<compile_context>
chip_gen: v7x
topology: tpu7x:2x2x1
jax: 0.10.0
libtpu: 0.0.40
codegen_flags: <defaults>
</compile_context>

<pallas_src>
import functools

import jax
import jax.numpy as jnp
from jax.experimental import pallas as pl
from jax.experimental.pallas import tpu as pltpu

BLOCK_SIZE = 32      # block_size in the PyTorch module (max sequence length)
N_EMBD = 384         # n_embd in the PyTorch module
NUM_HEADS = 6
HEAD_SIZE = N_EMBD // NUM_HEADS  # 64


def mha_kernel(x_ref, wqkv_ref, wp_ref, bp_ref, o_ref, *, num_heads):
    """One grid step = `bb` batch rows, all heads, fully fused projections."""
    bb, T, C = x_ref.shape
    HD = wp_ref.shape[0]          # num_heads * head_size
    hs = HD // num_heads
    M = bb * T

    # ---- fused QKV projection: one lane-dense GEMM ------------------------
    # bf16 operands (cast in wrapper / weight prep), f32 accumulation.
    # M = bb*T, K = 384, N = 1152.  Softmax scale is pre-folded into Q columns.
    xm = x_ref[...].reshape(M, C)
    qkv = jnp.dot(xm, wqkv_ref[...], preferred_element_type=jnp.float32)
    qkv16 = qkv.astype(jnp.bfloat16)      # single full-width cast, not per-head

    # Causal mask (torch.tril) — built and broadcast once, outside the head loop.
    row = jax.lax.broadcasted_iota(jnp.int32, (T, T), 0)
    col = jax.lax.broadcasted_iota(jnp.int32, (T, T), 1)
    causal = jnp.broadcast_to((row >= col)[None], (bb, T, T))
    neg_big = jnp.float32(-1e30)          # finite sentinel: no inf-inf NaN hazard

    # Output accumulator starts from the broadcast projection bias; each head
    # contributes a K=hs GEMM against its (sublane-aligned) row block of wp,
    # so the lane-axis concat of head outputs is eliminated entirely.
    y = jnp.broadcast_to(bp_ref[...], (M, C)).astype(jnp.float32)

    # Head loop is static (unrolled at trace time); per-head dots are
    # independent, so Mosaic schedules them back-to-back on the MXU.
    for h in range(num_heads):
        lo = h * hs
        q = qkv16[:, lo:lo + hs].reshape(bb, T, hs)
        k = qkv16[:, HD + lo:HD + lo + hs].reshape(bb, T, hs)
        v = qkv16[:, 2 * HD + lo:2 * HD + lo + hs].reshape(bb, T, hs)

        # scale already folded into the Q weight columns
        s = jnp.einsum('btd,bsd->bts', q, k,
                       preferred_element_type=jnp.float32)          # [bb,T,T]
        s = jnp.where(causal, s, neg_big)                           # masked_fill
        s = s - jnp.max(s, axis=-1, keepdims=True)                  # stable softmax
        p = jnp.exp(s)
        p = p * pl.reciprocal(jnp.sum(p, axis=-1, keepdims=True), approx=True)

        o_h = jnp.einsum('bts,bsd->btd', p.astype(jnp.bfloat16), v,
                         preferred_element_type=jnp.float32)        # [bb,T,hs]
        # accumulate this head's slice of the output projection (rows lo:lo+hs
        # of wp are 8-sublane aligned -> free slice, no concat needed)
        y = y + jnp.dot(o_h.reshape(M, hs).astype(jnp.bfloat16),
                        wp_ref[lo:lo + hs, :],
                        preferred_element_type=jnp.float32)

    o_ref[...] = y.reshape(bb, T, C).astype(o_ref.dtype)


def prepare_weights(wq, wk, wv, wp, bp, *, head_size=HEAD_SIZE):
    """One-time weight prep: fold softmax scale into Q, fuse Q|K|V, cast to bf16.

    Doing this outside the per-call wrapper means no cast / scale ops are
    re-emitted per invocation (review item: pass weights already in bf16).
    """
    scale = head_size ** -0.5
    wqkv = jnp.concatenate([wq * scale, wk, wv], axis=1).astype(jnp.bfloat16)
    return wqkv, wp.astype(jnp.bfloat16), bp.astype(jnp.float32)


def multi_head_attention(x, wqkv, wp, bp, *, num_heads=NUM_HEADS):
    """
    x    : [B, T, C]        float32 activations
    wqkv : [C, 3*H*hs]      fused Q|K|V projection weights (bf16, Q pre-scaled)
    wp   : [H*hs, C]        output projection weight (bf16, [in, out])
    bp   : [1, C]           output projection bias (f32)
    returns [B, T, C] in x.dtype
    """
    B, T, C = x.shape
    HD = wp.shape[0]
    out_dtype = x.dtype

    # bf16 activations: half the x DMA; f32 accumulation happens in-kernel.
    x16 = x.astype(jnp.bfloat16)

    # Only split the batch across grid steps if each step still gets a GEMM
    # M = bb*T >= 256 (worth feeding v7x's second TC).  On single-TC v5e/v6e a
    # split is just a serial loop with per-step overhead, and at the test
    # shape (B=2, T=32) splitting would halve an already-small M, so collapse
    # to a single step.
    if B % 2 == 0 and (B // 2) * T >= 256:
        bb, nb = B // 2, 2
    else:
        bb, nb = B, 1

    kernel = functools.partial(mha_kernel, num_heads=num_heads)
    return pl.pallas_call(
        kernel,
        out_shape=jax.ShapeDtypeStruct((B, T, C), out_dtype),
        grid_spec=pltpu.PrefetchScalarGridSpec(
            num_scalar_prefetch=0,
            grid=(nb,),
            in_specs=[
                pl.BlockSpec((bb, T, C), lambda i: (i, 0, 0)),    # x (batch block)
                # Weights/bias: constant index_map -> block-invariant, fetched
                # once, not re-DMA'd per grid step.
                pl.BlockSpec((C, 3 * HD), lambda i: (0, 0)),      # fused Wqkv
                pl.BlockSpec((HD, C), lambda i: (0, 0)),          # Wproj
                pl.BlockSpec((1, C), lambda i: (0, 0)),           # proj bias
            ],
            out_specs=pl.BlockSpec((bb, T, C), lambda i: (i, 0, 0)),
        ),
        compiler_params=pltpu.CompilerParams(
            dimension_semantics=("parallel",)),
    )(x16, wqkv, wp, bp)


# ----------------------------- references ----------------------------------

def reference_f32(x, wq, wk, wv, wp, bp, *, num_heads=NUM_HEADS):
    """Pure-f32 reference of the PyTorch forward (eval mode, dropout=identity)."""
    B, T, C = x.shape
    HD = wp.shape[0]
    hs = HD // num_heads
    q = (x @ wq).reshape(B, T, num_heads, hs)
    k = (x @ wk).reshape(B, T, num_heads, hs)
    v = (x @ wv).reshape(B, T, num_heads, hs)
    s = jnp.einsum('bthd,bshd->bhts', q, k) * (hs ** -0.5)
    tril = jnp.tril(jnp.ones((T, T), dtype=bool))
    s = jnp.where(tril, s, -jnp.inf)
    p = jax.nn.softmax(s, axis=-1)
    o = jnp.einsum('bhts,bshd->bthd', p, v).reshape(B, T, HD)
    return o @ wp + bp[0]


def reference_matched(x, wqkv, wp, bp, *, num_heads=NUM_HEADS):
    """Reference that mirrors the kernel's numerics (bf16 operands, f32 accum).

    Lets the correctness check use a tight tolerance instead of the loose
    bound needed when comparing bf16-operand output against pure f32.
    """
    B, T, C = x.shape
    HD = wp.shape[0]
    hs = HD // num_heads
    rb = lambda a: a.astype(jnp.bfloat16).astype(jnp.float32)   # round-to-bf16

    qkv = rb(x).reshape(B * T, C) @ wqkv.astype(jnp.float32)    # scale in wq
    q = rb(qkv[:, :HD]).reshape(B, T, num_heads, hs)
    k = rb(qkv[:, HD:2 * HD]).reshape(B, T, num_heads, hs)
    v = rb(qkv[:, 2 * HD:]).reshape(B, T, num_heads, hs)
    s = jnp.einsum('bthd,bshd->bhts', q, k)
    tril = jnp.tril(jnp.ones((T, T), dtype=bool))
    s = jnp.where(tril, s, -jnp.inf)
    p = jax.nn.softmax(s, axis=-1)
    o = jnp.einsum('bhts,bshd->bthd', rb(p), v).reshape(B * T, HD)
    y = rb(o) @ wp.astype(jnp.float32) + bp
    return y.reshape(B, T, C)


if __name__ == "__main__":
    B, T, C, H, hs = 2, BLOCK_SIZE, N_EMBD, NUM_HEADS, HEAD_SIZE
    HD = H * hs

    key = jax.random.PRNGKey(0)
    kx, kq, kk, kv, kp, kb = jax.random.split(key, 6)

    x = jax.random.normal(kx, (B, T, C), dtype=jnp.float32)
    # Deterministic synthetic weights (shapes match the nn.Linear layout).
    init_scale = C ** -0.5
    wq = jax.random.normal(kq, (C, HD), dtype=jnp.float32) * init_scale
    wk = jax.random.normal(kk, (C, HD), dtype=jnp.float32) * init_scale
    wv = jax.random.normal(kv, (C, HD), dtype=jnp.float32) * init_scale
    wp = jax.random.normal(kp, (HD, C), dtype=jnp.float32) * (HD ** -0.5)
    bp = jax.random.normal(kb, (1, C), dtype=jnp.float32) * 0.01

    # One-time weight prep (scale fold + bf16 cast), done outside the call.
    wqkv16, wp16, bp32 = prepare_weights(wq, wk, wv, wp, bp)

    out = multi_head_attention(x, wqkv16, wp16, bp32)
    out = jax.block_until_ready(out)
    assert out.shape == (B, T, C)

    # Tight check vs. a reference that matches the kernel's bf16/f32 numerics
    # (remaining delta: EUP exp + approx reciprocal + accumulation order).
    ref_m = reference_matched(x, wqkv16, wp16, bp32)
    assert jnp.allclose(out, ref_m, atol=1e-2, rtol=1e-2), \
        "mismatch vs bf16-matched reference"

    # Loose structural check vs. the pure-f32 module semantics.
    ref_f = reference_f32(x, wq, wk, wv, wp, bp)
    assert jnp.allclose(out, ref_f, atol=1e-1, rtol=1e-1), \
        "mismatch vs f32 reference"

    print("KERNEL_OK")
</pallas_src>

<mosaic_0001>
module attributes {stable_mosaic.version = 11 : i64} {
  func.func @mha_kernel(%arg0: i32, %arg1: memref<2x32x384xbf16, #tpu.memory_space<vmem>>, %arg2: memref<384x1152xbf16, #tpu.memory_space<vmem>>, %arg3: memref<384x384xbf16, #tpu.memory_space<vmem>>, %arg4: memref<1x384xf32, #tpu.memory_space<vmem>>, %arg5: memref<2x32x384xf32, #tpu.memory_space<vmem>>) attributes {dimension_semantics = [#tpu.dimension_semantics<parallel>], iteration_bounds = array<i64: 1>, scalar_prefetch = 0 : i64, scratch_operands = 0 : i64, tpu.core_type = #tpu.core_type<tc>, window_params = [{transform_indices = @transform_0, window_bounds = array<i64: 2, 32, 384>}, {pipeline_mode = #tpu.pipeline_mode<synchronous>, transform_indices = @transform_1, window_bounds = array<i64: 384, 1152>}, {pipeline_mode = #tpu.pipeline_mode<synchronous>, transform_indices = @transform_2, window_bounds = array<i64: 384, 384>}, {pipeline_mode = #tpu.pipeline_mode<synchronous>, transform_indices = @transform_3, window_bounds = array<i64: 1, 384>}, {transform_indices = @transform_4, window_bounds = array<i64: 2, 32, 384>}]} {
    %c0 = arith.constant 0 : index
    %c0_0 = arith.constant 0 : index
    %c0_1 = arith.constant 0 : index
    %0 = vector.load %arg1[%c0, %c0_0, %c0_1] : memref<2x32x384xbf16, #tpu.memory_space<vmem>>, vector<2x32x384xbf16>
    %1 = vector.shape_cast %0 : vector<2x32x384xbf16> to vector<64x384xbf16>
    %c0_2 = arith.constant 0 : index
    %c0_3 = arith.constant 0 : index
    %2 = vector.load %arg2[%c0_2, %c0_3] : memref<384x1152xbf16, #tpu.memory_space<vmem>>, vector<384x1152xbf16>
    %cst = arith.constant dense<0.000000e+00> : vector<64x1152xf32>
    %3 = tpu.matmul %1, %2, %cst {dimension_numbers = #tpu.dot_dimension_numbers<[1], [0], [0], [1], [0, 0, 1, 1], [], []>} : vector<64x384xbf16>, vector<384x1152xbf16>, vector<64x1152xf32> -> vector<64x1152xf32>
    %4 = arith.truncf %3 : vector<64x1152xf32> to vector<64x1152xbf16>
    %5 = tpu.iota {dimensions = array<i32: 0>} : vector<32x32xi32>
    %6 = tpu.iota {dimensions = array<i32: 1>} : vector<32x32xi32>
    %7 = arith.cmpi sge, %5, %6 : vector<32x32xi32>
    %8 = vector.shape_cast %7 : vector<32x32xi1> to vector<1x32x32xi1>
    %9 = vector.shape_cast %8 : vector<1x32x32xi1> to vector<1x32x32xi1>
    %10 = vector.broadcast %9 : vector<1x32x32xi1> to vector<2x32x32xi1>
    %c0_4 = arith.constant 0 : index
    %c0_5 = arith.constant 0 : index
    %11 = vector.load %arg4[%c0_4, %c0_5] : memref<1x384xf32, #tpu.memory_space<vmem>>, vector<1x384xf32>
    %12 = vector.shape_cast %11 : vector<1x384xf32> to vector<1x384xf32>
    %13 = vector.broadcast %12 : vector<1x384xf32> to vector<64x384xf32>
    %14 = vector.extract_strided_slice %4 {offsets = [0, 0], sizes = [64, 64], strides = [1, 1]} : vector<64x1152xbf16> to vector<64x64xbf16>
    %15 = vector.shape_cast %14 : vector<64x64xbf16> to vector<2x32x64xbf16>
    %16 = vector.extract_strided_slice %4 {offsets = [0, 384], sizes = [64, 64], strides = [1, 1]} : vector<64x1152xbf16> to vector<64x64xbf16>
    %17 = vector.shape_cast %16 : vector<64x64xbf16> to vector<2x32x64xbf16>
    %18 = vector.extract_strided_slice %4 {offsets = [0, 768], sizes = [64, 64], strides = [1, 1]} : vector<64x1152xbf16> to vector<64x64xbf16>
    %19 = vector.shape_cast %18 : vector<64x64xbf16> to vector<2x32x64xbf16>
    "tpu.trace_start"() <{level = 10 : i32, message = "btd,bsd->bts"}> : () -> ()
    %cst_6 = arith.constant dense<0.000000e+00> : vector<2x32x32xf32>
    %20 = tpu.matmul %15, %17, %cst_6 {dimension_numbers = #tpu.dot_dimension_numbers<[2], [2], [1], [1], [0, 0, 0, 1, 1, 1], [0], [0]>} : vector<2x32x64xbf16>, vector<2x32x64xbf16>, vector<2x32x32xf32> -> vector<2x32x32xf32>
    %cst_7 = arith.constant -1.000000e+30 : f32
    "tpu.trace_stop"() : () -> ()
    %21 = vector.broadcast %cst_7 : f32 to vector<2x32x32xf32>
    %22 = arith.select %10, %20, %21 : vector<2x32x32xi1>, vector<2x32x32xf32>
    %cst_8 = arith.constant dense<0xFF800000> : vector<2x32xf32>
    %23 = vector.multi_reduction <maximumf>, %22, %cst_8 [2] : vector<2x32x32xf32> to vector<2x32xf32>
    %24 = vector.shape_cast %23 : vector<2x32xf32> to vector<2x32x1xf32>
    %25 = vector.broadcast %24 : vector<2x32x1xf32> to vector<2x32x32xf32>
    %26 = arith.subf %22, %25 : vector<2x32x32xf32>
    %27 = math.exp %26 : vector<2x32x32xf32>
    %cst_9 = arith.constant dense<0.000000e+00> : vector<2x32xf32>
    %28 = vector.multi_reduction <add>, %27, %cst_9 [2] : vector<2x32x32xf32> to vector<2x32xf32>
    %29 = vector.shape_cast %28 : vector<2x32xf32> to vector<2x32x1xf32>
    %30 = tpu.reciprocal %29 {approx = true} : vector<2x32x1xf32> -> vector<2x32x1xf32>
    %31 = vector.broadcast %30 : vector<2x32x1xf32> to vector<2x32x32xf32>
    %32 = arith.mulf %27, %31 : vector<2x32x32xf32>
    %33 = arith.truncf %32 : vector<2x32x32xf32> to vector<2x32x32xbf16>
    "tpu.trace_start"() <{level = 10 : i32, message = "bts,bsd->btd"}> : () -> ()
    %cst_10 = arith.constant dense<0.000000e+00> : vector<2x32x64xf32>
    %34 = tpu.matmul %33, %19, %cst_10 {dimension_numbers = #tpu.dot_dimension_numbers<[2], [1], [1], [2], [0, 0, 0, 1, 1, 2], [0], [0]>} : vector<2x32x32xbf16>, vector<2x32x64xbf16>, vector<2x32x64xf32> -> vector<2x32x64xf32>
    "tpu.trace_stop"() : () -> ()
    %35 = vector.shape_cast %34 : vector<2x32x64xf32> to vector<64x64xf32>
    %36 = arith.truncf %35 : vector<64x64xf32> to vector<64x64xbf16>
    %c0_11 = arith.constant 0 : index
    %c0_12 = arith.constant 0 : index
    %37 = vector.load %arg3[%c0_11, %c0_12] : memref<384x384xbf16, #tpu.memory_space<vmem>>, vector<64x384xbf16>
    %cst_13 = arith.constant dense<0.000000e+00> : vector<64x384xf32>
    %38 = tpu.matmul %36, %37, %cst_13 {dimension_numbers = #tpu.dot_dimension_numbers<[1], [0], [0], [1], [0, 0, 1, 1], [], []>} : vector<64x64xbf16>, vector<64x384xbf16>, vector<64x384xf32> -> vector<64x384xf32>
    %39 = arith.addf %13, %38 : vector<64x384xf32>
    %40 = vector.extract_strided_slice %4 {offsets = [0, 64], sizes = [64, 64], strides = [1, 1]} : vector<64x1152xbf16> to vector<64x64xbf16>
    %41 = vector.shape_cast %40 : vector<64x64xbf16> to vector<2x32x64xbf16>
    %42 = vector.extract_strided_slice %4 {offsets = [0, 448], sizes = [64, 64], strides = [1, 1]} : vector<64x1152xbf16> to vector<64x64xbf16>
    %43 = vector.shape_cast %42 : vector<64x64xbf16> to vector<2x32x64xbf16>
    %44 = vector.extract_strided_slice %4 {offsets = [0, 832], sizes = [64, 64], strides = [1, 1]} : vector<64x1152xbf16> to vector<64x64xbf16>
    %45 = vector.shape_cast %44 : vector<64x64xbf16> to vector<2x32x64xbf16>
    "tpu.trace_start"() <{level = 10 : i32, message = "btd,bsd->bts"}> : () -> ()
    %cst_14 = arith.constant dense<0.000000e+00> : vector<2x32x32xf32>
    %46 = tpu.matmul %41, %43, %cst_14 {dimension_numbers = #tpu.dot_dimension_numbers<[2], [2], [1], [1], [0, 0, 0, 1, 1, 1], [0], [0]>} : vector<2x32x64xbf16>, vector<2x32x64xbf16>, vector<2x32x32xf32> -> vector<2x32x32xf32>
    %cst_15 = arith.constant -1.000000e+30 : f32
    "tpu.trace_stop"() : () -> ()
    %47 = vector.broadcast %cst_15 : f32 to vector<2x32x32xf32>
    %48 = arith.select %10, %46, %47 : vector<2x32x32xi1>, vector<2x32x32xf32>
    %cst_16 = arith.constant dense<0xFF800000> : vector<2x32xf32>
    %49 = vector.multi_reduction <maximumf>, %48, %cst_16 [2] : vector<2x32x32xf32> to vector<2x32xf32>
    %50 = vector.shape_cast %49 : vector<2x32xf32> to vector<2x32x1xf32>
    %51 = vector.broadcast %50 : vector<2x32x1xf32> to vector<2x32x32xf32>
    %52 = arith.subf %48, %51 : vector<2x32x32xf32>
    %53 = math.exp %52 : vector<2x32x32xf32>
    %cst_17 = arith.constant dense<0.000000e+00> : vector<2x32xf32>
    %54 = vector.multi_reduction <add>, %53, %cst_17 [2] : vector<2x32x32xf32> to vector<2x32xf32>
    %55 = vector.shape_cast %54 : vector<2x32xf32> to vector<2x32x1xf32>
    %56 = tpu.reciprocal %55 {approx = true} : vector<2x32x1xf32> -> vector<2x32x1xf32>
    %57 = vector.broadcast %56 : vector<2x32x1xf32> to vector<2x32x32xf32>
    %58 = arith.mulf %53, %57 : vector<2x32x32xf32>
    %59 = arith.truncf %58 : vector<2x32x32xf32> to vector<2x32x32xbf16>
    "tpu.trace_start"() <{level = 10 : i32, message = "bts,bsd->btd"}> : () -> ()
    %cst_18 = arith.constant dense<0.000000e+00> : vector<2x32x64xf32>
    %60 = tpu.matmul %59, %45, %cst_18 {dimension_numbers = #tpu.dot_dimension_numbers<[2], [1], [1], [2], [0, 0, 0, 1, 1, 2], [0], [0]>} : vector<2x32x32xbf16>, vector<2x32x64xbf16>, vector<2x32x64xf32> -> vector<2x32x64xf32>
    "tpu.trace_stop"() : () -> ()
    %61 = vector.shape_cast %60 : vector<2x32x64xf32> to vector<64x64xf32>
    %62 = arith.truncf %61 : vector<64x64xf32> to vector<64x64xbf16>
    %c64 = arith.constant 64 : index
    %c0_19 = arith.constant 0 : index
    %63 = vector.load %arg3[%c64, %c0_19] : memref<384x384xbf16, #tpu.memory_space<vmem>>, vector<64x384xbf16>
    %cst_20 = arith.constant dense<0.000000e+00> : vector<64x384xf32>
    %64 = tpu.matmul %62, %63, %cst_20 {dimension_numbers = #tpu.dot_dimension_numbers<[1], [0], [0], [1], [0, 0, 1, 1], [], []>} : vector<64x64xbf16>, vector<64x384xbf16>, vector<64x384xf32> -> vector<64x384xf32>
    %65 = arith.addf %39, %64 : vector<64x384xf32>
    %66 = vector.extract_strided_slice %4 {offsets = [0, 128], sizes = [64, 64], strides = [1, 1]} : vector<64x1152xbf16> to vector<64x64xbf16>
    %67 = vector.shape_cast %66 : vector<64x64xbf16> to vector<2x32x64xbf16>
    %68 = vector.extract_strided_slice %4 {offsets = [0, 512], sizes = [64, 64], strides = [1, 1]} : vector<64x1152xbf16> to vector<64x64xbf16>
    %69 = vector.shape_cast %68 : vector<64x64xbf16> to vector<2x32x64xbf16>
    %70 = vector.extract_strided_slice %4 {offsets = [0, 896], sizes = [64, 64], strides = [1, 1]} : vector<64x1152xbf16> to vector<64x64xbf16>
    %71 = vector.shape_cast %70 : vector<64x64xbf16> to vector<2x32x64xbf16>
    "tpu.trace_start"() <{level = 10 : i32, message = "btd,bsd->bts"}> : () -> ()
    %cst_21 = arith.constant dense<0.000000e+00> : vector<2x32x32xf32>
    %72 = tpu.matmul %67, %69, %cst_21 {dimension_numbers = #tpu.dot_dimension_numbers<[2], [2], [1], [1], [0, 0, 0, 1, 1, 1], [0], [0]>} : vector<2x32x64xbf16>, vector<2x32x64xbf16>, vector<2x32x32xf32> -> vector<2x32x32xf32>
    %cst_22 = arith.constant -1.000000e+30 : f32
    "tpu.trace_stop"() : () -> ()
    %73 = vector.broadcast %cst_22 : f32 to vector<2x32x32xf32>
    %74 = arith.select %10, %72, %73 : vector<2x32x32xi1>, vector<2x32x32xf32>
    %cst_23 = arith.constant dense<0xFF800000> : vector<2x32xf32>
    %75 = vector.multi_reduction <maximumf>, %74, %cst_23 [2] : vector<2x32x32xf32> to vector<2x32xf32>
    %76 = vector.shape_cast %75 : vector<2x32xf32> to vector<2x32x1xf32>
    %77 = vector.broadcast %76 : vector<2x32x1xf32> to vector<2x32x32xf32>
    %78 = arith.subf %74, %77 : vector<2x32x32xf32>
    %79 = math.exp %78 : vector<2x32x32xf32>
    %cst_24 = arith.constant dense<0.000000e+00> : vector<2x32xf32>
    %80 = vector.multi_reduction <add>, %79, %cst_24 [2] : vector<2x32x32xf32> to vector<2x32xf32>
    %81 = vector.shape_cast %80 : vector<2x32xf32> to vector<2x32x1xf32>
    %82 = tpu.reciprocal %81 {approx = true} : vector<2x32x1xf32> -> vector<2x32x1xf32>
    %83 = vector.broadcast %82 : vector<2x32x1xf32> to vector<2x32x32xf32>
    %84 = arith.mulf %79, %83 : vector<2x32x32xf32>
    %85 = arith.truncf %84 : vector<2x32x32xf32> to vector<2x32x32xbf16>
    "tpu.trace_start"() <{level = 10 : i32, message = "bts,bsd->btd"}> : () -> ()
    %cst_25 = arith.constant dense<0.000000e+00> : vector<2x32x64xf32>
    %86 = tpu.matmul %85, %71, %cst_25 {dimension_numbers = #tpu.dot_dimension_numbers<[2], [1], [1], [2], [0, 0, 0, 1, 1, 2], [0], [0]>} : vector<2x32x32xbf16>, vector<2x32x64xbf16>, vector<2x32x64xf32> -> vector<2x32x64xf32>
    "tpu.trace_stop"() : () -> ()
    %87 = vector.shape_cast %86 : vector<2x32x64xf32> to vector<64x64xf32>
    %88 = arith.truncf %87 : vector<64x64xf32> to vector<64x64xbf16>
    %c128 = arith.constant 128 : index
    %c0_26 = arith.constant 0 : index
    %89 = vector.load %arg3[%c128, %c0_26] : memref<384x384xbf16, #tpu.memory_space<vmem>>, vector<64x384xbf16>
    %cst_27 = arith.constant dense<0.000000e+00> : vector<64x384xf32>
    %90 = tpu.matmul %88, %89, %cst_27 {dimension_numbers = #tpu.dot_dimension_numbers<[1], [0], [0], [1], [0, 0, 1, 1], [], []>} : vector<64x64xbf16>, vector<64x384xbf16>, vector<64x384xf32> -> vector<64x384xf32>
    %91 = arith.addf %65, %90 : vector<64x384xf32>
    %92 = vector.extract_strided_slice %4 {offsets = [0, 192], sizes = [64, 64], strides = [1, 1]} : vector<64x1152xbf16> to vector<64x64xbf16>
    %93 = vector.shape_cast %92 : vector<64x64xbf16> to vector<2x32x64xbf16>
    %94 = vector.extract_strided_slice %4 {offsets = [0, 576], sizes = [64, 64], strides = [1, 1]} : vector<64x1152xbf16> to vector<64x64xbf16>
    %95 = vector.shape_cast %94 : vector<64x64xbf16> to vector<2x32x64xbf16>
    %96 = vector.extract_strided_slice %4 {offsets = [0, 960], sizes = [64, 64], strides = [1, 1]} : vector<64x1152xbf16> to vector<64x64xbf16>
    %97 = vector.shape_cast %96 : vector<64x64xbf16> to vector<2x32x64xbf16>
    "tpu.trace_start"() <{level = 10 : i32, message = "btd,bsd->bts"}> : () -> ()
    %cst_28 = arith.constant dense<0.000000e+00> : vector<2x32x32xf32>
    %98 = tpu.matmul %93, %95, %cst_28 {dimension_numbers = #tpu.dot_dimension_numbers<[2], [2], [1], [1], [0, 0, 0, 1, 1, 1], [0], [0]>} : vector<2x32x64xbf16>, vector<2x32x64xbf16>, vector<2x32x32xf32> -> vector<2x32x32xf32>
    %cst_29 = arith.constant -1.000000e+30 : f32
    "tpu.trace_stop"() : () -> ()
    %99 = vector.broadcast %cst_29 : f32 to vector<2x32x32xf32>
    %100 = arith.select %10, %98, %99 : vector<2x32x32xi1>, vector<2x32x32xf32>
    %cst_30 = arith.constant dense<0xFF800000> : vector<2x32xf32>
    %101 = vector.multi_reduction <maximumf>, %100, %cst_30 [2] : vector<2x32x32xf32> to vector<2x32xf32>
    %102 = vector.shape_cast %101 : vector<2x32xf32> to vector<2x32x1xf32>
    %103 = vector.broadcast %102 : vector<2x32x1xf32> to vector<2x32x32xf32>
    %104 = arith.subf %100, %103 : vector<2x32x32xf32>
    %105 = math.exp %104 : vector<2x32x32xf32>
    %cst_31 = arith.constant dense<0.000000e+00> : vector<2x32xf32>
    %106 = vector.multi_reduction <add>, %105, %cst_31 [2] : vector<2x32x32xf32> to vector<2x32xf32>
    %107 = vector.shape_cast %106 : vector<2x32xf32> to vector<2x32x1xf32>
    %108 = tpu.reciprocal %107 {approx = true} : vector<2x32x1xf32> -> vector<2x32x1xf32>
    %109 = vector.broadcast %108 : vector<2x32x1xf32> to vector<2x32x32xf32>
    %110 = arith.mulf %105, %109 : vector<2x32x32xf32>
    %111 = arith.truncf %110 : vector<2x32x32xf32> to vector<2x32x32xbf16>
    "tpu.trace_start"() <{level = 10 : i32, message = "bts,bsd->btd"}> : () -> ()
    %cst_32 = arith.constant dense<0.000000e+00> : vector<2x32x64xf32>
    %112 = tpu.matmul %111, %97, %cst_32 {dimension_numbers = #tpu.dot_dimension_numbers<[2], [1], [1], [2], [0, 0, 0, 1, 1, 2], [0], [0]>} : vector<2x32x32xbf16>, vector<2x32x64xbf16>, vector<2x32x64xf32> -> vector<2x32x64xf32>
    "tpu.trace_stop"() : () -> ()
    %113 = vector.shape_cast %112 : vector<2x32x64xf32> to vector<64x64xf32>
    %114 = arith.truncf %113 : vector<64x64xf32> to vector<64x64xbf16>
    %c192 = arith.constant 192 : index
    %c0_33 = arith.constant 0 : index
    %115 = vector.load %arg3[%c192, %c0_33] : memref<384x384xbf16, #tpu.memory_space<vmem>>, vector<64x384xbf16>
    %cst_34 = arith.constant dense<0.000000e+00> : vector<64x384xf32>
    %116 = tpu.matmul %114, %115, %cst_34 {dimension_numbers = #tpu.dot_dimension_numbers<[1], [0], [0], [1], [0, 0, 1, 1], [], []>} : vector<64x64xbf16>, vector<64x384xbf16>, vector<64x384xf32> -> vector<64x384xf32>
    %117 = arith.addf %91, %116 : vector<64x384xf32>
    %118 = vector.extract_strided_slice %4 {offsets = [0, 256], sizes = [64, 64], strides = [1, 1]} : vector<64x1152xbf16> to vector<64x64xbf16>
    %119 = vector.shape_cast %118 : vector<64x64xbf16> to vector<2x32x64xbf16>
    %120 = vector.extract_strided_slice %4 {offsets = [0, 640], sizes = [64, 64], strides = [1, 1]} : vector<64x1152xbf16> to vector<64x64xbf16>
    %121 = vector.shape_cast %120 : vector<64x64xbf16> to vector<2x32x64xbf16>
    %122 = vector.extract_strided_slice %4 {offsets = [0, 1024], sizes = [64, 64], strides = [1, 1]} : vector<64x1152xbf16> to vector<64x64xbf16>
    %123 = vector.shape_cast %122 : vector<64x64xbf16> to vector<2x32x64xbf16>
    "tpu.trace_start"() <{level = 10 : i32, message = "btd,bsd->bts"}> : () -> ()
    %cst_35 = arith.constant dense<0.000000e+00> : vector<2x32x32xf32>
    %124 = tpu.matmul %119, %121, %cst_35 {dimension_numbers = #tpu.dot_dimension_numbers<[2], [2], [1], [1], [0, 0, 0, 1, 1, 1], [0], [0]>} : vector<2x32x64xbf16>, vector<2x32x64xbf16>, vector<2x32x32xf32> -> vector<2x32x32xf32>
    %cst_36 = arith.constant -1.000000e+30 : f32
    "tpu.trace_stop"() : () -> ()
    %125 = vector.broadcast %cst_36 : f32 to vector<2x32x32xf32>
    %126 = arith.select %10, %124, %125 : vector<2x32x32xi1>, vector<2x32x32xf32>
    %cst_37 = arith.constant dense<0xFF800000> : vector<2x32xf32>
    %127 = vector.multi_reduction <maximumf>, %126, %cst_37 [2] : vector<2x32x32xf32> to vector<2x32xf32>
    %128 = vector.shape_cast %127 : vector<2x32xf32> to vector<2x32x1xf32>
    %129 = vector.broadcast %128 : vector<2x32x1xf32> to vector<2x32x32xf32>
    %130 = arith.subf %126, %129 : vector<2x32x32xf32>
    %131 = math.exp %130 : vector<2x32x32xf32>
    %cst_38 = arith.constant dense<0.000000e+00> : vector<2x32xf32>
    %132 = vector.multi_reduction <add>, %131, %cst_38 [2] : vector<2x32x32xf32> to vector<2x32xf32>
    %133 = vector.shape_cast %132 : vector<2x32xf32> to vector<2x32x1xf32>
    %134 = tpu.reciprocal %133 {approx = true} : vector<2x32x1xf32> -> vector<2x32x1xf32>
    %135 = vector.broadcast %134 : vector<2x32x1xf32> to vector<2x32x32xf32>
    %136 = arith.mulf %131, %135 : vector<2x32x32xf32>
    %137 = arith.truncf %136 : vector<2x32x32xf32> to vector<2x32x32xbf16>
    "tpu.trace_start"() <{level = 10 : i32, message = "bts,bsd->btd"}> : () -> ()
    %cst_39 = arith.constant dense<0.000000e+00> : vector<2x32x64xf32>
    %138 = tpu.matmul %137, %123, %cst_39 {dimension_numbers = #tpu.dot_dimension_numbers<[2], [1], [1], [2], [0, 0, 0, 1, 1, 2], [0], [0]>} : vector<2x32x32xbf16>, vector<2x32x64xbf16>, vector<2x32x64xf32> -> vector<2x32x64xf32>
    "tpu.trace_stop"() : () -> ()
    %139 = vector.shape_cast %138 : vector<2x32x64xf32> to vector<64x64xf32>
    %140 = arith.truncf %139 : vector<64x64xf32> to vector<64x64xbf16>
    %c256 = arith.constant 256 : index
    %c0_40 = arith.constant 0 : index
    %141 = vector.load %arg3[%c256, %c0_40] : memref<384x384xbf16, #tpu.memory_space<vmem>>, vector<64x384xbf16>
    %cst_41 = arith.constant dense<0.000000e+00> : vector<64x384xf32>
    %142 = tpu.matmul %140, %141, %cst_41 {dimension_numbers = #tpu.dot_dimension_numbers<[1], [0], [0], [1], [0, 0, 1, 1], [], []>} : vector<64x64xbf16>, vector<64x384xbf16>, vector<64x384xf32> -> vector<64x384xf32>
    %143 = arith.addf %117, %142 : vector<64x384xf32>
    %144 = vector.extract_strided_slice %4 {offsets = [0, 320], sizes = [64, 64], strides = [1, 1]} : vector<64x1152xbf16> to vector<64x64xbf16>
    %145 = vector.shape_cast %144 : vector<64x64xbf16> to vector<2x32x64xbf16>
    %146 = vector.extract_strided_slice %4 {offsets = [0, 704], sizes = [64, 64], strides = [1, 1]} : vector<64x1152xbf16> to vector<64x64xbf16>
    %147 = vector.shape_cast %146 : vector<64x64xbf16> to vector<2x32x64xbf16>
    %148 = vector.extract_strided_slice %4 {offsets = [0, 1088], sizes = [64, 64], strides = [1, 1]} : vector<64x1152xbf16> to vector<64x64xbf16>
    %149 = vector.shape_cast %148 : vector<64x64xbf16> to vector<2x32x64xbf16>
    "tpu.trace_start"() <{level = 10 : i32, message = "btd,bsd->bts"}> : () -> ()
    %cst_42 = arith.constant dense<0.000000e+00> : vector<2x32x32xf32>
    %150 = tpu.matmul %145, %147, %cst_42 {dimension_numbers = #tpu.dot_dimension_numbers<[2], [2], [1], [1], [0, 0, 0, 1, 1, 1], [0], [0]>} : vector<2x32x64xbf16>, vector<2x32x64xbf16>, vector<2x32x32xf32> -> vector<2x32x32xf32>
    %cst_43 = arith.constant -1.000000e+30 : f32
    "tpu.trace_stop"() : () -> ()
    %151 = vector.broadcast %cst_43 : f32 to vector<2x32x32xf32>
    %152 = arith.select %10, %150, %151 : vector<2x32x32xi1>, vector<2x32x32xf32>
    %cst_44 = arith.constant dense<0xFF800000> : vector<2x32xf32>
    %153 = vector.multi_reduction <maximumf>, %152, %cst_44 [2] : vector<2x32x32xf32> to vector<2x32xf32>
    %154 = vector.shape_cast %153 : vector<2x32xf32> to vector<2x32x1xf32>
    %155 = vector.broadcast %154 : vector<2x32x1xf32> to vector<2x32x32xf32>
    %156 = arith.subf %152, %155 : vector<2x32x32xf32>
    %157 = math.exp %156 : vector<2x32x32xf32>
    %cst_45 = arith.constant dense<0.000000e+00> : vector<2x32xf32>
    %158 = vector.multi_reduction <add>, %157, %cst_45 [2] : vector<2x32x32xf32> to vector<2x32xf32>
    %159 = vector.shape_cast %158 : vector<2x32xf32> to vector<2x32x1xf32>
    %160 = tpu.reciprocal %159 {approx = true} : vector<2x32x1xf32> -> vector<2x32x1xf32>
    %161 = vector.broadcast %160 : vector<2x32x1xf32> to vector<2x32x32xf32>
    %162 = arith.mulf %157, %161 : vector<2x32x32xf32>
    %163 = arith.truncf %162 : vector<2x32x32xf32> to vector<2x32x32xbf16>
    "tpu.trace_start"() <{level = 10 : i32, message = "bts,bsd->btd"}> : () -> ()
    %cst_46 = arith.constant dense<0.000000e+00> : vector<2x32x64xf32>
    %164 = tpu.matmul %163, %149, %cst_46 {dimension_numbers = #tpu.dot_dimension_numbers<[2], [1], [1], [2], [0, 0, 0, 1, 1, 2], [0], [0]>} : vector<2x32x32xbf16>, vector<2x32x64xbf16>, vector<2x32x64xf32> -> vector<2x32x64xf32>
    "tpu.trace_stop"() : () -> ()
    %165 = vector.shape_cast %164 : vector<2x32x64xf32> to vector<64x64xf32>
    %166 = arith.truncf %165 : vector<64x64xf32> to vector<64x64xbf16>
    %c320 = arith.constant 320 : index
    %c0_47 = arith.constant 0 : index
    %167 = vector.load %arg3[%c320, %c0_47] : memref<384x384xbf16, #tpu.memory_space<vmem>>, vector<64x384xbf16>
    %cst_48 = arith.constant dense<0.000000e+00> : vector<64x384xf32>
    %168 = tpu.matmul %166, %167, %cst_48 {dimension_numbers = #tpu.dot_dimension_numbers<[1], [0], [0], [1], [0, 0, 1, 1], [], []>} : vector<64x64xbf16>, vector<64x384xbf16>, vector<64x384xf32> -> vector<64x384xf32>
    %169 = arith.addf %143, %168 : vector<64x384xf32>
    %170 = vector.shape_cast %169 : vector<64x384xf32> to vector<2x32x384xf32>
    %c0_49 = arith.constant 0 : index
    %c0_50 = arith.constant 0 : index
    %c0_51 = arith.constant 0 : index
    %171 = vector.load %arg5[%c0_49, %c0_50, %c0_51] : memref<2x32x384xf32, #tpu.memory_space<vmem>>, vector<2x32x384xf32>
    tpu.vector_store %arg5[%c0_49, %c0_50, %c0_51], %170 {strides = array<i32>} : memref<2x32x384xf32, #tpu.memory_space<vmem>>, vector<2x32x384xf32>,
    return
  }
  func.func @transform_0(%arg0: i32) -> (i32, i32, i32) {
    %c0_i32 = arith.constant 0 : i32
    %c0_i32_0 = arith.constant 0 : i32
    %c0_i32_1 = arith.constant 0 : i32
    return %arg0, %c0_i32, %c0_i32_0 : i32, i32, i32
  }
  func.func @transform_1(%arg0: i32) -> (i32, i32) {
    %c0_i32 = arith.constant 0 : i32
    %c0_i32_0 = arith.constant 0 : i32
    %c0_i32_1 = arith.constant 0 : i32
    return %c0_i32, %c0_i32_0 : i32, i32
  }
  func.func @transform_2(%arg0: i32) -> (i32, i32) {
    %c0_i32 = arith.constant 0 : i32
    %c0_i32_0 = arith.constant 0 : i32
    %c0_i32_1 = arith.constant 0 : i32
    return %c0_i32, %c0_i32_0 : i32, i32
  }
  func.func @transform_3(%arg0: i32) -> (i32, i32) {
    %c0_i32 = arith.constant 0 : i32
    %c0_i32_0 = arith.constant 0 : i32
    %c0_i32_1 = arith.constant 0 : i32
    return %c0_i32, %c0_i32_0 : i32, i32
  }
  func.func @transform_4(%arg0: i32) -> (i32, i32, i32) {
    %c0_i32 = arith.constant 0 : i32
    %c0_i32_0 = arith.constant 0 : i32
    %c0_i32_1 = arith.constant 0 : i32
    return %arg0, %c0_i32, %c0_i32_0 : i32, i32, i32
  }
}

</mosaic_0001>

<bundles_post_ra>
// kernel: tpu_custom_call.1
= control target key start
LH: loop header
LB: loop body
LE: loop exit
PB: predicated region body
PF: predicated region fallthrough
CT: control target
= control target key end

     0   :  { %9 = vsyncpa [#allocation3], 0  ;;  %s8777_s0 = inlined_call_operand.hbm [shape: bf16[2,32,384], index: 0, kind: input, shape index: {}]   ;;  %s8778_s1 = inlined_call_operand.hbm [shape: bf16[384,1152], index: 1, kind: input, shape index: {}]   ;;  %s8779_s2 = inlined_call_operand.hbm [shape: bf16[384,384], index: 2, kind: input, shape index: {}]   ;;  %s8780_s3 = inlined_call_operand.vmem [shape: f32[1,384], index: 3, kind: input, shape index: {}]   ;;  %s8781_s4 = inlined_call_operand.hbm [shape: f32[2,32,384], index: 4, kind: output, shape index: {}]  }
   0x1   :  { %10 = vsyncpa [#allocation6], 0 }
   0x2   :  { %11 = vsyncpa [#allocation4], 0  ;;  %s7840_s15 = smov [#allocation5]   ;;  %s7746_s19 = scalar_lea.hbm %s8778_s1, 27648 }
   0x3   :  { %s29_s16 = sshll.u32 %s7840_s15, 4  ;;  %p7747_p0 = scmp.ne.s32.totalorder %s8778_s1, %s7746_s19  ;;  %s30_s16 = int_to_ptr.vmem [resolvable:$true] %s29_s16 }
   0x4   :  { %p7750_p1 = scmp.lt.u32.totalorder %s7746_s19, %s8778_s1 }
   0x6   :  { %p7752_p2 = pnand %p7750_p1, %p7747_p0 }
   0x8   :  { %7755 = shalt.err (!%p7752_p2)
}
   0x9   :  { %s7756_s24 = scalar_lea.vmem %s30_s16, 27648  ;;  %p7761_p4 = scmp.lt.s32.totalorder %s30_s16, %s30_s16 }
   0xa   :  { %p7757_p3 = scmp.ne.s32.totalorder %s30_s16, %s7756_s24  ;;  %p7762_p5 = scmp.lt.s32.totalorder %s7756_s24, %s7756_s24 }
   0xc   :  { %p7763_p6 = por %p7762_p5, %p7761_p4 }
   0xe   :  { %p7764_p7 = pnand %p7763_p6, %p7757_p3 }
  0x10   :  { %7767 = shalt.err (!%p7764_p7)
}
  0x11   :  { %s7841_s25 = smov 576   ;;  %s7842_s26 = smov 36  }
  0x12   :  { %35 = dma.hbm_to_vmem [thread:$0]  %s8778_s1, 27648, %s30_s16, [#allocation6], %s7841_s25, %s7841_s25, %s7842_s26  }
  0x13   :  { %s7843_s29 = smov [#allocation2]   ;;  %s7768_s7 = scalar_lea.hbm %s8777_s0, 1536 }
  0x14   :  { %s17_s30 = sshll.u32 %s7843_s29, 4  ;;  %p7769_p8 = scmp.ne.s32.totalorder %s8777_s0, %s7768_s7  ;;  %s18_s30 = int_to_ptr.vmem [resolvable:$true] %s17_s30 }
  0x15   :  { %p7772_p9 = scmp.lt.u32.totalorder %s7768_s7, %s8777_s0 }
  0x17   :  { %p7774_p10 = pnand %p7772_p9, %p7769_p8 }
  0x19   :  { %7777 = shalt.err (!%p7774_p10)
}
  0x1a   :  { %s7778_s12 = scalar_lea.vmem %s18_s30, 1536  ;;  %p7783_p12 = scmp.lt.s32.totalorder %s18_s30, %s18_s30 }
  0x1b   :  { %p7779_p11 = scmp.ne.s32.totalorder %s18_s30, %s7778_s12  ;;  %p7784_p13 = scmp.lt.s32.totalorder %s7778_s12, %s7778_s12 }
  0x1d   :  { %p7785_p0 = por %p7784_p13, %p7783_p12 }
  0x1f   :  { %p7786_p1 = pnand %p7785_p0, %p7779_p11 }
  0x21   :  { %7789 = shalt.err (!%p7786_p1)
}
  0x22   :  { %s7844_s1 = smov 192   ;;  %s7845_s13 = smov 12  }
  0x23   :  { %23 = dma.hbm_to_vmem [thread:$0]  %s8777_s0, 1536, %s18_s30, [#allocation3], %s7844_s1, %s7844_s1, %s7845_s13  }
  0x24   :  { %s7846_s16 = smov [#allocation7]   ;;  %s7790_s20 = scalar_lea.hbm %s8779_s2, 9216 }
  0x25   :  { %s41_s17 = sshll.u32 %s7846_s16, 4  ;;  %p7791_p2 = scmp.ne.s32.totalorder %s8779_s2, %s7790_s20  ;;  %s42_s17 = int_to_ptr.vmem [resolvable:$true] %s41_s17 }
  0x26   :  { %p7794_p3 = scmp.lt.u32.totalorder %s7790_s20, %s8779_s2 }
  0x28   :  { %p7796_p4 = pnand %p7794_p3, %p7791_p2 }
  0x2a   :  { %7799 = shalt.err (!%p7796_p4)
}
  0x2b   :  { %s7800_s25 = scalar_lea.vmem %s42_s17, 9216  ;;  %p7805_p6 = scmp.lt.s32.totalorder %s42_s17, %s42_s17 }
  0x2c   :  { %p7801_p5 = scmp.ne.s32.totalorder %s42_s17, %s7800_s25  ;;  %p7806_p7 = scmp.lt.s32.totalorder %s7800_s25, %s7800_s25 }
  0x2e   :  { %p7807_p8 = por %p7806_p7, %p7805_p6 }
  0x30   :  { %p7808_p9 = pnand %p7807_p8, %p7801_p5 }
  0x32   :  { %7811 = shalt.err (!%p7808_p9)
}
  0x33   :  { %47 = dma.hbm_to_vmem [thread:$0]  %s8779_s2, 9216, %s42_s17, [#allocation6], %s7844_s1, %s7844_s1, %s7845_s13  }
  0x34   :  { %7834 = dma.done.wait [#allocation3], 1536  }
  0x35   :  { %7835 = vsyncadd [#allocation3], 4294965760 }
  0x36   :  { %7836 = dma.done.wait [#allocation6], 36864  }
  0x37   :  { %7837 = vsyncadd [#allocation6], 4294930432  ;;  %v7122_v0 = vld [vmem:[#allocation5 + $0x4] ss:$36 sps:$4 sm:$0xff]   ;;  %v7124_v1 = vld [vmem:[#allocation5 + $0xc] ss:$36 sps:$4 sm:$0xff]  }
  0x38   :  { %1484 = vmatprep.subr.bf16.mxu0 %v7122_v0  ;;  %v7126_v2 = vld [vmem:[#allocation5] ss:$36 sps:$4 sm:$0xff]   ;;  %v7127_v3 = vld [vmem:[#allocation5 + $0x8] ss:$36 sps:$4 sm:$0xff]   ;;  %1630 = vmatprep.subr.bf16.mxu1 %v7124_v1  ;;  %v7130_v5 = vld [vmem:[#allocation5 + $0x54] ss:$36 sps:$4 sm:$0xff]  }
  0x39   :  { %v7128_v4 = vld [vmem:[#allocation5 + $0x4c] ss:$36 sps:$4 sm:$0xff]   ;;  %1485 = vmatpush1.bf16.msra.mxu0 %v7126_v2  ;;  %1631 = vmatpush1.bf16.msra.mxu1 %v7127_v3  ;;  %v7134_v8 = vld [vmem:[#allocation5 + $0x94] ss:$36 sps:$4 sm:$0xff]   ;;  %v7136_v9 = vld [vmem:[#allocation5 + $0x9c] ss:$36 sps:$4 sm:$0xff]  }
  0x3a   :  { %v7132_v6 = vld [vmem:[#allocation5 + $0x48] ss:$36 sps:$4 sm:$0xff]   ;;  %1486 = vmatprep.subr.bf16.mxu0 %v7128_v4  ;;  %v7133_v7 = vld [vmem:[#allocation5 + $0x50] ss:$36 sps:$4 sm:$0xff]   ;;  %1632 = vmatprep.subr.bf16.mxu1 %v7130_v5  ;;  %v7139_v11 = vld [vmem:[#allocation5 + $0x98] ss:$36 sps:$4 sm:$0xff]  }
  0x3b   :  { %v7138_v10 = vld [vmem:[#allocation5 + $0x90] ss:$36 sps:$4 sm:$0xff]   ;;  %v7140_v12 = vld [vmem:[#allocation5 + $0xdc] ss:$36 sps:$4 sm:$0xff]   ;;  %v7142_v13 = vld [vmem:[#allocation5 + $0xe4] ss:$36 sps:$4 sm:$0xff]  }
  0x3c   :  { %v7144_v14 = vld [vmem:[#allocation5 + $0xd8] ss:$36 sps:$4 sm:$0xff]   ;;  %v7145_v15 = vld [vmem:[#allocation5 + $0xe0] ss:$36 sps:$4 sm:$0xff]   ;;  %v7148_v17 = vld [vmem:[#allocation5 + $0x12c] ss:$36 sps:$4 sm:$0xff]  }
  0x3d   :  { %1487 = vmatpush1.bf16.msra.mxu0 %v7132_v6  ;;  %1633 = vmatpush1.bf16.msra.mxu1 %v7133_v7  ;;  %v7146_v16 = vld [vmem:[#allocation5 + $0x124] ss:$36 sps:$4 sm:$0xff]   ;;  %v7152_v20 = vld [vmem:[#allocation5 + $0x16c] ss:$36 sps:$4 sm:$0xff]   ;;  %v7154_v21 = vld [vmem:[#allocation5 + $0x174] ss:$36 sps:$4 sm:$0xff]  }
  0x3e   :  { %1488 = vmatprep.subr.bf16.mxu0 %v7134_v8  ;;  %1634 = vmatprep.subr.bf16.mxu1 %v7136_v9  ;;  %v7150_v18 = vld [vmem:[#allocation5 + $0x120] ss:$36 sps:$4 sm:$0xff]   ;;  %v7151_v19 = vld [vmem:[#allocation5 + $0x128] ss:$36 sps:$4 sm:$0xff]   ;;  %v7157_v23 = vld [vmem:[#allocation5 + $0x170] ss:$36 sps:$4 sm:$0xff]  }
  0x3f   :  { %v7156_v22 = vld [vmem:[#allocation5 + $0x168] ss:$36 sps:$4 sm:$0xff]   ;;  %v7158_v24 = vld [vmem:[#allocation5 + $0x1b4] ss:$36 sps:$4 sm:$0xff]   ;;  %v7160_v25 = vld [vmem:[#allocation5 + $0x1bc] ss:$36 sps:$4 sm:$0xff]  }
  0x40   :  { %v7162_v26 = vld [vmem:[#allocation5 + $0x1b0] ss:$36 sps:$4 sm:$0xff]   ;;  %v7163_v27 = vld [vmem:[#allocation5 + $0x1b8] ss:$36 sps:$4 sm:$0xff]   ;;  %v7166_v29 = vld [vmem:[#allocation5 + $0x204] ss:$36 sps:$4 sm:$0xff]  }
  0x41   :  { %1489 = vmatpush1.bf16.msra.mxu0 %v7138_v10  ;;  %1635 = vmatpush1.bf16.msra.mxu1 %v7139_v11  ;;  %v7164_v28 = vld [vmem:[#allocation5 + $0x1fc] ss:$36 sps:$4 sm:$0xff]   ;;  %v7170_v32 = vld [vmem:[#allocation5 + $0x244] ss:$36 sps:$4 sm:$0xff]   ;;  %v7172_v33 = vld [vmem:[#allocation5 + $0x24c] ss:$36 sps:$4 sm:$0xff]  }
  0x42   :  { %1490 = vmatprep.subr.bf16.mxu0 %v7140_v12  ;;  %1636 = vmatprep.subr.bf16.mxu1 %v7142_v13  ;;  %v7168_v30 = vld [vmem:[#allocation5 + $0x1f8] ss:$36 sps:$4 sm:$0xff]   ;;  %v7169_v31 = vld [vmem:[#allocation5 + $0x200] ss:$36 sps:$4 sm:$0xff]   ;;  %v7175_v35 = vld [vmem:[#allocation5 + $0x248] ss:$36 sps:$4 sm:$0xff]  }
  0x43   :  { %v7174_v34 = vld [vmem:[#allocation5 + $0x240] ss:$36 sps:$4 sm:$0xff]   ;;  %v7176_v36 = vld [vmem:[#allocation5 + $0x28c] ss:$36 sps:$4 sm:$0xff]   ;;  %v7178_v37 = vld [vmem:[#allocation5 + $0x294] ss:$36 sps:$4 sm:$0xff]  }
  0x44   :  { %v7180_v38 = vld [vmem:[#allocation5 + $0x288] ss:$36 sps:$4 sm:$0xff]   ;;  %v7181_v39 = vld [vmem:[#allocation5 + $0x290] ss:$36 sps:$4 sm:$0xff]   ;;  %v7184_v41 = vld [vmem:[#allocation5 + $0x2dc] ss:$36 sps:$4 sm:$0xff]  }
  0x45   :  { %1491 = vmatpush1.bf16.msra.mxu0 %v7144_v14  ;;  %1637 = vmatpush1.bf16.msra.mxu1 %v7145_v15  ;;  %v7182_v40 = vld [vmem:[#allocation5 + $0x2d4] ss:$36 sps:$4 sm:$0xff]   ;;  %v7188_v44 = vld [vmem:[#allocation5 + $0x31c] ss:$36 sps:$4 sm:$0xff]   ;;  %v7190_v45 = vld [vmem:[#allocation5 + $0x324] ss:$36 sps:$4 sm:$0xff]  }
  0x46   :  { %1492 = vmatprep.subr.bf16.mxu0 %v7146_v16  ;;  %1638 = vmatprep.subr.bf16.mxu1 %v7148_v17  ;;  %v7186_v42 = vld [vmem:[#allocation5 + $0x2d0] ss:$36 sps:$4 sm:$0xff]   ;;  %v7187_v43 = vld [vmem:[#allocation5 + $0x2d8] ss:$36 sps:$4 sm:$0xff]   ;;  %v7193_v47 = vld [vmem:[#allocation5 + $0x320] ss:$36 sps:$4 sm:$0xff]  }
  0x47   :  { %v7192_v46 = vld [vmem:[#allocation5 + $0x318] ss:$36 sps:$4 sm:$0xff]   ;;  %v7913_v48 = vld [vmem:[#allocation2 + $0x4] ss:$12 sps:$4 sm:$0xff]   ;;  %v7199_v52 = vld [vmem:[#allocation5 + $0x368] ss:$36 sps:$4 sm:$0xff]  }
  0x48   :  { %v7194_v49 = vld [vmem:[#allocation5 + $0x364] ss:$36 sps:$4 sm:$0xff]   ;;  %v7196_v50 = vld [vmem:[#allocation5 + $0x36c] ss:$36 sps:$4 sm:$0xff]   ;;  %1516 = vmatprep.mubr.bf16.mxu0 %v7913_v48  ;;  %1662 = vmatprep.mubr.bf16.mxu1 %v7913_v48  ;;  %v7202_v54 = vld [vmem:[#allocation5 + $0x3b4] ss:$36 sps:$4 sm:$0xff]  }
  0x49   :  { %1493 = vmatpush1.bf16.msra.mxu0 %v7150_v18  ;;  %1639 = vmatpush1.bf16.msra.mxu1 %v7151_v19  ;;  %v7198_v51 = vld [vmem:[#allocation5 + $0x360] ss:$36 sps:$4 sm:$0xff]   ;;  %v7200_v53 = vld [vmem:[#allocation5 + $0x3ac] ss:$36 sps:$4 sm:$0xff]   ;;  %v7206_v57 = vld [vmem:[#allocation5 + $0x3f4] ss:$36 sps:$4 sm:$0xff]  }
  0x4a   :  { %1494 = vmatprep.subr.bf16.mxu0 %v7152_v20  ;;  %1640 = vmatprep.subr.bf16.mxu1 %v7154_v21  ;;  %v7204_v55 = vld [vmem:[#allocation5 + $0x3a8] ss:$36 sps:$4 sm:$0xff]   ;;  %v7205_v56 = vld [vmem:[#allocation5 + $0x3b0] ss:$36 sps:$4 sm:$0xff]   ;;  %v7208_v58 = vld [vmem:[#allocation5 + $0x3fc] ss:$36 sps:$4 sm:$0xff]  }
  0x4b   :  { %v7210_v59 = vld [vmem:[#allocation5 + $0x3f0] ss:$36 sps:$4 sm:$0xff]   ;;  %v7211_v60 = vld [vmem:[#allocation5 + $0x3f8] ss:$36 sps:$4 sm:$0xff]   ;;  %v7214_v62 = vld [vmem:[#allocation5 + $0x444] ss:$36 sps:$4 sm:$0xff]  }
  0x4c   :  { %v7212_v61 = vld [vmem:[#allocation5 + $0x43c] ss:$36 sps:$4 sm:$0xff]   ;;  %v7223_v1 = vld [vmem:[#allocation5 + $0x484] ss:$36 sps:$4 sm:$0xff]   ;;  %v7226_v2 = vld [vmem:[#allocation5 + $0x48c] ss:$36 sps:$4 sm:$0xff]  }
  0x4d   :  { %1495 = vmatpush1.bf16.msra.mxu0 %v7156_v22  ;;  %1641 = vmatpush1.bf16.msra.mxu1 %v7157_v23  ;;  %v7216_v63 = vld [vmem:[#allocation5 + $0x438] ss:$36 sps:$4 sm:$0xff]   ;;  %v7217_v0 = vld [vmem:[#allocation5 + $0x440] ss:$36 sps:$4 sm:$0xff]   ;;  %v7224_v5 = vld [vmem:[#allocation5 + $0x488] ss:$36 sps:$4 sm:$0xff]  }
  0x4e   :  { %1496 = vmatprep.subr.bf16.mxu0 %v7158_v24  ;;  %1642 = vmatprep.subr.bf16.mxu1 %v7160_v25  ;;  %v7917_v3 = vld [vmem:[#allocation2] ss:$12 sps:$4 sm:$0xff]   ;;  %v7232_v7 = vld [vmem:[#allocation5 + $0x4d4] ss:$36 sps:$4 sm:$0xff]   ;;  %v7919_v8 = vld [vmem:[#allocation2 + $0x1c] ss:$12 sps:$4 sm:$0xff]  }
  0x4f   :  { %v7221_v4 = vld [vmem:[#allocation5 + $0x480] ss:$36 sps:$4 sm:$0xff]   ;;  %v7229_v6 = vld [vmem:[#allocation5 + $0x4cc] ss:$36 sps:$4 sm:$0xff]   ;;  %v7238_v11 = vld [vmem:[#allocation5 + $0x514] ss:$36 sps:$4 sm:$0xff]  }
  0x50   :  { %v7227_v9 = vld [vmem:[#allocation5 + $0x4c8] ss:$36 sps:$4 sm:$0xff]   ;;  %v7230_v10 = vld [vmem:[#allocation5 + $0x4d0] ss:$36 sps:$4 sm:$0xff]   ;;  %v7923_v12 = vld [vmem:[#allocation2 + $0x18] ss:$12 sps:$4 sm:$0xff]  }
  0x51   :  { %1497 = vmatpush1.bf16.msra.mxu0 %v7162_v26  ;;  %1643 = vmatpush1.bf16.msra.mxu1 %v7163_v27  ;;  %v7241_v13 = vld [vmem:[#allocation5 + $0x51c] ss:$36 sps:$4 sm:$0xff]   ;;  %v7236_v14 = vld [vmem:[#allocation5 + $0x510] ss:$36 sps:$4 sm:$0xff]   ;;  %v7247_v17 = vld [vmem:[#allocation5 + $0x564] ss:$36 sps:$4 sm:$0xff]  }
  0x52   :  { %1498 = vmatprep.subr.bf16.mxu0 %v7164_v28  ;;  %1644 = vmatprep.subr.bf16.mxu1 %v7166_v29  ;;  %v7239_v15 = vld [vmem:[#allocation5 + $0x518] ss:$36 sps:$4 sm:$0xff]   ;;  %v7927_v18 = vld [vmem:[#allocation2 + $0x34] ss:$12 sps:$4 sm:$0xff]   ;;  %v7253_v21 = vld [vmem:[#allocation5 + $0x5a4] ss:$36 sps:$4 sm:$0xff]  }
  0x53   :  { %v7244_v16 = vld [vmem:[#allocation5 + $0x55c] ss:$36 sps:$4 sm:$0xff]   ;;  %v7256_v22 = vld [vmem:[#allocation5 + $0x5ac] ss:$36 sps:$4 sm:$0xff]   ;;  %v7262_v27 = vld [vmem:[#allocation5 + $0x5f4] ss:$36 sps:$4 sm:$0xff]  }
  0x54   :  { %v7242_v19 = vld [vmem:[#allocation5 + $0x558] ss:$36 sps:$4 sm:$0xff]   ;;  %v7245_v20 = vld [vmem:[#allocation5 + $0x560] ss:$36 sps:$4 sm:$0xff]   ;;  %v7254_v25 = vld [vmem:[#allocation5 + $0x5a8] ss:$36 sps:$4 sm:$0xff]  }
  0x55   :  { %1499 = vmatpush1.bf16.msra.mxu0 %v7168_v30  ;;  %1645 = vmatpush1.bf16.msra.mxu1 %v7169_v31  ;;  %v7933_v23 = vld [vmem:[#allocation2 + $0x30] ss:$12 sps:$4 sm:$0xff]   ;;  %v7251_v24 = vld [vmem:[#allocation5 + $0x5a0] ss:$36 sps:$4 sm:$0xff]   ;;  %v7935_v28 = vld [vmem:[#allocation2 + $0x4c] ss:$12 sps:$4 sm:$0xff]  }
  0x56   :  { %1500 = vmatprep.subr.bf16.mxu0 %v7170_v32  ;;  %1646 = vmatprep.subr.bf16.mxu1 %v7172_v33  ;;  %v7259_v26 = vld [vmem:[#allocation5 + $0x5ec] ss:$36 sps:$4 sm:$0xff]   ;;  %v7268_v31 = vld [vmem:[#allocation5 + $0x634] ss:$36 sps:$4 sm:$0xff]   ;;  %v7271_v32 = vld [vmem:[#allocation5 + $0x63c] ss:$36 sps:$4 sm:$0xff]  }
  0x57   :  { %v7257_v29 = vld [vmem:[#allocation5 + $0x5e8] ss:$36 sps:$4 sm:$0xff]   ;;  %v7260_v30 = vld [vmem:[#allocation5 + $0x5f0] ss:$36 sps:$4 sm:$0xff]   ;;  %vm2270_vm0 = vcmask 523264   ;;  %vm2401_vm3 = vcmask 261120  }
  0x58   :  { %v7941_v33 = vld [vmem:[#allocation2 + $0x48] ss:$12 sps:$4 sm:$0xff]   ;;  %s7848_s2 = smov 64  }
  0x59   :  { %1501 = vmatpush1.bf16.msra.mxu0 %v7174_v34  ;;  %1647 = vmatpush1.bf16.msra.mxu1 %v7175_v35  ;;  %v7266_v34 = vld [vmem:[#allocation5 + $0x630] ss:$36 sps:$4 sm:$0xff]   ;;  %v7269_v35 = vld [vmem:[#allocation5 + $0x638] ss:$36 sps:$4 sm:$0xff]  }
  0x5a   :  { %1502 = vmatprep.subr.bf16.mxu0 %v7176_v36  ;;  %1648 = vmatprep.subr.bf16.mxu1 %v7178_v37  ;;  %v7274_v36 = vld [vmem:[#allocation5 + $0x67c] ss:$36 sps:$4 sm:$0xff]   ;;  %v7277_v37 = vld [vmem:[#allocation5 + $0x684] ss:$36 sps:$4 sm:$0xff]  }
  0x5d   :  { %1503 = vmatpush1.bf16.msra.mxu0 %v7180_v38  ;;  %1649 = vmatpush1.bf16.msra.mxu1 %v7181_v39  ;;  %v7272_v38 = vld [vmem:[#allocation5 + $0x678] ss:$36 sps:$4 sm:$0xff]   ;;  %v7275_v39 = vld [vmem:[#allocation5 + $0x680] ss:$36 sps:$4 sm:$0xff]  }
  0x5e   :  { %1504 = vmatprep.subr.bf16.mxu0 %v7182_v40  ;;  %1650 = vmatprep.subr.bf16.mxu1 %v7184_v41  ;;  %v7284_v40 = vld [vmem:[#allocation5 + $0x14] ss:$36 sps:$4 sm:$0xff]   ;;  %v7290_v41 = vld [vmem:[#allocation5 + $0x1c] ss:$36 sps:$4 sm:$0xff]  }
  0x61   :  { %1505 = vmatpush1.bf16.msra.mxu0 %v7186_v42  ;;  %1651 = vmatpush1.bf16.msra.mxu1 %v7187_v43  ;;  %v8782_v42 = vmov 0   ;;  %v7947_v43 = vld [vmem:[#allocation2 + $0x8] ss:$12 sps:$4 sm:$0xff]  }
  0x62   :  { %1506 = vmatprep.subr.bf16.mxu0 %v7188_v44  ;;  %1652 = vmatprep.subr.bf16.mxu1 %v7190_v45  ;;  %v7282_v44 = vld [vmem:[#allocation5 + $0x10] ss:$36 sps:$4 sm:$0xff]   ;;  %v7288_v45 = vld [vmem:[#allocation5 + $0x18] ss:$36 sps:$4 sm:$0xff]  }
  0x65   :  { %1507 = vmatpush1.bf16.msra.mxu0 %v7192_v46  ;;  %1653 = vmatpush1.bf16.msra.mxu1 %v7193_v47  ;;  %v7287_v46 = vld [vmem:[#allocation5 + $0x5c] ss:$36 sps:$4 sm:$0xff]   ;;  %v7296_v47 = vld [vmem:[#allocation5 + $0x64] ss:$36 sps:$4 sm:$0xff]  }
  0x66   :  { %1508 = vmatprep.subr.bf16.mxu0 %v7194_v49  ;;  %1654 = vmatprep.subr.bf16.mxu1 %v7196_v50  ;;  %v7285_v49 = vld [vmem:[#allocation5 + $0x58] ss:$36 sps:$4 sm:$0xff]   ;;  %v7294_v50 = vld [vmem:[#allocation5 + $0x60] ss:$36 sps:$4 sm:$0xff]  }
  0x69   :  { %1509 = vmatpush1.bf16.msra.mxu0 %v7198_v51  ;;  %1655 = vmatpush1.bf16.msra.mxu1 %v7199_v52  ;;  %v7293_v51 = vld [vmem:[#allocation5 + $0xa4] ss:$36 sps:$4 sm:$0xff]   ;;  %v7302_v52 = vld [vmem:[#allocation5 + $0xac] ss:$36 sps:$4 sm:$0xff]  }
  0x6a   :  { %1510 = vmatprep.subr.bf16.mxu0 %v7200_v53  ;;  %1656 = vmatprep.subr.bf16.mxu1 %v7202_v54  ;;  %v7953_v53 = vld [vmem:[#allocation2 + $0x20] ss:$12 sps:$4 sm:$0xff]  }
  0x6b   :  { %v7291_v54 = vld [vmem:[#allocation5 + $0xa0] ss:$36 sps:$4 sm:$0xff]  }
  0x6d   :  { %1511 = vmatpush1.bf16.msra.mxu0 %v7204_v55  ;;  %1657 = vmatpush1.bf16.msra.mxu1 %v7205_v56  ;;  %v7300_v55 = vld [vmem:[#allocation5 + $0xa8] ss:$36 sps:$4 sm:$0xff]  }
  0x6e   :  { %1512 = vmatprep.subr.bf16.mxu0 %v7206_v57  ;;  %1658 = vmatprep.subr.bf16.mxu1 %v7208_v58  ;;  %v7299_v56 = vld [vmem:[#allocation5 + $0xec] ss:$36 sps:$4 sm:$0xff]   ;;  %v7308_v57 = vld [vmem:[#allocation5 + $0xf4] ss:$36 sps:$4 sm:$0xff]  }
  0x6f   :  { %v7297_v58 = vld [vmem:[#allocation5 + $0xe8] ss:$36 sps:$4 sm:$0xff]  }
  0x71   :  { %1513 = vmatpush1.bf16.msra.mxu0 %v7210_v59  ;;  %1659 = vmatpush1.bf16.msra.mxu1 %v7211_v60  ;;  %v7306_v59 = vld [vmem:[#allocation5 + $0xf0] ss:$36 sps:$4 sm:$0xff]  }
  0x72   :  { %1514 = vmatprep.subr.bf16.mxu0 %v7212_v61  ;;  %1660 = vmatprep.subr.bf16.mxu1 %v7214_v62  ;;  %v7305_v60 = vld [vmem:[#allocation5 + $0x134] ss:$36 sps:$4 sm:$0xff]   ;;  %v7314_v61 = vld [vmem:[#allocation5 + $0x13c] ss:$36 sps:$4 sm:$0xff]  }
  0x73   :  { %v7959_v62 = vld [vmem:[#allocation2 + $0x38] ss:$12 sps:$4 sm:$0xff]  }
  0x75   :  { %1515 = vmatpush1.bf16.msra.mxu0 %v7216_v63  ;;  %1661 = vmatpush1.bf16.msra.mxu1 %v7217_v0  ;;  %v7303_v63 = vld [vmem:[#allocation5 + $0x130] ss:$36 sps:$4 sm:$0xff]   ;;  %v7312_v0 = vld [vmem:[#allocation5 + $0x138] ss:$36 sps:$4 sm:$0xff]  }
  0x76   :  { %1557 = vmatprep.subr.bf16.mxu0 %v7223_v1  ;;  %1703 = vmatprep.subr.bf16.mxu1 %v7226_v2  ;;  %v7311_v1 = vld [vmem:[#allocation5 + $0x17c] ss:$36 sps:$4 sm:$0xff]   ;;  %v7320_v2 = vld [vmem:[#allocation5 + $0x184] ss:$36 sps:$4 sm:$0xff]  }
  0x78   :  { %1517 = vmatmul.mubr.bf16.vlgmr.msra.gmra.mrb[0].mxu0 %v7917_v3  ;;  %1663 = vmatmul.mubr.bf16.vlgmr.msra.gmra.mrb[0].mxu1 %v7917_v3 }
  0x79   :  { %1558 = vmatpush1.bf16.msra.mxu0 %v7221_v4  ;;  %1704 = vmatpush1.bf16.msra.mxu1 %v7224_v5  ;;  %v7309_v4 = vld [vmem:[#allocation5 + $0x178] ss:$36 sps:$4 sm:$0xff]   ;;  %v7318_v5 = vld [vmem:[#allocation5 + $0x180] ss:$36 sps:$4 sm:$0xff]  }
  0x7a   :  { %1559 = vmatprep.subr.bf16.mxu0 %v7229_v6  ;;  %1705 = vmatprep.subr.bf16.mxu1 %v7232_v7  ;;  %v7317_v6 = vld [vmem:[#allocation5 + $0x1c4] ss:$36 sps:$4 sm:$0xff]   ;;  %v7326_v7 = vld [vmem:[#allocation5 + $0x1cc] ss:$36 sps:$4 sm:$0xff]  }
  0x7b   :  { %1526 = vmatprep.mubr.bf16.mxu0 %v7919_v8  ;;  %1672 = vmatprep.mubr.bf16.mxu1 %v7919_v8 }
  0x7d   :  { %1560 = vmatpush1.bf16.msra.mxu0 %v7227_v9  ;;  %1706 = vmatpush1.bf16.msra.mxu1 %v7230_v10  ;;  %v7965_v9 = vld [vmem:[#allocation2 + $0x50] ss:$12 sps:$4 sm:$0xff]   ;;  %v7315_v10 = vld [vmem:[#allocation5 + $0x1c0] ss:$36 sps:$4 sm:$0xff]  }
  0x7e   :  { %1561 = vmatprep.subr.bf16.mxu0 %v7238_v11  ;;  %1707 = vmatprep.subr.bf16.mxu1 %v7241_v13  ;;  %v7324_v11 = vld [vmem:[#allocation5 + $0x1c8] ss:$36 sps:$4 sm:$0xff]  }
  0x7f   :  { %v7323_v13 = vld [vmem:[#allocation5 + $0x20c] ss:$36 sps:$4 sm:$0xff]  }
  0x80   :  { %1527 = vmatmul.mubr.bf16.gmra.mrb[4].mxu0 %v7923_v12  ;;  %1673 = vmatmul.mubr.bf16.gmra.mrb[4].mxu1 %v7923_v12 }
  0x81   :  { %1562 = vmatpush1.bf16.msra.mxu0 %v7236_v14  ;;  %1708 = vmatpush1.bf16.msra.mxu1 %v7239_v15  ;;  %v7332_v14 = vld [vmem:[#allocation5 + $0x214] ss:$36 sps:$4 sm:$0xff]   ;;  %v7321_v15 = vld [vmem:[#allocation5 + $0x208] ss:$36 sps:$4 sm:$0xff]  }
  0x82   :  { %1563 = vmatprep.subr.bf16.mxu0 %v7244_v16  ;;  %1709 = vmatprep.subr.bf16.mxu1 %v7247_v17  ;;  %v7330_v16 = vld [vmem:[#allocation5 + $0x210] ss:$36 sps:$4 sm:$0xff]  }
  0x83   :  { %1536 = vmatprep.mubr.bf16.mxu0 %v7927_v18  ;;  %1682 = vmatprep.mubr.bf16.mxu1 %v7927_v18  ;;  %v7329_v17 = vld [vmem:[#allocation5 + $0x254] ss:$36 sps:$4 sm:$0xff]  }
  0x85   :  { %1564 = vmatpush1.bf16.msra.mxu0 %v7242_v19  ;;  %1710 = vmatpush1.bf16.msra.mxu1 %v7245_v20  ;;  %v7338_v19 = vld [vmem:[#allocation5 + $0x25c] ss:$36 sps:$4 sm:$0xff]   ;;  %v7327_v20 = vld [vmem:[#allocation5 + $0x250] ss:$36 sps:$4 sm:$0xff]  }
  0x86   :  { %1565 = vmatprep.subr.bf16.mxu0 %v7253_v21  ;;  %1711 = vmatprep.subr.bf16.mxu1 %v7256_v22  ;;  %v7336_v21 = vld [vmem:[#allocation5 + $0x258] ss:$36 sps:$4 sm:$0xff]  }
  0x87   :  { %v7335_v22 = vld [vmem:[#allocation5 + $0x29c] ss:$36 sps:$4 sm:$0xff]  }
  0x88   :  { %1537 = vmatmul.mubr.bf16.gmra.mrb[8].mxu0 %v7933_v23  ;;  %1683 = vmatmul.mubr.bf16.gmra.mrb[8].mxu1 %v7933_v23 }
  0x89   :  { %1566 = vmatpush1.bf16.msra.mxu0 %v7251_v24  ;;  %1712 = vmatpush1.bf16.msra.mxu1 %v7254_v25  ;;  %v7344_v24 = vld [vmem:[#allocation5 + $0x2a4] ss:$36 sps:$4 sm:$0xff]   ;;  %v7333_v25 = vld [vmem:[#allocation5 + $0x298] ss:$36 sps:$4 sm:$0xff]  }
  0x8a   :  { %1567 = vmatprep.subr.bf16.mxu0 %v7259_v26  ;;  %1713 = vmatprep.subr.bf16.mxu1 %v7262_v27  ;;  %v7342_v26 = vld [vmem:[#allocation5 + $0x2a0] ss:$36 sps:$4 sm:$0xff]   ;;  %v7350_v27 = vld [vmem:[#allocation5 + $0x2ec] ss:$36 sps:$4 sm:$0xff]  }
  0x8b   :  { %1546 = vmatprep.mubr.bf16.mxu0 %v7935_v28  ;;  %1692 = vmatprep.mubr.bf16.mxu1 %v7935_v28 }
  0x8d   :  { %1568 = vmatpush1.bf16.msra.mxu0 %v7257_v29  ;;  %1714 = vmatpush1.bf16.msra.mxu1 %v7260_v30  ;;  %v7339_v29 = vld [vmem:[#allocation5 + $0x2e0] ss:$36 sps:$4 sm:$0xff]   ;;  %v7347_v30 = vld [vmem:[#allocation5 + $0x32c] ss:$36 sps:$4 sm:$0xff]  }
  0x8e   :  { %1569 = vmatprep.subr.bf16.mxu0 %v7268_v31  ;;  %1715 = vmatprep.subr.bf16.mxu1 %v7271_v32  ;;  %v7348_v31 = vld [vmem:[#allocation5 + $0x2e8] ss:$36 sps:$4 sm:$0xff]   ;;  %v7356_v32 = vld [vmem:[#allocation5 + $0x334] ss:$36 sps:$4 sm:$0xff]  }
  0x90   :  { %1547 = vmatmul.mubr.bf16.gmra.mrb[12].mxu0 %v7941_v33  ;;  %1693 = vmatmul.mubr.bf16.gmra.mrb[12].mxu1 %v7941_v33 }
  0x91   :  { %1570 = vmatpush1.bf16.msra.mxu0 %v7266_v34  ;;  %1716 = vmatpush1.bf16.msra.mxu1 %v7269_v35  ;;  %v7345_v34 = vld [vmem:[#allocation5 + $0x328] ss:$36 sps:$4 sm:$0xff]   ;;  %v7353_v35 = vld [vmem:[#allocation5 + $0x374] ss:$36 sps:$4 sm:$0xff]  }
  0x92   :  { %1571 = vmatprep.subr.bf16.mxu0 %v7274_v36  ;;  %1717 = vmatprep.subr.bf16.mxu1 %v7277_v37  ;;  %v7354_v36 = vld [vmem:[#allocation5 + $0x330] ss:$36 sps:$4 sm:$0xff]   ;;  %v7362_v37 = vld [vmem:[#allocation5 + $0x37c] ss:$36 sps:$4 sm:$0xff]  }
  0x93   :  { %1589 = vmatprep.mubr.bf16.mxu0 %v8782_v42  ;;  %1735 = vmatprep.mubr.bf16.mxu1 %v8782_v42 }
  0x95   :  { %1572 = vmatpush1.bf16.msra.mxu0 %v7272_v38  ;;  %1718 = vmatpush1.bf16.msra.mxu1 %v7275_v39  ;;  %v7351_v38 = vld [vmem:[#allocation5 + $0x370] ss:$36 sps:$4 sm:$0xff]   ;;  %v7359_v39 = vld [vmem:[#allocation5 + $0x3bc] ss:$36 sps:$4 sm:$0xff]  }
  0x96   :  { %1776 = vmatprep.subr.bf16.mxu0 %v7284_v40  ;;  %1922 = vmatprep.subr.bf16.mxu1 %v7290_v41  ;;  %v7360_v40 = vld [vmem:[#allocation5 + $0x378] ss:$36 sps:$4 sm:$0xff]   ;;  %v7368_v41 = vld [vmem:[#allocation5 + $0x3c4] ss:$36 sps:$4 sm:$0xff]  }
  0x98   :  { %1590 = vmatmul.mubr.bf16.vlgmr.msra.gmra.mrb[0].mxu0 %v7947_v43  ;;  %1736 = vmatmul.mubr.bf16.vlgmr.msra.gmra.mrb[0].mxu1 %v7947_v43 }
  0x99   :  { %1599 = vmatprep.mubr.bf16.mxu0 %v8782_v42  ;;  %1745 = vmatprep.mubr.bf16.mxu1 %v8782_v42 }
  0x9a   :  { %1777 = vmatpush1.bf16.msra.mxu0 %v7282_v44  ;;  %1923 = vmatpush1.bf16.msra.mxu1 %v7288_v45  ;;  %v7357_v44 = vld [vmem:[#allocation5 + $0x3b8] ss:$36 sps:$4 sm:$0xff]   ;;  %v7365_v45 = vld [vmem:[#allocation5 + $0x404] ss:$36 sps:$4 sm:$0xff]  }
  0x9b   :  { %1778 = vmatprep.subr.bf16.mxu0 %v7287_v46  ;;  %1924 = vmatprep.subr.bf16.mxu1 %v7296_v47  ;;  %v7366_v46 = vld [vmem:[#allocation5 + $0x3c0] ss:$36 sps:$4 sm:$0xff]   ;;  %v7374_v47 = vld [vmem:[#allocation5 + $0x40c] ss:$36 sps:$4 sm:$0xff]  }
  0x9e   :  { %1779 = vmatpush1.bf16.msra.mxu0 %v7285_v49  ;;  %1925 = vmatpush1.bf16.msra.mxu1 %v7294_v50  ;;  %v7363_v49 = vld [vmem:[#allocation5 + $0x400] ss:$36 sps:$4 sm:$0xff]   ;;  %v7371_v50 = vld [vmem:[#allocation5 + $0x44c] ss:$36 sps:$4 sm:$0xff]  }
  0x9f   :  { %1780 = vmatprep.subr.bf16.mxu0 %v7293_v51  ;;  %1926 = vmatprep.subr.bf16.mxu1 %v7302_v52  ;;  %v7372_v51 = vld [vmem:[#allocation5 + $0x408] ss:$36 sps:$4 sm:$0xff]   ;;  %v7380_v52 = vld [vmem:[#allocation5 + $0x454] ss:$36 sps:$4 sm:$0xff]  }
  0xa0   :  { %1600 = vmatmul.mubr.bf16.gmra.mrb[4].mxu0 %v7953_v53  ;;  %1746 = vmatmul.mubr.bf16.gmra.mrb[4].mxu1 %v7953_v53 }
  0xa1   :  { %1609 = vmatprep.mubr.bf16.mxu0 %v8782_v42  ;;  %1755 = vmatprep.mubr.bf16.mxu1 %v8782_v42 }
  0xa2   :  { %1781 = vmatpush1.bf16.msra.mxu0 %v7291_v54  ;;  %1927 = vmatpush1.bf16.msra.mxu1 %v7300_v55  ;;  %v7369_v54 = vld [vmem:[#allocation5 + $0x448] ss:$36 sps:$4 sm:$0xff]   ;;  %v7377_v55 = vld [vmem:[#allocation5 + $0x494] ss:$36 sps:$4 sm:$0xff]  }
  0xa3   :  { %1782 = vmatprep.subr.bf16.mxu0 %v7299_v56  ;;  %1928 = vmatprep.subr.bf16.mxu1 %v7308_v57  ;;  %v7378_v56 = vld [vmem:[#allocation5 + $0x450] ss:$36 sps:$4 sm:$0xff]   ;;  %v7386_v57 = vld [vmem:[#allocation5 + $0x49c] ss:$36 sps:$4 sm:$0xff]  }
  0xa6   :  { %1783 = vmatpush1.bf16.msra.mxu0 %v7297_v58  ;;  %1929 = vmatpush1.bf16.msra.mxu1 %v7306_v59  ;;  %v7375_v58 = vld [vmem:[#allocation5 + $0x490] ss:$36 sps:$4 sm:$0xff]   ;;  %v7383_v59 = vld [vmem:[#allocation5 + $0x4dc] ss:$36 sps:$4 sm:$0xff]  }
  0xa7   :  { %1784 = vmatprep.subr.bf16.mxu0 %v7305_v60  ;;  %1930 = vmatprep.subr.bf16.mxu1 %v7314_v61  ;;  %v7384_v60 = vld [vmem:[#allocation5 + $0x498] ss:$36 sps:$4 sm:$0xff]   ;;  %v7392_v61 = vld [vmem:[#allocation5 + $0x4e4] ss:$36 sps:$4 sm:$0xff]  }
  0xa8   :  { %1610 = vmatmul.mubr.bf16.gmra.mrb[8].mxu0 %v7959_v62  ;;  %1756 = vmatmul.mubr.bf16.gmra.mrb[8].mxu1 %v7959_v62 }
  0xa9   :  { %1619 = vmatprep.mubr.bf16.mxu0 %v8782_v42  ;;  %1765 = vmatprep.mubr.bf16.mxu1 %v8782_v42 }
  0xaa   :  { %1785 = vmatpush1.bf16.msra.mxu0 %v7303_v63  ;;  %1931 = vmatpush1.bf16.msra.mxu1 %v7312_v0  ;;  %v7381_v63 = vld [vmem:[#allocation5 + $0x4d8] ss:$36 sps:$4 sm:$0xff]   ;;  %v7389_v0 = vld [vmem:[#allocation5 + $0x524] ss:$36 sps:$4 sm:$0xff]  }
  0xab   :  { %1786 = vmatprep.subr.bf16.mxu0 %v7311_v1  ;;  %1932 = vmatprep.subr.bf16.mxu1 %v7320_v2  ;;  %v7390_v1 = vld [vmem:[#allocation5 + $0x4e0] ss:$36 sps:$4 sm:$0xff]   ;;  %v7398_v2 = vld [vmem:[#allocation5 + $0x52c] ss:$36 sps:$4 sm:$0xff]  }
  0xae   :  { %1787 = vmatpush1.bf16.msra.mxu0 %v7309_v4  ;;  %1933 = vmatpush1.bf16.msra.mxu1 %v7318_v5  ;;  %v7387_v4 = vld [vmem:[#allocation5 + $0x520] ss:$36 sps:$4 sm:$0xff]   ;;  %v7395_v5 = vld [vmem:[#allocation5 + $0x56c] ss:$36 sps:$4 sm:$0xff]  }
  0xaf   :  { %1788 = vmatprep.subr.bf16.mxu0 %v7317_v6  ;;  %1934 = vmatprep.subr.bf16.mxu1 %v7326_v7  ;;  %v7396_v6 = vld [vmem:[#allocation5 + $0x528] ss:$36 sps:$4 sm:$0xff]   ;;  %v7404_v7 = vld [vmem:[#allocation5 + $0x574] ss:$36 sps:$4 sm:$0xff]  }
  0xb0   :  { %1620 = vmatmul.mubr.bf16.gmra.mrb[12].mxu0 %v7965_v9  ;;  %1766 = vmatmul.mubr.bf16.gmra.mrb[12].mxu1 %v7965_v9 }
  0xb1   :  { %1808 = vmatprep.mubr.bf16.mxu0 %v7913_v48  ;;  %1954 = vmatprep.mubr.bf16.mxu1 %v7913_v48  ;;  %v7341_v48 = vld [vmem:[#allocation5 + $0x2e4] ss:$36 sps:$4 sm:$0xff]  }
  0xb2   :  { %1789 = vmatpush1.bf16.msra.mxu0 %v7315_v10  ;;  %1935 = vmatpush1.bf16.msra.mxu1 %v7324_v11  ;;  %v7393_v10 = vld [vmem:[#allocation5 + $0x568] ss:$36 sps:$4 sm:$0xff]   ;;  %v7402_v11 = vld [vmem:[#allocation5 + $0x570] ss:$36 sps:$4 sm:$0xff]  }
  0xb3   :  { %1790 = vmatprep.subr.bf16.mxu0 %v7323_v13  ;;  %1936 = vmatprep.subr.bf16.mxu1 %v7332_v14  ;;  %v7410_v13 = vld [vmem:[#allocation5 + $0x5bc] ss:$36 sps:$4 sm:$0xff]  }
  0xb4   :  { %v7407_v14 = vld [vmem:[#allocation5 + $0x5fc] ss:$36 sps:$4 sm:$0xff]  }
  0xb6   :  { %1791 = vmatpush1.bf16.msra.mxu0 %v7321_v15  ;;  %1937 = vmatpush1.bf16.msra.mxu1 %v7330_v16  ;;  %v7408_v15 = vld [vmem:[#allocation5 + $0x5b8] ss:$36 sps:$4 sm:$0xff]   ;;  %v7416_v16 = vld [vmem:[#allocation5 + $0x604] ss:$36 sps:$4 sm:$0xff]  }
  0xb7   :  { %1792 = vmatprep.subr.bf16.mxu0 %v7329_v17  ;;  %1938 = vmatprep.subr.bf16.mxu1 %v7338_v19  ;;  %v7405_v17 = vld [vmem:[#allocation5 + $0x5f8] ss:$36 sps:$4 sm:$0xff]   ;;  %v7414_v19 = vld [vmem:[#allocation5 + $0x600] ss:$36 sps:$4 sm:$0xff]  }
  0xba   :  { %1793 = vmatpush1.bf16.msra.mxu0 %v7327_v20  ;;  %1939 = vmatpush1.bf16.msra.mxu1 %v7336_v21  ;;  %v7422_v20 = vld [vmem:[#allocation5 + $0x64c] ss:$36 sps:$4 sm:$0xff]  }
  0xbb   :  { %1794 = vmatprep.subr.bf16.mxu0 %v7335_v22  ;;  %1940 = vmatprep.subr.bf16.mxu1 %v7344_v24  ;;  %v7419_v21 = vld [vmem:[#allocation5 + $0x68c] ss:$36 sps:$4 sm:$0xff]   ;;  %v7425_v24 = vld [vmem:[#allocation5 + $0x694] ss:$36 sps:$4 sm:$0xff]  }
  0xbc   :  { %v7420_v22 = vld [vmem:[#allocation5 + $0x648] ss:$36 sps:$4 sm:$0xff]  }
  0xbe   :  { %1795 = vmatpush1.bf16.msra.mxu0 %v7333_v25  ;;  %1941 = vmatpush1.bf16.msra.mxu1 %v7342_v26  ;;  %v7417_v25 = vld [vmem:[#allocation5 + $0x688] ss:$36 sps:$4 sm:$0xff]   ;;  %v7426_v26 = vld [vmem:[#allocation5 + $0x260] ss:$36 sps:$4 sm:$0xff]  }
  0xbf   :  { %1796 = vmatprep.subr.bf16.mxu0 %v7341_v48  ;;  %1942 = vmatprep.subr.bf16.mxu1 %v7350_v27  ;;  %v7427_v48 = vld [vmem:[#allocation5 + $0x4a0] ss:$36 sps:$4 sm:$0xff]   ;;  %v7429_v27 = vld [vmem:[#allocation5 + $0x2a8] ss:$36 sps:$4 sm:$0xff]  }
  0xc2   :  { %1797 = vmatpush1.bf16.msra.mxu0 %v7339_v29  ;;  %1943 = vmatpush1.bf16.msra.mxu1 %v7348_v31  ;;  %v7431_v29 = vld [vmem:[#allocation5 + $0x68] ss:$36 sps:$4 sm:$0xff]   ;;  %v7433_v31 = vld [vmem:[#allocation5 + $0x530] ss:$36 sps:$4 sm:$0xff]  }
  0xc3   :  { %1798 = vmatprep.subr.bf16.mxu0 %v7347_v30  ;;  %1944 = vmatprep.subr.bf16.mxu1 %v7356_v32  ;;  %v7432_v30 = vld [vmem:[#allocation5 + $0x2f0] ss:$36 sps:$4 sm:$0xff]  }
  0xc4   :  { %v7434_v32 = vld [vmem:[#allocation5 + $0xb0] ss:$36 sps:$4 sm:$0xff]  }
  0xc6   :  { %1799 = vmatpush1.bf16.msra.mxu0 %v7345_v34  ;;  %1945 = vmatpush1.bf16.msra.mxu1 %v7354_v36  ;;  %v7435_v34 = vld [vmem:[#allocation5 + $0x338] ss:$36 sps:$4 sm:$0xff]  }
  0xc7   :  { %1800 = vmatprep.subr.bf16.mxu0 %v7353_v35  ;;  %1946 = vmatprep.subr.bf16.mxu1 %v7362_v37  ;;  %v7436_v35 = vld [vmem:[#allocation5 + $0x578] ss:$36 sps:$4 sm:$0xff]   ;;  %v7438_v37 = vld [vmem:[#allocation5 + $0x380] ss:$36 sps:$4 sm:$0xff]  }
  0xc8   :  { %v7437_v36 = vld [vmem:[#allocation5 + $0xf8] ss:$36 sps:$4 sm:$0xff]  }
  0xca   :  { %1801 = vmatpush1.bf16.msra.mxu0 %v7351_v38  ;;  %1947 = vmatpush1.bf16.msra.mxu1 %v7360_v40  ;;  %v7439_v38 = vld [vmem:[#allocation5 + $0x5c0] ss:$36 sps:$4 sm:$0xff]   ;;  %v7441_v40 = vld [vmem:[#allocation5 + $0x3c8] ss:$36 sps:$4 sm:$0xff]  }
  0xcb   :  { %1802 = vmatprep.subr.bf16.mxu0 %v7359_v39  ;;  %1948 = vmatprep.subr.bf16.mxu1 %v7368_v41  ;;  %v7440_v39 = vld [vmem:[#allocation5 + $0x140] ss:$36 sps:$4 sm:$0xff]   ;;  %v7442_v41 = vld [vmem:[#allocation5 + $0x608] ss:$36 sps:$4 sm:$0xff]  }
  0xce   :  { %1803 = vmatpush1.bf16.msra.mxu0 %v7357_v44  ;;  %1949 = vmatpush1.bf16.msra.mxu1 %v7366_v46  ;;  %v7443_v44 = vld [vmem:[#allocation5 + $0x188] ss:$36 sps:$4 sm:$0xff]   ;;  %v7445_v46 = vld [vmem:[#allocation5 + $0x650] ss:$36 sps:$4 sm:$0xff]  }
  0xcf   :  { %1804 = vmatprep.subr.bf16.mxu0 %v7365_v45  ;;  %1950 = vmatprep.subr.bf16.mxu1 %v7374_v47  ;;  %v7444_v45 = vld [vmem:[#allocation5 + $0x410] ss:$36 sps:$4 sm:$0xff]  }
  0xd0   :  { %v7446_v47 = vld [vmem:[#allocation5 + $0x1d0] ss:$36 sps:$4 sm:$0xff]  }
  0xd2   :  { %1805 = vmatpush1.bf16.msra.mxu0 %v7363_v49  ;;  %1951 = vmatpush1.bf16.msra.mxu1 %v7372_v51  ;;  %v7447_v49 = vld [vmem:[#allocation5 + $0x458] ss:$36 sps:$4 sm:$0xff]   ;;  %v7738_v51 = vld [vmem:[#allocation2 + $0x4] ss:$12 sps:$4 sm:$0xff]  }
  0xd3   :  { %1806 = vmatprep.subr.bf16.mxu0 %v7371_v50  ;;  %1952 = vmatprep.subr.bf16.mxu1 %v7380_v52  ;;  %v7448_v50 = vld [vmem:[#allocation5 + $0x698] ss:$36 sps:$4 sm:$0xff]  }
  0xd4   :  { %v7449_v52 = vld [vmem:[#allocation5 + $0x218] ss:$36 sps:$4 sm:$0xff]  }
  0xd6   :  { %1807 = vmatpush1.bf16.msra.mxu0 %v7369_v54  ;;  %1953 = vmatpush1.bf16.msra.mxu1 %v7378_v56  ;;  %v7739_v54 = vld [vmem:[#allocation2] ss:$12 sps:$4 sm:$0xff]   ;;  %v7741_v56 = vld [vmem:[#allocation2 + $0x18] ss:$12 sps:$4 sm:$0xff]  }
  0xd7   :  { %1849 = vmatprep.subr.bf16.mxu0 %v7377_v55  ;;  %1995 = vmatprep.subr.bf16.mxu1 %v7386_v57  ;;  %v7740_v55 = vld [vmem:[#allocation2 + $0x1c] ss:$12 sps:$4 sm:$0xff]   ;;  %v7742_v57 = vld [vmem:[#allocation2 + $0x34] ss:$12 sps:$4 sm:$0xff]  }
  0xd9   :  { %1809 = vmatmul.mubr.bf16.vlgmr.msra.gmra.mrb[16].mxu0 %v7917_v3  ;;  %1955 = vmatmul.mubr.bf16.vlgmr.msra.gmra.mrb[16].mxu1 %v7917_v3  ;;  %v7401_v3 = vld [vmem:[#allocation5 + $0x5b4] ss:$36 sps:$4 sm:$0xff]  }
  0xda   :  { %1850 = vmatpush1.bf16.msra.mxu0 %v7375_v58  ;;  %1818 = vmatprep.mubr.bf16.mxu0 %v7919_v8  ;;  %v7744_v58 = vld [vmem:[#allocation2 + $0x4c] ss:$12 sps:$4 sm:$0xff]  }
  0xdb   :  { %1851 = vmatprep.subr.bf16.mxu0 %v7383_v59  ;;  %1996 = vmatpush1.bf16.msra.mxu1 %v7384_v60  ;;  %v7745_v59 = vld [vmem:[#allocation2 + $0x48] ss:$12 sps:$4 sm:$0xff]  }
  0xdc   :  { %1997 = vmatprep.subr.bf16.mxu1 %v7392_v61  ;;  %1964 = vmatprep.mubr.bf16.mxu1 %v7919_v8  ;;  %v7399_v8 = vld [vmem:[#allocation5 + $0x5b0] ss:$36 sps:$4 sm:$0xff]  }
  0xde   :  { %1852 = vmatpush1.bf16.msra.mxu0 %v7381_v63 }
  0xdf   :  { %1853 = vmatprep.subr.bf16.mxu0 %v7389_v0  ;;  %1998 = vmatpush1.bf16.msra.mxu1 %v7390_v1 }
  0xe0   :  { %1999 = vmatprep.subr.bf16.mxu1 %v7398_v2 }
  0xe1   :  { %1819 = vmatmul.mubr.bf16.gmra.mrb[20].mxu0 %v7923_v12  ;;  %1965 = vmatmul.mubr.bf16.gmra.mrb[20].mxu1 %v7923_v12  ;;  %v7413_v12 = vld [vmem:[#allocation5 + $0x644] ss:$36 sps:$4 sm:$0xff]  }
  0xe2   :  { %1854 = vmatpush1.bf16.msra.mxu0 %v7387_v4  ;;  %1828 = vmatprep.mubr.bf16.mxu0 %v7927_v18 }
  0xe3   :  { %1855 = vmatprep.subr.bf16.mxu0 %v7395_v5  ;;  %2000 = vmatpush1.bf16.msra.mxu1 %v7396_v6 }
  0xe4   :  { %2001 = vmatprep.subr.bf16.mxu1 %v7404_v7  ;;  %1974 = vmatprep.mubr.bf16.mxu1 %v7927_v18  ;;  %v7411_v18 = vld [vmem:[#allocation5 + $0x640] ss:$36 sps:$4 sm:$0xff]  }
  0xe6   :  { %1856 = vmatpush1.bf16.msra.mxu0 %v7393_v10 }
  0xe7   :  { %1857 = vmatprep.subr.bf16.mxu0 %v7401_v3  ;;  %2002 = vmatpush1.bf16.msra.mxu1 %v7402_v11 }
  0xe8   :  { %2003 = vmatprep.subr.bf16.mxu1 %v7410_v13 }
  0xe9   :  { %1829 = vmatmul.mubr.bf16.gmra.mrb[24].mxu0 %v7933_v23  ;;  %1975 = vmatmul.mubr.bf16.gmra.mrb[24].mxu1 %v7933_v23  ;;  %v7423_v23 = vld [vmem:[#allocation5 + $0x690] ss:$36 sps:$4 sm:$0xff]  }
  0xea   :  { %1858 = vmatpush1.bf16.msra.mxu0 %v7399_v8  ;;  %1838 = vmatprep.mubr.bf16.mxu0 %v7935_v28 }
  0xeb   :  { %1859 = vmatprep.subr.bf16.mxu0 %v7407_v14  ;;  %2004 = vmatpush1.bf16.msra.mxu1 %v7408_v15 }
  0xec   :  { %2005 = vmatprep.subr.bf16.mxu1 %v7416_v16  ;;  %1984 = vmatprep.mubr.bf16.mxu1 %v7935_v28  ;;  %v7428_v28 = vld [vmem:[#allocation5 + $0x20] ss:$36 sps:$4 sm:$0xff]  }
  0xee   :  { %1860 = vmatpush1.bf16.msra.mxu0 %v7405_v17 }
  0xef   :  { %1861 = vmatprep.subr.bf16.mxu0 %v7413_v12  ;;  %2006 = vmatpush1.bf16.msra.mxu1 %v7414_v19 }
  0xf0   :  { %2007 = vmatprep.subr.bf16.mxu1 %v7422_v20 }
  0xf1   :  { %1839 = vmatmul.mubr.bf16.gmra.mrb[28].mxu0 %v7941_v33  ;;  %1985 = vmatmul.mubr.bf16.gmra.mrb[28].mxu1 %v7941_v33  ;;  %v7430_v33 = vld [vmem:[#allocation5 + $0x4e8] ss:$36 sps:$4 sm:$0xff]  }
  0xf2   :  { %1862 = vmatpush1.bf16.msra.mxu0 %v7411_v18  ;;  %1881 = vmatprep.mubr.bf16.mxu0 %v8782_v42 }
  0xf3   :  { %1863 = vmatprep.subr.bf16.mxu0 %v7419_v21  ;;  %2008 = vmatpush1.bf16.msra.mxu1 %v7420_v22 }
  0xf4   :  { %2009 = vmatprep.subr.bf16.mxu1 %v7425_v24  ;;  %2027 = vmatprep.mubr.bf16.mxu1 %v8782_v42 }
  0xf6   :  { %1864 = vmatpush1.bf16.msra.mxu0 %v7417_v25 }
  0xf7   :  { %2010 = vmatpush1.bf16.msra.mxu1 %v7423_v23  ;;  %6370 = vmatprep.subr.bf16.mxu0 %v7426_v26 }
  0xf8   :  { %6566 = vmatprep.subr.bf16.mxu1 %v7427_v48 }
  0xf9   :  { %1882 = vmatmul.mubr.bf16.vlgmr.msra.gmra.mrb[16].mxu0 %v7947_v43 }
  0xfa   :  { %2028 = vmatmul.mubr.bf16.vlgmr.msra.gmra.mrb[16].mxu1 %v7947_v43  ;;  %1891 = vmatprep.mubr.bf16.mxu0 %v8782_v42 }
  0xfb   :  { %2037 = vmatprep.mubr.bf16.mxu1 %v8782_v42  ;;  %6371 = vmatpush3.bf16.msra.mxu0 %v7428_v28 }
  0xfc   :  { %6567 = vmatpush3.bf16.msra.mxu1 %v7427_v48  ;;  %6372 = vmatprep.subr.bf16.mxu0 %v7429_v27 }
  0xfd   :  { %6568 = vmatprep.subr.bf16.mxu1 %v7430_v33 }
  0xff   :  { %6373 = vmatpush3.bf16.msra.mxu0 %v7431_v29 }
 0x100   :  { %6569 = vmatpush3.bf16.msra.mxu1 %v7430_v33  ;;  %6374 = vmatprep.subr.bf16.mxu0 %v7432_v30 }
 0x101   :  { %1892 = vmatmul.mubr.bf16.gmra.mrb[20].mxu0 %v7953_v53  ;;  %6570 = vmatprep.subr.bf16.mxu1 %v7433_v31 }
 0x102   :  { %2038 = vmatmul.mubr.bf16.gmra.mrb[20].mxu1 %v7953_v53  ;;  %1901 = vmatprep.mubr.bf16.mxu0 %v8782_v42 }
 0x103   :  { %2047 = vmatprep.mubr.bf16.mxu1 %v8782_v42  ;;  %6375 = vmatpush3.bf16.msra.mxu0 %v7434_v32 }
 0x104   :  { %6571 = vmatpush3.bf16.msra.mxu1 %v7433_v31  ;;  %6376 = vmatprep.subr.bf16.mxu0 %v7435_v34 }
 0x105   :  { %6572 = vmatprep.subr.bf16.mxu1 %v7436_v35 }
 0x107   :  { %6377 = vmatpush3.bf16.msra.mxu0 %v7437_v36 }
 0x108   :  { %6573 = vmatpush3.bf16.msra.mxu1 %v7436_v35  ;;  %6378 = vmatprep.subr.bf16.mxu0 %v7438_v37 }
 0x109   :  { %1902 = vmatmul.mubr.bf16.gmra.mrb[24].mxu0 %v7959_v62  ;;  %6574 = vmatprep.subr.bf16.mxu1 %v7439_v38 }
 0x10a   :  { %2048 = vmatmul.mubr.bf16.gmra.mrb[24].mxu1 %v7959_v62  ;;  %1911 = vmatprep.mubr.bf16.mxu0 %v8782_v42 }
 0x10b   :  { %2057 = vmatprep.mubr.bf16.mxu1 %v8782_v42  ;;  %6379 = vmatpush3.bf16.msra.mxu0 %v7440_v39 }
 0x10c   :  { %6575 = vmatpush3.bf16.msra.mxu1 %v7439_v38  ;;  %6380 = vmatprep.subr.bf16.mxu0 %v7441_v40 }
 0x10d   :  { %6576 = vmatprep.subr.bf16.mxu1 %v7442_v41 }
 0x10f   :  { %6381 = vmatpush3.bf16.msra.mxu0 %v7443_v44 }
 0x110   :  { %6577 = vmatpush3.bf16.msra.mxu1 %v7442_v41  ;;  %6382 = vmatprep.subr.bf16.mxu0 %v7444_v45 }
 0x111   :  { %1912 = vmatmul.mubr.bf16.gmra.mrb[28].mxu0 %v7965_v9  ;;  %6578 = vmatprep.subr.bf16.mxu1 %v7445_v46 }
 0x112   :  { %2058 = vmatmul.mubr.bf16.gmra.mrb[28].mxu1 %v7965_v9  ;;  %2100 = vmatprep.mubr.bf16.mxu0 %v7738_v51 }
 0x113   :  { %6383 = vmatpush3.bf16.msra.mxu0 %v7446_v47  ;;  %6582 = vmatprep.mubr.bf16.mxu1 %v7947_v43  ;;  %v7743_v43 = vld [vmem:[#allocation2 + $0x30] ss:$12 sps:$4 sm:$0xff]  }
 0x114   :  { %6579 = vmatpush3.bf16.msra.mxu1 %v7445_v46  ;;  %6384 = vmatprep.subr.bf16.mxu0 %v7447_v49 }
 0x115   :  { %6580 = vmatprep.subr.bf16.mxu1 %v7448_v50 }
 0x117   :  { %6385 = vmatpush3.bf16.msra.mxu0 %v7449_v52 }
 0x118   :  { %6581 = vmatpush3.bf16.msra.mxu1 %v7448_v50 }
 0x11a   :  { %2101 = vmatmul.mubr.bf16.vlgmr.msra.gmra.mrb[32].mxu0 %v7739_v54 }
 0x11b   :  { %6583 = vmatmul.mubr.bf16.vlgmr.msra.gmra.mrb[32].mxu1 %v7953_v53  ;;  %2108 = vmatprep.mubr.bf16.mxu0 %v7740_v55 }
 0x11c   :  { %6586 = vmatprep.mubr.bf16.mxu1 %v7959_v62 }
 0x122   :  { %2109 = vmatmul.mubr.bf16.gmra.mrb[36].mxu0 %v7741_v56 }
 0x123   :  { %6587 = vmatmul.mubr.bf16.gmra.mrb[36].mxu1 %v7965_v9  ;;  %2116 = vmatprep.mubr.bf16.mxu0 %v7742_v57 }
 0x12a   :  { %2117 = vmatmul.mubr.bf16.gmra.mrb[40].mxu0 %v7743_v43 }
 0x12b   :  { %2124 = vmatprep.mubr.bf16.mxu0 %v7744_v58 }
 0x132   :  { %2125 = vmatmul.mubr.bf16.gmra.mrb[44].mxu0 %v7745_v59 }
 0x16b   :  { %v1591_v60 = vpop.f32.mrb[0].mxu0  ;;  %v1737_v61 = vpop.f32.mrb[0].mxu1 }
 0x16c   :  { %v1593_v63 = vpop.f32.mrb[1].mxu0  ;;  %v1739_v53 = vpop.f32.mrb[1].mxu1 }
 0x16d   :  { %v1595_v0 = vpop.f32.mrb[2].mxu0  ;;  %v1741_v1 = vpop.f32.mrb[2].mxu1 }
 0x16e   :  { %v8005_v62 = vpack.c.bf16 %v1595_v0, %v1591_v60  ;;  %v8007_v2 = vpack.c.bf16 %v1741_v1, %v1737_v61  ;;  %v1597_v9 = vpop.f32.mrb[3].mxu0  ;;  %v1743_v4 = vpop.f32.mrb[3].mxu1 }
 0x16f   :  { %v8009_v5 = vpack.c.bf16 %v1597_v9, %v1593_v63  ;;  %v8011_v6 = vpack.c.bf16 %v1743_v4, %v1739_v53 }
 0x170   :  { %6594 = vmatprep.mubr.msk.bf16.mxu1 %vm2270_vm0, %v8005_v62 }
 0x171   :  { %7086 = vmatprep.subr.msk.bf16.mxu1 %vm2270_vm0, %v8011_v6  ;;  %v2278_v7 = vsel %vm2270_vm0, %v8011_v6, 0 }
 0x172   :  { %6591 = vmatpush3.bf16.xpose.msra.mxu1 %v2278_v7 }
 0x173   :  { %v1601_v10 = vpop.f32.mrb[4].mxu0  ;;  %v1747_v3 = vpop.f32.mrb[4].mxu1 }
 0x174   :  { %v1603_v11 = vpop.f32.mrb[5].mxu0  ;;  %v1749_v13 = vpop.f32.mrb[5].mxu1 }
 0x175   :  { %v1605_v8 = vpop.f32.mrb[6].mxu0  ;;  %v1751_v14 = vpop.f32.mrb[6].mxu1 }
 0x176   :  { %v8019_v15 = vpack.c.bf16 %v1605_v8, %v1601_v10  ;;  %v8021_v16 = vpack.c.bf16 %v1751_v14, %v1747_v3  ;;  %v1607_v17 = vpop.f32.mrb[7].mxu0  ;;  %v1753_v12 = vpop.f32.mrb[7].mxu1 }
 0x177   :  { %v8023_v19 = vpack.c.bf16 %v1607_v17, %v1603_v11  ;;  %v8025_v20 = vpack.c.bf16 %v1753_v12, %v1749_v13 }
 0x179   :  { %7087 = vmatprep.subr.msk.bf16.mxu1 %vm2270_vm0, %v8025_v20  ;;  %v2281_v18 = vsel %vm2270_vm0, %v8025_v20, 0 }
 0x17a   :  { %6593 = vmatpush3.bf16.xpose.msra.mxu1 %v2281_v18 }
 0x17b   :  { %v1611_v21 = vpop.f32.mrb[8].mxu0  ;;  %v1757_v22 = vpop.f32.mrb[8].mxu1 }
 0x17c   :  { %v1613_v24 = vpop.f32.mrb[9].mxu0  ;;  %v1759_v25 = vpop.f32.mrb[9].mxu1 }
 0x17d   :  { %v1615_v23 = vpop.f32.mrb[10].mxu0  ;;  %v1761_v26 = vpop.f32.mrb[10].mxu1 }
 0x17e   :  { %v8031_v48 = vpack.c.bf16 %v1615_v23, %v1611_v21  ;;  %v8033_v28 = vpack.c.bf16 %v1761_v26, %v1757_v22  ;;  %v1617_v27 = vpop.f32.mrb[11].mxu0  ;;  %v1763_v33 = vpop.f32.mrb[11].mxu1 }
 0x17f   :  { %v8035_v29 = vpack.c.bf16 %v1617_v27, %v1613_v24  ;;  %v8037_v30 = vpack.c.bf16 %v1763_v33, %v1759_v25 }
 0x180   :  { %6602 = vmatprep.mubr.msk.bf16.mxu0 %vm2270_vm0, %v8031_v48 }
 0x181   :  { %6595 = vmatmul.mubr.msk.bf16.vlgmr.msra.gmra.mrb[40].mxu1 %vm2270_vm0, %v8019_v15  ;;  %7088 = vmatprep.subr.msk.bf16.mxu0 %vm2270_vm0, %v8037_v30  ;;  %v2339_v31 = vsel %vm2270_vm0, %v8037_v30, 0 }
 0x182   :  { %6599 = vmatpush3.bf16.xpose.msra.mxu0 %v2339_v31 }
 0x183   :  { %v1621_v32 = vpop.f32.mrb[12].mxu0  ;;  %v1767_v34 = vpop.f32.mrb[12].mxu1 }
 0x184   :  { %v1623_v35 = vpop.f32.mrb[13].mxu0  ;;  %v1769_v36 = vpop.f32.mrb[13].mxu1 }
 0x185   :  { %v1625_v37 = vpop.f32.mrb[14].mxu0  ;;  %v1771_v38 = vpop.f32.mrb[14].mxu1 }
 0x186   :  { %v8047_v39 = vpack.c.bf16 %v1625_v37, %v1621_v32  ;;  %v8049_v40 = vpack.c.bf16 %v1771_v38, %v1767_v34  ;;  %v1627_v41 = vpop.f32.mrb[15].mxu0  ;;  %v1773_v44 = vpop.f32.mrb[15].mxu1 }
 0x187   :  { %v8051_v45 = vpack.c.bf16 %v1627_v41, %v1623_v35  ;;  %v8053_v46 = vpack.c.bf16 %v1773_v44, %v1769_v36 }
 0x189   :  { %7089 = vmatprep.subr.msk.bf16.mxu0 %vm2270_vm0, %v8053_v46  ;;  %v2342_v47 = vsel %vm2270_vm0, %v8053_v46, 0 }
 0x18a   :  { %6601 = vmatpush3.bf16.xpose.msra.mxu0 %v2342_v47 }
 0x191   :  { %6603 = vmatmul.mubr.msk.bf16.vlgmr.msra.gmra.mrb[48].mxu0 %vm2270_vm0, %v8047_v39 }
 0x192   :  { %2732 = vmatprep.mubr.bf16.mxu0 %v8782_v42 }
 0x1cc   :  { %v1883_v49 = vpop.f32.mrb[16].mxu0 }
 0x1cd   :  { %v1885_v50 = vpop.f32.mrb[17].mxu0  ;;  %v2029_v51 = vpop.f32.mrb[16].mxu1 }
 0x1ce   :  { %v1887_v52 = vpop.f32.mrb[18].mxu0  ;;  %v2031_v54 = vpop.f32.mrb[17].mxu1 }
 0x1cf   :  { %v8062_v55 = vpack.c.bf16 %v1887_v52, %v1883_v49  ;;  %v1889_v56 = vpop.f32.mrb[19].mxu0  ;;  %v2033_v57 = vpop.f32.mrb[18].mxu1 }
 0x1d0   :  { %v8064_v43 = vpack.c.bf16 %v1889_v56, %v1885_v50  ;;  %v8066_v58 = vpack.c.bf16 %v2033_v57, %v2029_v51  ;;  %v2035_v59 = vpop.f32.mrb[19].mxu1 }
 0x1d1   :  { %v8068_v60 = vpack.c.bf16 %v2035_v59, %v2031_v54 }
 0x1d2   :  { %6606 = vmatprep.subr.bf16.mxu1 %v8066_v58 }
 0x1d3   :  { %6607 = vmatpush3.bf16.msra.mxu1 %v8066_v58 }
 0x1d4   :  { %v1893_v61 = vpop.f32.mrb[20].mxu0 }
 0x1d5   :  { %v1895_v63 = vpop.f32.mrb[21].mxu0  ;;  %v2039_v53 = vpop.f32.mrb[20].mxu1 }
 0x1d6   :  { %v1897_v0 = vpop.f32.mrb[22].mxu0  ;;  %v2041_v1 = vpop.f32.mrb[21].mxu1 }
 0x1d7   :  { %v8072_v9 = vpack.c.bf16 %v1897_v0, %v1893_v61  ;;  %v1899_v4 = vpop.f32.mrb[23].mxu0  ;;  %v2043_v7 = vpop.f32.mrb[22].mxu1 }
 0x1d8   :  { %v8074_v10 = vpack.c.bf16 %v1899_v4, %v1895_v63  ;;  %v8076_v3 = vpack.c.bf16 %v2043_v7, %v2039_v53  ;;  %v2045_v11 = vpop.f32.mrb[23].mxu1 }
 0x1d9   :  { %v8078_v13 = vpack.c.bf16 %v2045_v11, %v2041_v1 }
 0x1da   :  { %6608 = vmatprep.subr.bf16.mxu1 %v8076_v3 }
 0x1db   :  { %6609 = vmatpush3.bf16.msra.mxu1 %v8076_v3 }
 0x1dc   :  { %v1903_v8 = vpop.f32.mrb[24].mxu0 }
 0x1dd   :  { %v1905_v14 = vpop.f32.mrb[25].mxu0  ;;  %v2049_v17 = vpop.f32.mrb[24].mxu1 }
 0x1de   :  { %v1907_v12 = vpop.f32.mrb[26].mxu0  ;;  %v2051_v18 = vpop.f32.mrb[25].mxu1 }
 0x1df   :  { %v8082_v21 = vpack.c.bf16 %v1907_v12, %v1903_v8  ;;  %v1909_v22 = vpop.f32.mrb[27].mxu0  ;;  %v2053_v24 = vpop.f32.mrb[26].mxu1 }
 0x1e0   :  { %v8084_v25 = vpack.c.bf16 %v1909_v22, %v1905_v14  ;;  %v8086_v23 = vpack.c.bf16 %v2053_v24, %v2049_v17  ;;  %v2055_v26 = vpop.f32.mrb[27].mxu1 }
 0x1e1   :  { %v8088_v27 = vpack.c.bf16 %v2055_v26, %v2051_v18 }
 0x1e2   :  { %6614 = vmatprep.subr.bf16.mxu1 %v8086_v23 }
 0x1e4   :  { %v1913_v33 = vpop.f32.mrb[28].mxu0 }
 0x1e5   :  { %v1915_v31 = vpop.f32.mrb[29].mxu0  ;;  %v2059_v32 = vpop.f32.mrb[28].mxu1 }
 0x1e6   :  { %v1917_v34 = vpop.f32.mrb[30].mxu0  ;;  %v2061_v35 = vpop.f32.mrb[29].mxu1 }
 0x1e7   :  { %v8091_v36 = vpack.c.bf16 %v1917_v34, %v1913_v33  ;;  %v1919_v37 = vpop.f32.mrb[31].mxu0  ;;  %v2063_v38 = vpop.f32.mrb[30].mxu1 }
 0x1e8   :  { %v8093_v41 = vpack.c.bf16 %v1919_v37, %v1915_v31  ;;  %v8095_v44 = vpack.c.bf16 %v2063_v38, %v2059_v32  ;;  %v2065_v47 = vpop.f32.mrb[31].mxu1 }
 0x1e9   :  { %v8097_v49 = vpack.c.bf16 %v2065_v47, %v2061_v35 }
 0x1ed   :  { %v6386_v50 = vpop.f32.mrb[32].mxu0 }
 0x1ee   :  { %v6584_v51 = vpop.f32.mrb[32].mxu1  ;;  %v6387_v52 = vpop.f32.mrb[33].mxu0 }
 0x1ef   :  { %v2167_v54 = vpop.f32.mrb[33].mxu1  ;;  %v6388_v56 = vadd.f32 %v6387_v52, %v6386_v50  ;;  %v6389_v57 = vpop.f32.mrb[34].mxu0 }
 0x1f0   :  { %v6585_v59 = vpop.f32.mrb[34].mxu1  ;;  %v6390_v61 = vpop.f32.mrb[35].mxu0 }
 0x1f1   :  { %v2170_v63 = vpop.f32.mrb[35].mxu1  ;;  %v2168_v53 = vadd.f32 %v6388_v56, %v2167_v54  ;;  %v6391_v0 = vadd.f32 %v6390_v61, %v6389_v57 }
 0x1f3   :  { %v2171_v1 = vadd.f32 %v6391_v0, %v2170_v63 }
 0x1f5   :  { %v6392_v4 = vpop.f32.mrb[36].mxu0  ;;  %v8099_v7 = vpack.c.bf16 %v2171_v1, %v2168_v53 }
 0x1f6   :  { %v6588_v11 = vpop.f32.mrb[36].mxu1  ;;  %v6393_v8 = vpop.f32.mrb[37].mxu0 }
 0x1f7   :  { %v2183_v14 = vpop.f32.mrb[37].mxu1  ;;  %v6394_v17 = vadd.f32 %v6393_v8, %v6392_v4  ;;  %v6395_v12 = vpop.f32.mrb[38].mxu0  ;;  %v2234_v8 = vlaneseq }
 0x1f8   :  { %v6589_v18 = vpop.f32.mrb[38].mxu1  ;;  %v6396_v22 = vpop.f32.mrb[39].mxu0 }
 0x1f9   :  { %v2186_v24 = vpop.f32.mrb[39].mxu1  ;;  %v2176_v26 = vadd.f32 %v6584_v51, %v6394_v17  ;;  %v6397_v33 = vadd.f32 %v6396_v22, %v6395_v12  ;;  %v8107_v17 = vshrl.u32 %v2234_v8, 7 }
 0x1fb   :  { %v2179_v31 = vadd.f32 %v6585_v59, %v6397_v33  ;;  %v2237_v12 = vadd.s32 16, %v8107_v17  ;;  %v2238_v22 = vadd.s32 24, %v8107_v17 }
 0x1fd   :  { %v6398_v32 = vpop.f32.mrb[40].mxu0  ;;  %v8101_v34 = vpack.c.bf16 %v2179_v31, %v2176_v26 }
 0x1fe   :  { %v6399_v35 = vpop.f32.mrb[41].mxu0 }
 0x1ff   :  { %v6400_v37 = vadd.f32 %v6399_v35, %v6398_v32  ;;  %v6401_v38 = vpop.f32.mrb[42].mxu0 }
 0x200   :  { %v6402_v47 = vpop.f32.mrb[43].mxu0 }
 0x201   :  { %v2184_v50 = vadd.f32 %v6400_v37, %v2183_v14  ;;  %v6403_v52 = vadd.f32 %v6402_v47, %v6401_v38  ;;  %v2240_v14 = vand.u32 127, %v2234_v8 }
 0x203   :  { %v2187_v54 = vadd.f32 %v6403_v52, %v2186_v24  ;;  %v2236_v24 = vadd.s32 8, %v8107_v17  ;;  %vm8112_vm1 = vcmp.ge.s32.totalorder %v2237_v12, %v2240_v14  ;;  %vm8117_vm2 = vcmp.ge.s32.totalorder %v8107_v17, %v2240_v14 }
 0x204   :  { %vm8121_vm4 = vcmp.ge.s32.totalorder %v2238_v22, %v2240_v14 }
 0x205   :  { %v6404_v56 = vpop.f32.mrb[44].mxu0  ;;  %v8103_v57 = vpack.c.bf16 %v2187_v54, %v2184_v50  ;;  %vm8127_vm5 = vcmp.ge.s32.totalorder %v2236_v24, %v2240_v14 }
 0x206   :  { %v6405_v61 = vpop.f32.mrb[45].mxu0 }
 0x207   :  { %v6406_v63 = vadd.f32 %v6405_v61, %v6404_v56  ;;  %v6407_v53 = vpop.f32.mrb[46].mxu0 }
 0x208   :  { %v6408_v0 = vpop.f32.mrb[47].mxu0 }
 0x209   :  { %v2192_v51 = vadd.f32 %v6588_v11, %v6406_v63  ;;  %v6409_v1 = vadd.f32 %v6408_v0, %v6407_v53 }
 0x20b   :  { %v2195_v59 = vadd.f32 %v6589_v18, %v6409_v1 }
 0x20d   :  { %v8105_v4 = vpack.c.bf16 %v2195_v59, %v2192_v51 }
 0x254   :  { %v6596_v18 = vpop.f32.mrb[40].mxu1 }
 0x255   :  { %v2395_v31 = vsel %vm8112_vm1, %v6596_v18, -1e+30  ;;  %v2317_v32 = vpop.f32.mrb[41].mxu1 }
 0x256   :  { %v2393_v37 = vsel %vm8117_vm2, %v2317_v32, -1e+30  ;;  %v6597_v38 = vpop.f32.mrb[42].mxu1  ;;  %v2408_v47 = vsel %vm2401_vm3, %v2395_v31, -inf }
 0x257   :  { %v2396_v50 = vsel %vm8121_vm4, %v6597_v38, -1e+30  ;;  %2409 = vmax.xlane.f32.xlu1 %v2408_v47  ;;  %v2320_v52 = vpop.f32.mrb[43].mxu1  ;;  %v2402_v54 = vsel %vm2401_vm3, %v2393_v37, -inf }
 0x258   :  { %v2394_v56 = vsel %vm8127_vm5, %v2320_v52, -1e+30  ;;  %2403 = vmax.xlane.f32.xlu0 %v2402_v54  ;;  %v2411_v61 = vsel %vm2401_vm3, %v2396_v50, -inf }
 0x259   :  { %v2405_v63 = vsel %vm2401_vm3, %v2394_v56, -inf }
 0x25b   :  { %2412 = vmax.xlane.f32.xlu1 %v2411_v61 }
 0x25c   :  { %2406 = vmax.xlane.f32.xlu0 %v2405_v63 }
 0x264   :  { %v6604_v53 = vpop.f32.mrb[48].mxu0 }
 0x265   :  { %v2378_v0 = vpop.f32.mrb[49].mxu0  ;;  %v2399_v12 = vsel %vm8112_vm1, %v6604_v53, -1e+30 }
 0x266   :  { %v2397_v51 = vsel %vm8117_vm2, %v2378_v0, -1e+30  ;;  %v6605_v1 = vpop.f32.mrb[50].mxu0  ;;  %v2420_v18 = vsel %vm2401_vm3, %v2399_v12, -inf }
 0x267   :  { %v2381_v59 = vpop.f32.mrb[51].mxu0  ;;  %v2414_v8 = vsel %vm2401_vm3, %v2397_v51, -inf  ;;  %v2400_v24 = vsel %vm8121_vm4, %v6605_v1, -1e+30 }
 0x268   :  { %v2398_v14 = vsel %vm8127_vm5, %v2381_v59, -1e+30  ;;  %2415 = vmax.xlane.f32.xlu0 %v2414_v8  ;;  %v2423_v32 = vsel %vm2401_vm3, %v2400_v24, -inf }
 0x269   :  { %v2417_v22 = vsel %vm2401_vm3, %v2398_v14, -inf }
 0x26a   :  { %2418 = vmax.xlane.f32.xlu1 %v2417_v22 }
 0x26c   :  { %2421 = vmax.xlane.f32.xlu0 %v2420_v18 }
 0x26e   :  { %2424 = vmax.xlane.f32.xlu1 %v2423_v32 }
 0x2e4   :  { %v2410_v38 = vpop.xlane.xlu1 %2409 }
 0x2e5   :  { %v2428_v47 = vsub.f32 %v2395_v31, %v2410_v38  ;;  %v2404_v52 = vpop.xlane.xlu0 %2403 }
 0x2e6   :  { %v2426_v54 = vsub.f32 %v2393_v37, %v2404_v52 }
 0x2e7   :  { %v2438_v61 = vmul.f32 1.442695, %v2428_v47 }
 0x2e8   :  { %v2434_v63 = vmul.f32 1.442695, %v2426_v54  ;;  %v2413_v53 = vpop.xlane.xlu1 %2412 }
 0x2e9   :  { %v2429_v0 = vsub.f32 %v2396_v50, %v2413_v53  ;;  %v2407_v59 = vpop.xlane.xlu0 %2406 }
 0x2ea   :  { %7546 = vpow2.f32 %v2434_v63  ;;  %v2427_v8 = vsub.f32 %v2394_v56, %v2407_v59 }
 0x2eb   :  { %7548 = vpow2.f32 %v2438_v61  ;;  %v2440_v1 = vmul.f32 1.442695, %v2429_v0 }
 0x2ec   :  { %v2436_v22 = vmul.f32 1.442695, %v2427_v8 }
 0x2ee   :  { %7550 = vpow2.f32 %v2436_v22 }
 0x2ef   :  { %7552 = vpow2.f32 %v2440_v1 }
 0x2f4   :  { %v8153_v18 = vpop.eup %7546 }
 0x2f5   :  { %v2416_v42 = vpop.xlane.xlu0 %2415  ;;  %v2450_v31 = vsel %vm2401_vm3, %v8153_v18, 0.0  ;;  %v8157_v32 = vpop.eup %7548 }
 0x2f6   :  { %v2430_v37 = vsub.f32 %v2397_v51, %v2416_v42  ;;  %2451 = vadd.xlane.f32.xlu0 %v2450_v31  ;;  %v2456_v54 = vsel %vm2401_vm3, %v8157_v32, 0.0 }
 0x2f7   :  { %v2419_v38 = vpop.xlane.xlu1 %2418 }
 0x2f8   :  { %v8159_v50 = vpop.eup %7550  ;;  %v2442_v47 = vmul.f32 1.442695, %v2430_v37  ;;  %v2431_v56 = vsub.f32 %v2398_v14, %v2419_v38 }
 0x2f9   :  { %v2422_v52 = vpop.xlane.xlu0 %2421  ;;  %v2453_v61 = vsel %vm2401_vm3, %v8159_v50, 0.0  ;;  %v8165_v63 = vpop.eup %7552 }
 0x2fa   :  { %7554 = vpow2.f32 %v2442_v47  ;;  %v2444_v53 = vmul.f32 1.442695, %v2431_v56  ;;  %v2432_v0 = vsub.f32 %v2399_v12, %v2422_v52  ;;  %2457 = vadd.xlane.f32.xlu0 %v2456_v54  ;;  %2454 = vadd.xlane.f32.xlu1 %v2453_v61  ;;  %v2459_v14 = vsel %vm2401_vm3, %v8165_v63, 0.0  ;;  %v7452_v56 = vld [vmem:[#allocation7 + $0x4] ss:$12 sps:$4 sm:$0xff]  }
 0x2fb   :  { %v2425_v42 = vpop.xlane.xlu1 %2424  ;;  %v7450_v52 = vld [vmem:[#allocation7] ss:$12 sps:$4 sm:$0xff]   ;;  %2700 = vmatprep.subr.bf16.mxu0 %v7452_v56  ;;  %v7455_v54 = vld [vmem:[#allocation7 + $0x1c] ss:$12 sps:$4 sm:$0xff]   ;;  %v7453_v61 = vld [vmem:[#allocation7 + $0x18] ss:$12 sps:$4 sm:$0xff]  }
 0x2fc   :  { %7556 = vpow2.f32 %v2444_v53  ;;  %v2446_v51 = vmul.f32 1.442695, %v2432_v0  ;;  %v2433_v59 = vsub.f32 %v2400_v24, %v2425_v42  ;;  %2701 = vmatpush1.bf16.msra.mxu0 %v7450_v52  ;;  %v7458_v53 = vld [vmem:[#allocation7 + $0x34] ss:$12 sps:$4 sm:$0xff]   ;;  %v7456_v0 = vld [vmem:[#allocation7 + $0x30] ss:$12 sps:$4 sm:$0xff]  }
 0x2fd   :  { %2702 = vmatprep.subr.bf16.mxu0 %v7455_v54  ;;  %v7461_v42 = vld [vmem:[#allocation7 + $0x4c] ss:$12 sps:$4 sm:$0xff]  }
 0x2fe   :  { %7558 = vpow2.f32 %v2446_v51  ;;  %v2448_v8 = vmul.f32 1.442695, %v2433_v59  ;;  %2460 = vadd.xlane.f32.xlu1 %v2459_v14  ;;  %v7459_v51 = vld [vmem:[#allocation7 + $0x48] ss:$12 sps:$4 sm:$0xff]  }
 0x300   :  { %7560 = vpow2.f32 %v2448_v8  ;;  %2703 = vmatpush1.bf16.msra.mxu0 %v7453_v61 }
 0x301   :  { %2704 = vmatprep.subr.bf16.mxu0 %v7458_v53 }
 0x304   :  { %v8169_v1 = vpop.eup %7554  ;;  %2705 = vmatpush1.bf16.msra.mxu0 %v7456_v0 }
 0x305   :  { %v2462_v22 = vsel %vm2401_vm3, %v8169_v1, 0.0  ;;  %2706 = vmatprep.subr.bf16.mxu0 %v7461_v42 }
 0x306   :  { %v8173_v31 = vpop.eup %7556  ;;  %2463 = vadd.xlane.f32.xlu0 %v2462_v22 }
 0x307   :  { %v2465_v12 = vsel %vm2401_vm3, %v8173_v31, 0.0 }
 0x308   :  { %v8177_v37 = vpop.eup %7558  ;;  %2466 = vadd.xlane.f32.xlu1 %v2465_v12  ;;  %2707 = vmatpush1.bf16.msra.mxu0 %v7459_v51 }
 0x309   :  { %v2468_v24 = vsel %vm2401_vm3, %v8177_v37, 0.0 }
 0x30a   :  { %v8181_v38 = vpop.eup %7560  ;;  %2469 = vadd.xlane.f32.xlu0 %v2468_v24 }
 0x30b   :  { %v2471_v47 = vsel %vm2401_vm3, %v8181_v38, 0.0 }
 0x30c   :  { %2472 = vadd.xlane.f32.xlu1 %v2471_v47 }
 0x31d   :  { %2872 = vrot.lane.b32.xlu1 %v8025_v20, %s7848_s2 }
 0x320   :  { %2870 = vrot.lane.b32.xlu0 %v8011_v6, %s7848_s2 }
 0x321   :  { %2864 = vrot.lane.b32.xlu1 %v8005_v62, %s7848_s2 }
 0x324   :  { %2866 = vrot.lane.b32.xlu0 %v8019_v15, %s7848_s2 }
 0x325   :  { %2943 = vrot.lane.b32.xlu1 %v8037_v30, %s7848_s2 }
 0x328   :  { %2937 = vrot.lane.b32.xlu0 %v8031_v48, %s7848_s2 }
 0x329   :  { %2945 = vrot.lane.b32.xlu1 %v8053_v46, %s7848_s2 }
 0x32d   :  { %2939 = vrot.lane.b32.xlu1 %v8047_v39, %s7848_s2 }
 0x383   :  { %v2452_v62 = vpop.xlane.xlu0 %2451 }
 0x384   :  { %7562 = vrcp.f32 %v2452_v62 }
 0x387   :  { %v2458_v6 = vpop.xlane.xlu0 %2457  ;;  %v2455_v20 = vpop.xlane.xlu1 %2454 }
 0x388   :  { %7564 = vrcp.f32 %v2455_v20 }
 0x389   :  { %7566 = vrcp.f32 %v2458_v6 }
 0x38b   :  { %v2461_v15 = vpop.xlane.xlu1 %2460 }
 0x38c   :  { %7568 = vrcp.f32 %v2461_v15 }
 0x38e   :  { %v7563_v30 = vpop.eup %7562 }
 0x38f   :  { %v2482_v48 = vmul.f32 %v7563_v30, %v8153_v18 }
 0x392   :  { %v7565_v59 = vpop.eup %7564 }
 0x393   :  { %v2464_v14 = vpop.xlane.xlu0 %2463  ;;  %v7567_v8 = vpop.eup %7566  ;;  %v2483_v46 = vmul.f32 %v7565_v59, %v8159_v50  ;;  %v7462_v50 = vld [vmem:[#allocation7 + $0x8] ss:$12 sps:$4 sm:$0xff]   ;;  %v7463_v59 = vld [vmem:[#allocation7 + $0x20] ss:$12 sps:$4 sm:$0xff]  }
 0x394   :  { %7570 = vrcp.f32 %v2464_v14  ;;  %v2484_v24 = vmul.f32 %v7567_v8, %v8157_v32 }
 0x395   :  { %v2467_v22 = vpop.xlane.xlu1 %2466  ;;  %v2490_v39 = vpack.c.bf16 %v2483_v46, %v2482_v48 }
 0x396   :  { %v7569_v12 = vpop.eup %7568  ;;  %7572 = vrcp.f32 %v2467_v22 }
 0x397   :  { %v2485_v47 = vmul.f32 %v7569_v12, %v8165_v63  ;;  %v2470_v56 = vpop.xlane.xlu0 %2469  ;;  %6610 = vmatprep.mubr.msk.bf16.mxu1 %vm2401_vm3, %v2490_v39 }
 0x398   :  { %7574 = vrcp.f32 %v2470_v56  ;;  %v7468_v56 = vld [vmem:[#allocation7 + $0x64] ss:$12 sps:$4 sm:$0xff]  }
 0x399   :  { %v2473_v52 = vpop.xlane.xlu1 %2472  ;;  %v2491_v54 = vpack.c.bf16 %v2485_v47, %v2484_v24  ;;  %v8792_v47 = vmov 0  }
 0x39a   :  { %7576 = vrcp.f32 %v2473_v52 }
 0x39b   :  { %6611 = vmatmul.mubr.msk.bf16.vlgmr.msra.gmra.mrb[44].mxu1 %vm2401_vm3, %v2491_v54 }
 0x39c   :  { %6615 = vmatpush3.bf16.msra.mxu1 %v8086_v23 }
 0x39d   :  { %6616 = vmatprep.subr.bf16.mxu1 %v8095_v44  ;;  %v2873_v18 = vpop.permute.xlu1 %2872 }
 0x39e   :  { %v7571_v61 = vpop.eup %7570 }
 0x39f   :  { %v2486_v63 = vmul.f32 %v7571_v61, %v8169_v1  ;;  %v7464_v1 = vld [vmem:[#allocation7 + $0x38] ss:$12 sps:$4 sm:$0xff]   ;;  %v2884_v61 = vsel %vm2270_vm0, %v2873_v18, 0 }
 0x3a0   :  { %v7573_v53 = vpop.eup %7572  ;;  %6617 = vmatpush3.bf16.msra.mxu1 %v8095_v44 }
 0x3a1   :  { %v2865_v32 = vpop.permute.xlu1 %2864  ;;  %v2487_v0 = vmul.f32 %v7573_v53, %v8173_v31  ;;  %6622 = vmatprep.subr.bf16.mxu1 %v7462_v50  ;;  %v7465_v31 = vld [vmem:[#allocation7 + $0x50] ss:$12 sps:$4 sm:$0xff]  }
 0x3a2   :  { %v7575_v42 = vpop.eup %7574 }
 0x3a3   :  { %v2492_v51 = vpack.c.bf16 %v2487_v0, %v2486_v63  ;;  %v2488_v6 = vmul.f32 %v7575_v42, %v8177_v37  ;;  %v2871_v37 = vpop.permute.xlu0 %2870 }
 0x3a4   :  { %v7577_v62 = vpop.eup %7576  ;;  %v2881_v24 = vsel %vm2270_vm0, %v2871_v37, 0 }
 0x3a5   :  { %v2489_v20 = vmul.f32 %v7577_v62, %v8181_v38  ;;  %6618 = vmatprep.mubr.msk.bf16.mxu1 %vm2401_vm3, %v2492_v51  ;;  %v2944_v15 = vpop.permute.xlu1 %2943  ;;  %v7466_v62 = vld [vmem:[#allocation7 + $0x60] ss:$12 sps:$4 sm:$0xff]  }
 0x3a6   :  { %7092 = vmatprep.subr.msk.bf16.mxu0 %vm2270_vm0, %v2944_v15  ;;  %v2954_v12 = vsel %vm2270_vm0, %v2944_v15, 0  ;;  %v7469_v15 = vld [vmem:[#allocation7 + $0x78] ss:$12 sps:$4 sm:$0xff]  }
 0x3a7   :  { %v2493_v30 = vpack.c.bf16 %v2489_v20, %v2488_v6  ;;  %v2867_v51 = vpop.permute.xlu0 %2866  ;;  %v7471_v6 = vld [vmem:[#allocation7 + $0x7c] ss:$12 sps:$4 sm:$0xff]  }
 0x3a9   :  { %6619 = vmatmul.mubr.msk.bf16.vlgmr.msra.gmra.mrb[48].mxu1 %vm2401_vm3, %v2493_v30  ;;  %v2946_v39 = vpop.permute.xlu1 %2945  ;;  %v7472_v30 = vld [vmem:[#allocation7 + $0x90] ss:$12 sps:$4 sm:$0xff]  }
 0x3aa   :  { %6623 = vmatpush3.bf16.msra.mxu1 %v7462_v50  ;;  %v2957_v54 = vsel %vm2270_vm0, %v2946_v39, 0 }
 0x3ab   :  { %6624 = vmatprep.subr.bf16.mxu1 %v7463_v59 }
 0x3ad   :  { %v2940_v20 = vpop.permute.xlu1 %2939 }
 0x3ae   :  { %6625 = vmatpush3.bf16.msra.mxu1 %v7463_v59  ;;  %v7477_v59 = vld [vmem:[#allocation7 + $0xac] ss:$12 sps:$4 sm:$0xff]  }
 0x3af   :  { %6626 = vmatprep.subr.bf16.mxu1 %v7464_v1 }
 0x3b2   :  { %6627 = vmatpush3.bf16.msra.mxu1 %v7464_v1  ;;  %v7475_v1 = vld [vmem:[#allocation7 + $0xa8] ss:$12 sps:$4 sm:$0xff]  }
 0x3b3   :  { %6628 = vmatprep.subr.bf16.mxu1 %v7465_v31 }
 0x3b6   :  { %6629 = vmatpush3.bf16.msra.mxu1 %v7465_v31 }
 0x3b7   :  { %7090 = vmatprep.subr.msk.bf16.mxu1 %vm2270_vm0, %v2871_v37 }
 0x46e   :  { %v6612_v38 = vpop.f32.mrb[44].mxu1 }
 0x46f   :  { %v2534_v14 = vpop.f32.mrb[45].mxu1 }
 0x470   :  { %v6613_v8 = vpop.f32.mrb[46].mxu1 }
 0x471   :  { %v2605_v48 = vpack.c.bf16 %v6613_v8, %v6612_v38  ;;  %v2537_v46 = vpop.f32.mrb[47].mxu1 }
 0x472   :  { %v2604_v22 = vpack.c.bf16 %v2537_v46, %v2534_v14 }
 0x474   :  { %6222 = vmatmul.mubr.msk.bf16.vlgmr.msra.gmra.mrb[52].mxu0 %vm2270_vm0, %v2604_v22  ;;  %6630 = vmatprep.mubr.msk.bf16.mxu1 %vm2270_vm0, %v2604_v22 }
 0x475   :  { %6647 = vmatpush3.bf16.xpose.msra.mxu0 %v2954_v12  ;;  %6631 = vmatmul.mubr.msk.bf16.vlgmr.msra.gmra.mrb[52].mxu1 %vm2270_vm0, %v2605_v48 }
 0x476   :  { %6639 = vmatpush3.bf16.xpose.msra.mxu1 %v2881_v24  ;;  %7093 = vmatprep.subr.msk.bf16.mxu0 %vm2270_vm0, %v2946_v39 }
 0x477   :  { %7091 = vmatprep.subr.msk.bf16.mxu1 %vm2270_vm0, %v2873_v18  ;;  %2742 = vmatprep.mubr.bf16.mxu0 %v8792_v47  ;;  %v2938_v18 = vpop.permute.xlu0 %2937 }
 0x47c   :  { %v6620_v52 = vpop.f32.mrb[48].mxu1  ;;  %6223 = vmatmul.mubr.msk.bf16.gmra.mrb[56].mxu0 %vm2270_vm0, %v2605_v48 }
 0x47d   :  { %6649 = vmatpush3.bf16.xpose.msra.mxu0 %v2957_v54  ;;  %v2589_v50 = vpop.f32.mrb[49].mxu1  ;;  %2752 = vmatprep.mubr.bf16.mxu0 %v8792_v47 }
 0x47e   :  { %6641 = vmatpush3.bf16.xpose.msra.mxu1 %v2884_v61  ;;  %v6621_v53 = vpop.f32.mrb[50].mxu1  ;;  %3330 = vmatprep.subr.bf16.mxu0 %v7468_v56 }
 0x47f   :  { %v2607_v63 = vpack.c.bf16 %v6621_v53, %v6620_v52  ;;  %v2592_v0 = vpop.f32.mrb[51].mxu1 }
 0x480   :  { %v2606_v42 = vpack.c.bf16 %v2592_v0, %v2589_v50 }
 0x482   :  { %6634 = vmatprep.mubr.msk.bf16.mxu1 %vm2270_vm0, %v2606_v42 }
 0x483   :  { %6635 = vmatmul.mubr.msk.bf16.gmra.mrb[56].mxu1 %vm2270_vm0, %v2607_v63 }
 0x484   :  { %6224 = vmatmul.mubr.msk.bf16.gmra.mrb[60].mxu0 %vm2270_vm0, %v2606_v42  ;;  %6642 = vmatprep.mubr.msk.bf16.mxu1 %vm2270_vm0, %v2865_v32  ;;  %v7474_v32 = vld [vmem:[#allocation7 + $0x94] ss:$12 sps:$4 sm:$0xff]  }
 0x485   :  { %2762 = vmatprep.mubr.bf16.mxu0 %v8792_v47 }
 0x48b   :  { %6643 = vmatmul.mubr.msk.bf16.vlgmr.msra.gmra.mrb[60].mxu1 %vm2270_vm0, %v2867_v51 }
 0x48c   :  { %6225 = vmatmul.mubr.msk.bf16.gmra.mrb[64].mxu0 %vm2270_vm0, %v2607_v63 }
 0x48d   :  { %6650 = vmatprep.mubr.msk.bf16.mxu0 %vm2270_vm0, %v2938_v18 }
 0x494   :  { %6651 = vmatmul.mubr.msk.bf16.vlgmr.msra.gmra.mrb[68].mxu0 %vm2270_vm0, %v2940_v20 }
 0x495   :  { %3331 = vmatpush1.bf16.msra.mxu0 %v7466_v62  ;;  %3362 = vmatprep.mubr.bf16.mxu0 %v8792_v47 }
 0x496   :  { %3332 = vmatprep.subr.bf16.mxu0 %v7471_v6 }
 0x499   :  { %3333 = vmatpush1.bf16.msra.mxu0 %v7469_v15 }
 0x49a   :  { %3334 = vmatprep.subr.bf16.mxu0 %v7474_v32 }
 0x49d   :  { %3335 = vmatpush1.bf16.msra.mxu0 %v7472_v30 }
 0x49e   :  { %3336 = vmatprep.subr.bf16.mxu0 %v7477_v59 }
 0x4a1   :  { %3337 = vmatpush1.bf16.msra.mxu0 %v7475_v1 }
 0x4a2   :  { %7096 = vmatprep.subr.msk.bf16.mxu0 %vm2270_vm0, %v8082_v21 }
 0x55e   :  { %v6644_v31 = vpop.f32.mrb[60].mxu1 }
 0x55f   :  { %v2920_v37 = vpop.f32.mrb[61].mxu1  ;;  %v3010_v46 = vsel %vm8112_vm1, %v6644_v31, -1e+30 }
 0x560   :  { %v3008_v38 = vsel %vm8117_vm2, %v2920_v37, -1e+30  ;;  %v6645_v14 = vpop.f32.mrb[62].mxu1  ;;  %v3022_v39 = vsel %vm2401_vm3, %v3010_v46, -inf }
 0x561   :  { %v2923_v8 = vpop.f32.mrb[63].mxu1  ;;  %v3016_v48 = vsel %vm2401_vm3, %v3008_v38, -inf  ;;  %v3011_v24 = vsel %vm8121_vm4, %v6645_v14, -1e+30 }
 0x562   :  { %v3009_v22 = vsel %vm8127_vm5, %v2923_v8, -1e+30  ;;  %3017 = vmax.xlane.f32.xlu0 %v3016_v48  ;;  %v3025_v50 = vsel %vm2401_vm3, %v3011_v24, -inf }
 0x563   :  { %v3019_v12 = vsel %vm2401_vm3, %v3009_v22, -inf }
 0x564   :  { %3020 = vmax.xlane.f32.xlu1 %v3019_v12 }
 0x566   :  { %3023 = vmax.xlane.f32.xlu0 %v3022_v39 }
 0x567   :  { %v6652_v56 = vpop.f32.mrb[68].mxu0 }
 0x568   :  { %v2993_v52 = vpop.f32.mrb[69].mxu0  ;;  %v3014_v18 = vsel %vm8112_vm1, %v6652_v56, -1e+30 }
 0x569   :  { %v6653_v54 = vpop.f32.mrb[70].mxu0  ;;  %v3012_v61 = vsel %vm8117_vm2, %v2993_v52, -1e+30  ;;  %v3034_v6 = vsel %vm2401_vm3, %v3014_v18, -inf }
 0x56a   :  { %3026 = vmax.xlane.f32.xlu0 %v3025_v50  ;;  %v2996_v53 = vpop.f32.mrb[71].mxu0  ;;  %v3015_v42 = vsel %vm8121_vm4, %v6653_v54, -1e+30  ;;  %v3028_v51 = vsel %vm2401_vm3, %v3012_v61, -inf }
 0x56b   :  { %v3013_v63 = vsel %vm8127_vm5, %v2996_v53, -1e+30  ;;  %v3037_v62 = vsel %vm2401_vm3, %v3015_v42, -inf }
 0x56c   :  { %v3031_v0 = vsel %vm2401_vm3, %v3013_v63, -inf }
 0x56d   :  { %3032 = vmax.xlane.f32.xlu1 %v3031_v0 }
 0x56e   :  { %3029 = vmax.xlane.f32.xlu0 %v3028_v51 }
 0x571   :  { %3038 = vmax.xlane.f32.xlu1 %v3037_v62 }
 0x572   :  { %3035 = vmax.xlane.f32.xlu0 %v3034_v6 }
 0x5ef   :  { %v3018_v20 = vpop.xlane.xlu0 %3017 }
 0x5f0   :  { %v3040_v15 = vsub.f32 %v3008_v38, %v3018_v20 }
 0x5f1   :  { %v3021_v32 = vpop.xlane.xlu1 %3020 }
 0x5f2   :  { %v3048_v1 = vmul.f32 1.442695, %v3040_v15  ;;  %v3041_v31 = vsub.f32 %v3009_v22, %v3021_v32 }
 0x5f3   :  { %v3024_v30 = vpop.xlane.xlu0 %3023 }
 0x5f4   :  { %v3042_v59 = vsub.f32 %v3010_v46, %v3024_v30  ;;  %v3050_v48 = vmul.f32 1.442695, %v3041_v31 }
 0x5f6   :  { %v3052_v37 = vmul.f32 1.442695, %v3042_v59 }
 0x5f7   :  { %v3027_v14 = vpop.xlane.xlu0 %3026 }
 0x5f8   :  { %7578 = vpow2.f32 %v3052_v37  ;;  %v3043_v8 = vsub.f32 %v3011_v24, %v3027_v14 }
 0x5f9   :  { %7580 = vpow2.f32 %v3048_v1 }
 0x5fa   :  { %v3054_v12 = vmul.f32 1.442695, %v3043_v8  ;;  %v3033_v32 = vpop.xlane.xlu1 %3032 }
 0x5fb   :  { %v3030_v39 = vpop.xlane.xlu0 %3029  ;;  %v3045_v1 = vsub.f32 %v3013_v63, %v3033_v32 }
 0x5fc   :  { %7582 = vpow2.f32 %v3054_v12  ;;  %v3044_v56 = vsub.f32 %v3012_v61, %v3030_v39 }
 0x5fd   :  { %7584 = vpow2.f32 %v3050_v48  ;;  %v3058_v37 = vmul.f32 1.442695, %v3045_v1 }
 0x5fe   :  { %v3056_v38 = vmul.f32 1.442695, %v3044_v56  ;;  %v3039_v30 = vpop.xlane.xlu1 %3038 }
 0x5ff   :  { %v3036_v52 = vpop.xlane.xlu0 %3035  ;;  %v3047_v59 = vsub.f32 %v3015_v42, %v3039_v30 }
 0x600   :  { %v3046_v54 = vsub.f32 %v3014_v18, %v3036_v52 }
 0x601   :  { %v3062_v31 = vmul.f32 1.442695, %v3047_v59 }
 0x602   :  { %v8266_v50 = vpop.eup %7578  ;;  %v3060_v53 = vmul.f32 1.442695, %v3046_v54 }
 0x603   :  { %v3070_v46 = vsel %vm2401_vm3, %v8266_v50, 0.0  ;;  %v7581_v22 = vpop.eup %7580 }
 0x604   :  { %7586 = vpow2.f32 %v3060_v53  ;;  %3071 = vadd.xlane.f32.xlu0 %v3070_v46  ;;  %v3064_v0 = vsel %vm2401_vm3, %v7581_v22, 0.0 }
 0x605   :  { %7588 = vpow2.f32 %v3056_v38 }
 0x606   :  { %v7583_v24 = vpop.eup %7582  ;;  %7590 = vpow2.f32 %v3062_v31 }
 0x607   :  { %v3073_v51 = vsel %vm2401_vm3, %v7583_v24, 0.0  ;;  %v7585_v62 = vpop.eup %7584  ;;  %7592 = vpow2.f32 %v3058_v37 }
 0x608   :  { %3065 = vadd.xlane.f32.xlu0 %v3064_v0  ;;  %3074 = vadd.xlane.f32.xlu1 %v3073_v51  ;;  %v3067_v61 = vsel %vm2401_vm3, %v7585_v62, 0.0 }
 0x60c   :  { %3068 = vadd.xlane.f32.xlu1 %v3067_v61 }
 0x60e   :  { %v8273_v18 = vpop.eup %7586 }
 0x60f   :  { %v3082_v6 = vsel %vm2401_vm3, %v8273_v18, 0.0  ;;  %v8277_v20 = vpop.eup %7588 }
 0x610   :  { %3083 = vadd.xlane.f32.xlu0 %v3082_v6  ;;  %v3076_v15 = vsel %vm2401_vm3, %v8277_v20, 0.0  ;;  %v7591_v14 = vpop.eup %7590 }
 0x611   :  { %v3085_v8 = vsel %vm2401_vm3, %v7591_v14, 0.0  ;;  %v7593_v48 = vpop.eup %7592 }
 0x614   :  { %3077 = vadd.xlane.f32.xlu0 %v3076_v15 }
 0x61d   :  { %3112 = vrot.lane.b32.xlu1 %v8076_v3, %s7848_s2  ;;  %v3079_v3 = vsel %vm2401_vm3, %v7593_v48, 0.0 }
 0x621   :  { %3173 = vrot.lane.b32.xlu1 %v8086_v23, %s7848_s2 }
 0x62a   :  { %3110 = vrot.lane.b32.xlu0 %v8066_v58, %s7848_s2 }
 0x645   :  { %3086 = vadd.xlane.f32.xlu1 %v3085_v8 }
 0x649   :  { %3080 = vadd.xlane.f32.xlu1 %v3079_v3 }
 0x65a   :  { %3175 = vrot.lane.b32.xlu1 %v8095_v44, %s7848_s2 }
 0x691   :  { %v3072_v23 = vpop.xlane.xlu0 %3071 }
 0x695   :  { %v3066_v58 = vpop.xlane.xlu0 %3065  ;;  %v3075_v12 = vpop.xlane.xlu1 %3074 }
 0x696   :  { %7594 = vrcp.f32 %v3066_v58 }
 0x699   :  { %v3069_v63 = vpop.xlane.xlu1 %3068 }
 0x69a   :  { %7596 = vrcp.f32 %v3069_v63  ;;  %v7479_v63 = vld [vmem:[#allocation7 + $0x80] ss:$12 sps:$4 sm:$0xff]  }
 0x69b   :  { %7598 = vrcp.f32 %v3075_v12 }
 0x69c   :  { %7600 = vrcp.f32 %v3072_v23 }
 0x69d   :  { %v3084_v42 = vpop.xlane.xlu0 %3083  ;;  %v3113_v38 = vpop.permute.xlu1 %3112 }
 0x6a0   :  { %v7595_v56 = vpop.eup %7594 }
 0x6a1   :  { %v3078_v39 = vpop.xlane.xlu0 %3077  ;;  %v3096_v46 = vmul.f32 %v7595_v56, %v7581_v22  ;;  %v3174_v15 = vpop.permute.xlu1 %3173 }
 0x6a4   :  { %v7597_v52 = vpop.eup %7596 }
 0x6a5   :  { %v7599_v54 = vpop.eup %7598  ;;  %v3111_v53 = vpop.permute.xlu0 %3110  ;;  %v3097_v0 = vmul.f32 %v7597_v52, %v7585_v62  ;;  %v7478_v62 = vld [vmem:[#allocation7 + $0x68] ss:$12 sps:$4 sm:$0xff]  }
 0x6a6   :  { %6654 = vmatprep.subr.bf16.mxu1 %v3111_v53  ;;  %v7601_v51 = vpop.eup %7600  ;;  %v3099_v61 = vmul.f32 %v7599_v54, %v7583_v24  ;;  %v3560_v54 = vsel %vm2270_vm0, %v8082_v21, 0 }
 0x6a7   :  { %6655 = vmatpush3.bf16.msra.mxu1 %v3111_v53  ;;  %v3104_v44 = vpack.c.bf16 %v3097_v0, %v3096_v46  ;;  %v3098_v6 = vmul.f32 %v7601_v51, %v8266_v50  ;;  %v3563_v53 = vsel %vm2270_vm0, %v8091_v36, 0  ;;  %v3502_v46 = vsel %vm2270_vm0, %v8072_v9, 0 }
 0x6a8   :  { %6656 = vmatprep.subr.bf16.mxu1 %v3113_v38 }
 0x6a9   :  { %6658 = vmatprep.mubr.msk.bf16.mxu1 %vm2401_vm3, %v3104_v44  ;;  %v3105_v32 = vpack.c.bf16 %v3099_v61, %v3098_v6 }
 0x6ab   :  { %6657 = vmatpush3.bf16.msra.mxu1 %v3113_v38  ;;  %v3499_v38 = vsel %vm2270_vm0, %v8062_v55, 0 }
 0x6ac   :  { %6662 = vmatprep.subr.bf16.mxu1 %v3174_v15 }
 0x6ae   :  { %6659 = vmatmul.mubr.msk.bf16.vlgmr.msra.gmra.mrb[64].mxu1 %vm2401_vm3, %v3105_v32 }
 0x6af   :  { %6663 = vmatpush3.bf16.msra.mxu1 %v3174_v15 }
 0x6d2   :  { %v3087_v30 = vpop.xlane.xlu1 %3086 }
 0x6d3   :  { %7602 = vrcp.f32 %v3087_v30 }
 0x6d4   :  { %7604 = vrcp.f32 %v3078_v39  ;;  %v7481_v39 = vld [vmem:[#allocation7 + $0xb0] ss:$12 sps:$4 sm:$0xff]  }
 0x6d5   :  { %7606 = vrcp.f32 %v3084_v42  ;;  %v7480_v42 = vld [vmem:[#allocation7 + $0x98] ss:$12 sps:$4 sm:$0xff]  }
 0x6d6   :  { %v3081_v22 = vpop.xlane.xlu1 %3080 }
 0x6d7   :  { %7608 = vrcp.f32 %v3081_v22 }
 0x6da   :  { %v3176_v24 = vpop.permute.xlu1 %3175 }
 0x6db   :  { %6664 = vmatprep.subr.bf16.mxu1 %v3176_v24 }
 0x6dc   :  { %6665 = vmatpush3.bf16.msra.mxu1 %v3176_v24 }
 0x6dd   :  { %6670 = vmatprep.subr.bf16.mxu1 %v7478_v62  ;;  %v7603_v59 = vpop.eup %7602 }
 0x6de   :  { %v7605_v50 = vpop.eup %7604  ;;  %v3103_v37 = vmul.f32 %v7603_v59, %v7591_v14 }
 0x6df   :  { %v7607_v1 = vpop.eup %7606  ;;  %v3100_v8 = vmul.f32 %v7605_v50, %v8277_v20 }
 0x6e0   :  { %v3102_v23 = vmul.f32 %v7607_v1, %v8273_v18 }
 0x6e1   :  { %v7609_v31 = vpop.eup %7608 }
 0x6e2   :  { %v3101_v3 = vmul.f32 %v7609_v31, %v7593_v48  ;;  %v3107_v12 = vpack.c.bf16 %v3103_v37, %v3102_v23 }
 0x6e4   :  { %v3106_v58 = vpack.c.bf16 %v3101_v3, %v3100_v8 }
 0x6e6   :  { %6666 = vmatprep.mubr.msk.bf16.mxu1 %vm2401_vm3, %v3106_v58 }
 0x6e7   :  { %6667 = vmatmul.mubr.msk.bf16.vlgmr.msra.gmra.mrb[68].mxu1 %vm2401_vm3, %v3107_v12 }
 0x6e8   :  { %6671 = vmatpush3.bf16.msra.mxu1 %v7478_v62 }
 0x6e9   :  { %6672 = vmatprep.subr.bf16.mxu1 %v7479_v63 }
 0x6ec   :  { %6673 = vmatpush3.bf16.msra.mxu1 %v7479_v63 }
 0x6ed   :  { %6674 = vmatprep.subr.bf16.mxu1 %v7480_v42 }
 0x6f0   :  { %6675 = vmatpush3.bf16.msra.mxu1 %v7480_v42 }
 0x6f1   :  { %6676 = vmatprep.subr.bf16.mxu1 %v7481_v39 }
 0x6f4   :  { %6677 = vmatpush3.bf16.msra.mxu1 %v7481_v39 }
 0x6f5   :  { %7094 = vmatprep.subr.msk.bf16.mxu1 %vm2270_vm0, %v8062_v55 }
 0x781   :  { %v6660_v18 = vpop.f32.mrb[64].mxu1 }
 0x782   :  { %v3156_v20 = vpop.f32.mrb[65].mxu1 }
 0x783   :  { %v6661_v14 = vpop.f32.mrb[66].mxu1 }
 0x784   :  { %v3235_v48 = vpack.c.bf16 %v6661_v14, %v6660_v18  ;;  %v3159_v56 = vpop.f32.mrb[67].mxu1 }
 0x785   :  { %v3234_v52 = vpack.c.bf16 %v3159_v56, %v3156_v20 }
 0x787   :  { %6250 = vmatmul.mubr.msk.bf16.vlgmr.msra.gmra.mrb[52].mxu0 %vm2270_vm0, %v3234_v52  ;;  %6678 = vmatprep.mubr.msk.bf16.mxu1 %vm2270_vm0, %v3234_v52 }
 0x788   :  { %6695 = vmatpush3.bf16.xpose.msra.mxu0 %v3560_v54  ;;  %6679 = vmatmul.mubr.msk.bf16.vlgmr.msra.gmra.mrb[52].mxu1 %vm2270_vm0, %v3235_v48 }
 0x789   :  { %6687 = vmatpush3.bf16.xpose.msra.mxu1 %v3499_v38  ;;  %7097 = vmatprep.subr.msk.bf16.mxu0 %vm2270_vm0, %v8091_v36 }
 0x78a   :  { %7095 = vmatprep.subr.msk.bf16.mxu1 %vm2270_vm0, %v8072_v9  ;;  %3372 = vmatprep.mubr.bf16.mxu0 %v8792_v47 }
 0x78f   :  { %6251 = vmatmul.mubr.msk.bf16.gmra.mrb[56].mxu0 %vm2270_vm0, %v3235_v48 }
 0x790   :  { %6697 = vmatpush3.bf16.xpose.msra.mxu0 %v3563_v53  ;;  %3382 = vmatprep.mubr.bf16.mxu0 %v8792_v47 }
 0x791   :  { %6689 = vmatpush3.bf16.xpose.msra.mxu1 %v3502_v46 }
 0x792   :  { %6702 = vmatprep.subr.bf16.mxu1 %v8068_v60 }
 0x7ba   :  { %v6668_v0 = vpop.f32.mrb[68].mxu1 }
 0x7bb   :  { %v3219_v51 = vpop.f32.mrb[69].mxu1 }
 0x7bc   :  { %v6669_v44 = vpop.f32.mrb[70].mxu1 }
 0x7bd   :  { %v3237_v61 = vpack.c.bf16 %v6669_v44, %v6668_v0  ;;  %v3222_v6 = vpop.f32.mrb[71].mxu1 }
 0x7be   :  { %v3236_v15 = vpack.c.bf16 %v3222_v6, %v3219_v51 }
 0x7c0   :  { %6252 = vmatmul.mubr.msk.bf16.gmra.mrb[60].mxu0 %vm2270_vm0, %v3236_v15  ;;  %6682 = vmatprep.mubr.msk.bf16.mxu1 %vm2270_vm0, %v3236_v15 }
 0x7c1   :  { %6683 = vmatmul.mubr.msk.bf16.gmra.mrb[56].mxu1 %vm2270_vm0, %v3237_v61  ;;  %3392 = vmatprep.mubr.bf16.mxu0 %v8792_v47 }
 0x7c2   :  { %6690 = vmatprep.mubr.msk.bf16.mxu1 %vm2270_vm0, %v8009_v5 }
 0x7c8   :  { %6253 = vmatmul.mubr.msk.bf16.gmra.mrb[64].mxu0 %vm2270_vm0, %v3237_v61 }
 0x7c9   :  { %6691 = vmatmul.mubr.msk.bf16.vlgmr.msra.gmra.mrb[72].mxu1 %vm2270_vm0, %v8023_v19  ;;  %6698 = vmatprep.mubr.msk.bf16.mxu0 %vm2270_vm0, %v8035_v29 }
 0x7ca   :  { %6703 = vmatpush3.bf16.msra.mxu1 %v8068_v60 }
 0x7cb   :  { %6704 = vmatprep.subr.bf16.mxu1 %v8078_v13 }
 0x7ce   :  { %6705 = vmatpush3.bf16.msra.mxu1 %v8078_v13 }
 0x7cf   :  { %6710 = vmatprep.subr.bf16.mxu1 %v8088_v27 }
 0x7d0   :  { %6699 = vmatmul.mubr.msk.bf16.vlgmr.msra.gmra.mrb[72].mxu0 %vm2270_vm0, %v8051_v45 }
 0x7d1   :  { %3952 = vmatprep.mubr.bf16.mxu0 %v8792_v47 }
 0x89c   :  { %v6692_v32 = vpop.f32.mrb[72].mxu1 }
 0x89d   :  { %v3538_v30 = vpop.f32.mrb[73].mxu1  ;;  %v3616_v50 = vsel %vm8112_vm1, %v6692_v32, -1e+30 }
 0x89e   :  { %v3614_v22 = vsel %vm8117_vm2, %v3538_v30, -1e+30  ;;  %v6693_v62 = vpop.f32.mrb[74].mxu1  ;;  %v3628_v8 = vsel %vm2401_vm3, %v3616_v50, -inf }
 0x89f   :  { %v3541_v24 = vpop.f32.mrb[75].mxu1  ;;  %v3622_v59 = vsel %vm2401_vm3, %v3614_v22, -inf  ;;  %v3617_v3 = vsel %vm8121_vm4, %v6693_v62, -1e+30 }
 0x8a0   :  { %v3615_v1 = vsel %vm8127_vm5, %v3541_v24, -1e+30  ;;  %3623 = vmax.xlane.f32.xlu0 %v3622_v59  ;;  %v3631_v42 = vsel %vm2401_vm3, %v3617_v3, -inf }
 0x8a1   :  { %v3625_v31 = vsel %vm2401_vm3, %v3615_v1, -inf }
 0x8a2   :  { %3626 = vmax.xlane.f32.xlu1 %v3625_v31 }
 0x8a3   :  { %v6700_v37 = vpop.f32.mrb[72].mxu0 }
 0x8a4   :  { %3629 = vmax.xlane.f32.xlu0 %v3628_v8  ;;  %v3599_v23 = vpop.f32.mrb[73].mxu0  ;;  %v3620_v48 = vsel %vm8112_vm1, %v6700_v37, -1e+30 }
 0x8a5   :  { %v6701_v58 = vpop.f32.mrb[74].mxu0  ;;  %v3618_v39 = vsel %vm8117_vm2, %v3599_v23, -1e+30  ;;  %v3640_v52 = vsel %vm2401_vm3, %v3620_v48, -inf }
 0x8a6   :  { %v3602_v12 = vpop.f32.mrb[75].mxu0  ;;  %v3621_v20 = vsel %vm8121_vm4, %v6701_v58, -1e+30  ;;  %v3634_v14 = vsel %vm2401_vm3, %v3618_v39, -inf }
 0x8a7   :  { %v3619_v63 = vsel %vm8127_vm5, %v3602_v12, -1e+30  ;;  %v3643_v56 = vsel %vm2401_vm3, %v3621_v20, -inf }
 0x8a8   :  { %3632 = vmax.xlane.f32.xlu0 %v3631_v42  ;;  %v3637_v18 = vsel %vm2401_vm3, %v3619_v63, -inf }
 0x8a9   :  { %3638 = vmax.xlane.f32.xlu1 %v3637_v18 }
 0x8ac   :  { %3635 = vmax.xlane.f32.xlu0 %v3634_v14 }
 0x8ad   :  { %3644 = vmax.xlane.f32.xlu1 %v3643_v56 }
 0x8b0   :  { %3641 = vmax.xlane.f32.xlu0 %v3640_v52 }
 0x92d   :  { %v3624_v54 = vpop.xlane.xlu0 %3623 }
 0x92e   :  { %v3646_v38 = vsub.f32 %v3614_v22, %v3624_v54 }
 0x92f   :  { %v3627_v53 = vpop.xlane.xlu1 %3626 }
 0x930   :  { %v3654_v46 = vmul.f32 1.442695, %v3646_v38  ;;  %v3647_v0 = vsub.f32 %v3615_v1, %v3627_v53 }
 0x931   :  { %v3630_v51 = vpop.xlane.xlu0 %3629 }
 0x932   :  { %7610 = vpow2.f32 %v3654_v46  ;;  %v3656_v44 = vmul.f32 1.442695, %v3647_v0  ;;  %v3648_v61 = vsub.f32 %v3616_v50, %v3630_v51 }
 0x934   :  { %7612 = vpow2.f32 %v3656_v44  ;;  %v3658_v6 = vmul.f32 1.442695, %v3648_v61  ;;  %v7484_v44 = vld [vmem:[#allocation7 + $0xc4] ss:$12 sps:$4 sm:$0xff]   ;;  %v7482_v61 = vld [vmem:[#allocation7 + $0xc0] ss:$12 sps:$4 sm:$0xff]  }
 0x935   :  { %v3633_v15 = vpop.xlane.xlu0 %3632  ;;  %3920 = vmatprep.subr.bf16.mxu0 %v7484_v44 }
 0x936   :  { %7614 = vpow2.f32 %v3658_v6  ;;  %v3649_v32 = vsub.f32 %v3617_v3, %v3633_v15  ;;  %v3639_v30 = vpop.xlane.xlu1 %3638  ;;  %3921 = vmatpush1.bf16.msra.mxu0 %v7482_v61  ;;  %v7487_v6 = vld [vmem:[#allocation7 + $0xdc] ss:$12 sps:$4 sm:$0xff]   ;;  %v7485_v15 = vld [vmem:[#allocation7 + $0xd8] ss:$12 sps:$4 sm:$0xff]  }
 0x937   :  { %v3651_v62 = vsub.f32 %v3619_v63, %v3639_v30  ;;  %3922 = vmatprep.subr.bf16.mxu0 %v7487_v6  ;;  %v7488_v30 = vld [vmem:[#allocation7 + $0xf0] ss:$12 sps:$4 sm:$0xff]   ;;  %v7496_v61 = vld [vmem:[#allocation7 + $0xf8] ss:$12 sps:$4 sm:$0xff]  }
 0x938   :  { %v3660_v24 = vmul.f32 1.442695, %v3649_v32  ;;  %v7490_v32 = vld [vmem:[#allocation7 + $0xf4] ss:$12 sps:$4 sm:$0xff]  }
 0x939   :  { %v3664_v59 = vmul.f32 1.442695, %v3651_v62  ;;  %v3636_v31 = vpop.xlane.xlu0 %3635  ;;  %v7493_v62 = vld [vmem:[#allocation7 + $0x10c] ss:$12 sps:$4 sm:$0xff]  }
 0x93a   :  { %7616 = vpow2.f32 %v3660_v24  ;;  %v3650_v37 = vsub.f32 %v3618_v39, %v3636_v31  ;;  %v3645_v22 = vpop.xlane.xlu1 %3644  ;;  %3923 = vmatpush1.bf16.msra.mxu0 %v7485_v15  ;;  %v7491_v24 = vld [vmem:[#allocation7 + $0x108] ss:$12 sps:$4 sm:$0xff]  }
 0x93b   :  { %v3653_v8 = vsub.f32 %v3621_v20, %v3645_v22  ;;  %7618 = vpow2.f32 %v3664_v59  ;;  %3924 = vmatprep.subr.bf16.mxu0 %v7490_v32 }
 0x93c   :  { %v8361_v23 = vpop.eup %7610  ;;  %v3662_v1 = vmul.f32 1.442695, %v3650_v37 }
 0x93d   :  { %v3668_v58 = vmul.f32 1.442695, %v3653_v8  ;;  %v3642_v50 = vpop.xlane.xlu0 %3641  ;;  %v3670_v12 = vsel %vm2401_vm3, %v8361_v23, 0.0 }
 0x93e   :  { %v8365_v42 = vpop.eup %7612  ;;  %7620 = vpow2.f32 %v3662_v1  ;;  %v3652_v3 = vsub.f32 %v3620_v48, %v3642_v50  ;;  %3671 = vadd.xlane.f32.xlu0 %v3670_v12  ;;  %3925 = vmatpush1.bf16.msra.mxu0 %v7488_v30 }
 0x93f   :  { %v3673_v63 = vsel %vm2401_vm3, %v8365_v42, 0.0  ;;  %7622 = vpow2.f32 %v3668_v58  ;;  %3926 = vmatprep.subr.bf16.mxu0 %v7493_v62 }
 0x940   :  { %v8369_v39 = vpop.eup %7614  ;;  %v3666_v18 = vmul.f32 1.442695, %v3652_v3  ;;  %3674 = vadd.xlane.f32.xlu1 %v3673_v63 }
 0x941   :  { %v3676_v20 = vsel %vm2401_vm3, %v8369_v39, 0.0 }
 0x942   :  { %7624 = vpow2.f32 %v3666_v18  ;;  %3677 = vadd.xlane.f32.xlu0 %v3676_v20  ;;  %3927 = vmatpush1.bf16.msra.mxu0 %v7491_v24 }
 0x944   :  { %v8373_v14 = vpop.eup %7616 }
 0x945   :  { %v3679_v56 = vsel %vm2401_vm3, %v8373_v14, 0.0  ;;  %v8377_v48 = vpop.eup %7618 }
 0x946   :  { %3680 = vadd.xlane.f32.xlu1 %v3679_v56  ;;  %v3685_v38 = vsel %vm2401_vm3, %v8377_v48, 0.0 }
 0x948   :  { %v8379_v52 = vpop.eup %7620 }
 0x949   :  { %v3682_v54 = vsel %vm2401_vm3, %v8379_v52, 0.0  ;;  %v8385_v53 = vpop.eup %7622 }
 0x94a   :  { %3683 = vadd.xlane.f32.xlu0 %v3682_v54  ;;  %3686 = vadd.xlane.f32.xlu1 %v3685_v38  ;;  %v3691_v51 = vsel %vm2401_vm3, %v8385_v53, 0.0  ;;  %v7494_v54 = vld [vmem:[#allocation7 + $0xc8] ss:$12 sps:$4 sm:$0xff]  }
 0x94c   :  { %v8387_v46 = vpop.eup %7624 }
 0x94d   :  { %v3688_v0 = vsel %vm2401_vm3, %v8387_v46, 0.0 }
 0x94e   :  { %3689 = vadd.xlane.f32.xlu0 %v3688_v0  ;;  %3692 = vadd.xlane.f32.xlu1 %v3691_v51 }
 0x95f   :  { %4092 = vrot.lane.b32.xlu1 %v8072_v9, %s7848_s2 }
 0x963   :  { %4084 = vrot.lane.b32.xlu1 %v8009_v5, %s7848_s2 }
 0x964   :  { %4090 = vrot.lane.b32.xlu0 %v8062_v55, %s7848_s2 }
 0x967   :  { %4163 = vrot.lane.b32.xlu1 %v8082_v21, %s7848_s2 }
 0x968   :  { %4086 = vrot.lane.b32.xlu0 %v8023_v19, %s7848_s2 }
 0x96b   :  { %4165 = vrot.lane.b32.xlu1 %v8091_v36, %s7848_s2 }
 0x96c   :  { %4157 = vrot.lane.b32.xlu0 %v8035_v29, %s7848_s2 }
 0x96f   :  { %4159 = vrot.lane.b32.xlu1 %v8051_v45, %s7848_s2 }
 0x9cb   :  { %v3672_v5 = vpop.xlane.xlu0 %3671 }
 0x9cc   :  { %7626 = vrcp.f32 %v3672_v5 }
 0x9cd   :  { %v3675_v55 = vpop.xlane.xlu1 %3674 }
 0x9ce   :  { %7628 = vrcp.f32 %v3675_v55 }
 0x9cf   :  { %v3678_v9 = vpop.xlane.xlu0 %3677 }
 0x9d0   :  { %7630 = vrcp.f32 %v3678_v9 }
 0x9d3   :  { %v3681_v21 = vpop.xlane.xlu1 %3680 }
 0x9d4   :  { %7632 = vrcp.f32 %v3681_v21 }
 0x9d6   :  { %v7627_v59 = vpop.eup %7626 }
 0x9d7   :  { %v3684_v19 = vpop.xlane.xlu0 %3683  ;;  %v3687_v31 = vpop.xlane.xlu1 %3686  ;;  %v3702_v36 = vmul.f32 %v7627_v59, %v8361_v23 }
 0x9d8   :  { %v7629_v37 = vpop.eup %7628  ;;  %7634 = vrcp.f32 %v3684_v19 }
 0x9d9   :  { %7636 = vrcp.f32 %v3687_v31  ;;  %v3703_v29 = vmul.f32 %v7629_v37, %v8365_v42 }
 0x9da   :  { %v7631_v1 = vpop.eup %7630 }
 0x9db   :  { %v3690_v22 = vpop.xlane.xlu0 %3689  ;;  %v3693_v45 = vpop.xlane.xlu1 %3692  ;;  %v3710_v8 = vpack.c.bf16 %v3703_v29, %v3702_v36  ;;  %v3704_v50 = vmul.f32 %v7631_v1, %v8369_v39 }
 0x9dc   :  { %7638 = vrcp.f32 %v3690_v22  ;;  %v7500_v22 = vld [vmem:[#allocation7 + $0x124] ss:$12 sps:$4 sm:$0xff]  }
 0x9dd   :  { %7640 = vrcp.f32 %v3693_v45  ;;  %6706 = vmatprep.mubr.msk.bf16.mxu1 %vm2401_vm3, %v3710_v8 }
 0x9de   :  { %v7633_v58 = vpop.eup %7632 }
 0x9df   :  { %v3705_v12 = vmul.f32 %v7633_v58, %v8373_v14  ;;  %v8414_v3 = vpop.permute.xlu1 %4092  ;;  %v7498_v58 = vld [vmem:[#allocation7 + $0x120] ss:$12 sps:$4 sm:$0xff]  }
 0x9e0   :  { %v4104_v45 = vsel %vm2270_vm0, %v8414_v3, 0 }
 0x9e1   :  { %v3711_v63 = vpack.c.bf16 %v3705_v12, %v3704_v50  ;;  %v7503_v50 = vld [vmem:[#allocation7 + $0x13c] ss:$12 sps:$4 sm:$0xff]  }
 0x9e2   :  { %v7635_v18 = vpop.eup %7634 }
 0x9e3   :  { %v7637_v23 = vpop.eup %7636  ;;  %6707 = vmatmul.mubr.msk.bf16.vlgmr.msra.gmra.mrb[76].mxu1 %vm2401_vm3, %v3711_v63  ;;  %v4085_v42 = vpop.permute.xlu1 %4084  ;;  %v3706_v20 = vmul.f32 %v7635_v18, %v8379_v52  ;;  %v7506_v63 = vld [vmem:[#allocation7 + $0x154] ss:$12 sps:$4 sm:$0xff]   ;;  %v7504_v18 = vld [vmem:[#allocation7 + $0x150] ss:$12 sps:$4 sm:$0xff]  }
 0x9e4   :  { %6711 = vmatpush3.bf16.msra.mxu1 %v8088_v27  ;;  %v3707_v56 = vmul.f32 %v7637_v23, %v8377_v48  ;;  %v7495_v48 = vld [vmem:[#allocation7 + $0xe0] ss:$12 sps:$4 sm:$0xff]  }
 0x9e5   :  { %6712 = vmatprep.subr.bf16.mxu1 %v8097_v49  ;;  %v7509_v23 = vld [vmem:[#allocation7 + $0x16c] ss:$12 sps:$4 sm:$0xff]  }
 0x9e6   :  { %v7639_v39 = vpop.eup %7638  ;;  %v3712_v38 = vpack.c.bf16 %v3707_v56, %v3706_v20 }
 0x9e7   :  { %v7641_v14 = vpop.eup %7640  ;;  %v3708_v0 = vmul.f32 %v7639_v39, %v8387_v46  ;;  %v4164_v51 = vpop.permute.xlu1 %4163  ;;  %v7497_v46 = vld [vmem:[#allocation7 + $0x110] ss:$12 sps:$4 sm:$0xff]  }
 0x9e8   :  { %v3709_v44 = vmul.f32 %v7641_v14, %v8385_v53  ;;  %6713 = vmatpush3.bf16.msra.mxu1 %v8097_v49  ;;  %6714 = vmatprep.mubr.msk.bf16.mxu1 %vm2401_vm3, %v3712_v38  ;;  %v4091_v53 = vpop.permute.xlu0 %4090  ;;  %v4174_v5 = vsel %vm2270_vm0, %v4164_v51, 0 }
 0x9e9   :  { %7100 = vmatprep.subr.msk.bf16.mxu0 %vm2270_vm0, %v4164_v51  ;;  %6718 = vmatprep.subr.bf16.mxu1 %v7494_v54  ;;  %v4101_v55 = vsel %vm2270_vm0, %v4091_v53, 0 }
 0x9ea   :  { %v3713_v52 = vpack.c.bf16 %v3709_v44, %v3708_v0 }
 0x9eb   :  { %v4166_v9 = vpop.permute.xlu1 %4165 }
 0x9ec   :  { %6715 = vmatmul.mubr.msk.bf16.vlgmr.msra.gmra.mrb[80].mxu1 %vm2401_vm3, %v3713_v52  ;;  %v4177_v29 = vsel %vm2270_vm0, %v4166_v9, 0  ;;  %v4087_v8 = vpop.permute.xlu0 %4086 }
 0x9ed   :  { %6719 = vmatpush3.bf16.msra.mxu1 %v7494_v54 }
 0x9ee   :  { %6720 = vmatprep.subr.bf16.mxu1 %v7495_v48 }
 0x9ef   :  { %v4160_v12 = vpop.permute.xlu1 %4159 }
 0x9f0   :  { %v4158_v1 = vpop.permute.xlu0 %4157 }
 0x9f1   :  { %6721 = vmatpush3.bf16.msra.mxu1 %v7495_v48 }
 0x9f2   :  { %6722 = vmatprep.subr.bf16.mxu1 %v7496_v61 }
 0x9f5   :  { %6723 = vmatpush3.bf16.msra.mxu1 %v7496_v61 }
 0x9f6   :  { %6724 = vmatprep.subr.bf16.mxu1 %v7497_v46 }
 0x9f9   :  { %6725 = vmatpush3.bf16.msra.mxu1 %v7497_v46 }
 0x9fa   :  { %7098 = vmatprep.subr.msk.bf16.mxu1 %vm2270_vm0, %v4091_v53 }
 0xab6   :  { %v6708_v6 = vpop.f32.mrb[76].mxu1 }
 0xab7   :  { %v3754_v15 = vpop.f32.mrb[77].mxu1 }
 0xab8   :  { %v6709_v32 = vpop.f32.mrb[78].mxu1 }
 0xab9   :  { %v3825_v30 = vpack.c.bf16 %v6709_v32, %v6708_v6  ;;  %v3757_v62 = vpop.f32.mrb[79].mxu1 }
 0xaba   :  { %v3824_v24 = vpack.c.bf16 %v3757_v62, %v3754_v15 }
 0xabc   :  { %6278 = vmatmul.mubr.msk.bf16.vlgmr.msra.gmra.mrb[52].mxu0 %vm2270_vm0, %v3824_v24  ;;  %6726 = vmatprep.mubr.msk.bf16.mxu1 %vm2270_vm0, %v3824_v24 }
 0xabd   :  { %6743 = vmatpush3.bf16.xpose.msra.mxu0 %v4174_v5  ;;  %6727 = vmatmul.mubr.msk.bf16.vlgmr.msra.gmra.mrb[52].mxu1 %vm2270_vm0, %v3825_v30 }
 0xabe   :  { %6735 = vmatpush3.bf16.xpose.msra.mxu1 %v4101_v55  ;;  %7101 = vmatprep.subr.msk.bf16.mxu0 %vm2270_vm0, %v4166_v9 }
 0xabf   :  { %v6716_v21 = vpop.f32.mrb[80].mxu1  ;;  %7099 = vmatprep.subr.msk.bf16.mxu1 %vm2270_vm0, %v8414_v3  ;;  %3962 = vmatprep.mubr.bf16.mxu0 %v8792_v47  ;;  %v7501_v3 = vld [vmem:[#allocation7 + $0x138] ss:$12 sps:$4 sm:$0xff]  }
 0xac0   :  { %v3809_v59 = vpop.f32.mrb[81].mxu1 }
 0xac1   :  { %v6717_v19 = vpop.f32.mrb[82].mxu1 }
 0xac2   :  { %v3827_v31 = vpack.c.bf16 %v6717_v19, %v6716_v21  ;;  %v3812_v37 = vpop.f32.mrb[83].mxu1 }
 0xac3   :  { %v3826_v36 = vpack.c.bf16 %v3812_v37, %v3809_v59 }
 0xac4   :  { %6279 = vmatmul.mubr.msk.bf16.gmra.mrb[56].mxu0 %vm2270_vm0, %v3825_v30 }
 0xac5   :  { %6730 = vmatprep.mubr.msk.bf16.mxu1 %vm2270_vm0, %v3826_v36  ;;  %6745 = vmatpush3.bf16.xpose.msra.mxu0 %v4177_v29 }
 0xac6   :  { %6731 = vmatmul.mubr.msk.bf16.gmra.mrb[56].mxu1 %vm2270_vm0, %v3827_v31  ;;  %3972 = vmatprep.mubr.bf16.mxu0 %v8792_v47 }
 0xac7   :  { %6737 = vmatpush3.bf16.xpose.msra.mxu1 %v4104_v45  ;;  %6738 = vmatprep.mubr.msk.bf16.mxu1 %vm2270_vm0, %v4085_v42  ;;  %v7507_v42 = vld [vmem:[#allocation7 + $0x168] ss:$12 sps:$4 sm:$0xff]  }
 0xac8   :  { %4550 = vmatprep.subr.bf16.mxu0 %v7500_v22 }
 0xacc   :  { %6280 = vmatmul.mubr.msk.bf16.gmra.mrb[60].mxu0 %vm2270_vm0, %v3826_v36 }
 0xacd   :  { %3982 = vmatprep.mubr.bf16.mxu0 %v8792_v47 }
 0xace   :  { %6739 = vmatmul.mubr.msk.bf16.vlgmr.msra.gmra.mrb[84].mxu1 %vm2270_vm0, %v4087_v8 }
 0xad4   :  { %6281 = vmatmul.mubr.msk.bf16.gmra.mrb[64].mxu0 %vm2270_vm0, %v3827_v31 }
 0xad5   :  { %6746 = vmatprep.mubr.msk.bf16.mxu0 %vm2270_vm0, %v4158_v1 }
 0xadc   :  { %6747 = vmatmul.mubr.msk.bf16.vlgmr.msra.gmra.mrb[76].mxu0 %vm2270_vm0, %v4160_v12 }
 0xadd   :  { %4551 = vmatpush1.bf16.msra.mxu0 %v7498_v58  ;;  %4582 = vmatprep.mubr.bf16.mxu0 %v8792_v47 }
 0xade   :  { %4552 = vmatprep.subr.bf16.mxu0 %v7503_v50 }
 0xae1   :  { %4553 = vmatpush1.bf16.msra.mxu0 %v7501_v3 }
 0xae2   :  { %4554 = vmatprep.subr.bf16.mxu0 %v7506_v63 }
 0xae5   :  { %4555 = vmatpush1.bf16.msra.mxu0 %v7504_v18 }
 0xae6   :  { %4556 = vmatprep.subr.bf16.mxu0 %v7509_v23 }
 0xae9   :  { %4557 = vmatpush1.bf16.msra.mxu0 %v7507_v42 }
 0xaea   :  { %7104 = vmatprep.subr.msk.bf16.mxu0 %vm2270_vm0, %v8084_v25 }
 0xba1   :  { %v6740_v20 = vpop.f32.mrb[84].mxu1 }
 0xba2   :  { %v4140_v56 = vpop.f32.mrb[85].mxu1  ;;  %v4230_v0 = vsel %vm8112_vm1, %v6740_v20, -1e+30 }
 0xba3   :  { %v4228_v54 = vsel %vm8117_vm2, %v4140_v56, -1e+30  ;;  %v6741_v39 = vpop.f32.mrb[86].mxu1  ;;  %v4242_v52 = vsel %vm2401_vm3, %v4230_v0, -inf }
 0xba4   :  { %v4143_v38 = vpop.f32.mrb[87].mxu1  ;;  %v4236_v14 = vsel %vm2401_vm3, %v4228_v54, -inf  ;;  %v4231_v48 = vsel %vm8121_vm4, %v6741_v39, -1e+30 }
 0xba5   :  { %v4229_v51 = vsel %vm8127_vm5, %v4143_v38, -1e+30  ;;  %4237 = vmax.xlane.f32.xlu0 %v4236_v14  ;;  %v4245_v61 = vsel %vm2401_vm3, %v4231_v48, -inf }
 0xba6   :  { %v4239_v44 = vsel %vm2401_vm3, %v4229_v51, -inf }
 0xba7   :  { %4240 = vmax.xlane.f32.xlu1 %v4239_v44 }
 0xba9   :  { %4243 = vmax.xlane.f32.xlu0 %v4242_v52 }
 0xbad   :  { %4246 = vmax.xlane.f32.xlu0 %v4245_v61 }
 0xbaf   :  { %v6748_v46 = vpop.f32.mrb[76].mxu0 }
 0xbb0   :  { %v4213_v53 = vpop.f32.mrb[77].mxu0  ;;  %v4234_v62 = vsel %vm8112_vm1, %v6748_v46, -1e+30 }
 0xbb1   :  { %v4232_v6 = vsel %vm8117_vm2, %v4213_v53, -1e+30  ;;  %v6749_v15 = vpop.f32.mrb[78].mxu0  ;;  %v4254_v9 = vsel %vm2401_vm3, %v4234_v62, -inf }
 0xbb2   :  { %v4216_v32 = vpop.f32.mrb[79].mxu0  ;;  %v4248_v30 = vsel %vm2401_vm3, %v4232_v6, -inf  ;;  %v4235_v55 = vsel %vm8121_vm4, %v6749_v15, -1e+30 }
 0xbb3   :  { %v4233_v24 = vsel %vm8127_vm5, %v4216_v32, -1e+30  ;;  %4249 = vmax.xlane.f32.xlu0 %v4248_v30  ;;  %v4257_v21 = vsel %vm2401_vm3, %v4235_v55, -inf }
 0xbb4   :  { %v4251_v5 = vsel %vm2401_vm3, %v4233_v24, -inf }
 0xbb5   :  { %4252 = vmax.xlane.f32.xlu1 %v4251_v5 }
 0xbb7   :  { %4255 = vmax.xlane.f32.xlu0 %v4254_v9 }
 0xbb9   :  { %4258 = vmax.xlane.f32.xlu1 %v4257_v21 }
 0xc32   :  { %v4238_v59 = vpop.xlane.xlu0 %4237 }
 0xc33   :  { %v4260_v19 = vsub.f32 %v4228_v54, %v4238_v59 }
 0xc34   :  { %v4241_v31 = vpop.xlane.xlu1 %4240 }
 0xc35   :  { %v4268_v29 = vmul.f32 1.442695, %v4260_v19  ;;  %v4261_v22 = vsub.f32 %v4229_v51, %v4241_v31 }
 0xc36   :  { %v4244_v37 = vpop.xlane.xlu0 %4243 }
 0xc37   :  { %v4262_v36 = vsub.f32 %v4230_v0, %v4244_v37  ;;  %v4270_v58 = vmul.f32 1.442695, %v4261_v22 }
 0xc39   :  { %v4272_v45 = vmul.f32 1.442695, %v4262_v36 }
 0xc3a   :  { %v4247_v8 = vpop.xlane.xlu0 %4246 }
 0xc3b   :  { %7642 = vpow2.f32 %v4272_v45  ;;  %v4263_v1 = vsub.f32 %v4231_v48, %v4247_v8 }
 0xc3c   :  { %7644 = vpow2.f32 %v4268_v29 }
 0xc3d   :  { %v4274_v50 = vmul.f32 1.442695, %v4263_v1 }
 0xc3f   :  { %7646 = vpow2.f32 %v4274_v50 }
 0xc40   :  { %v4250_v12 = vpop.xlane.xlu0 %4249  ;;  %7648 = vpow2.f32 %v4270_v58 }
 0xc41   :  { %v4264_v3 = vsub.f32 %v4232_v6, %v4250_v12 }
 0xc42   :  { %v4253_v46 = vpop.xlane.xlu1 %4252 }
 0xc43   :  { %v4276_v56 = vmul.f32 1.442695, %v4264_v3  ;;  %v4265_v15 = vsub.f32 %v4233_v24, %v4253_v46  ;;  %v7512_v46 = vld [vmem:[#allocation7 + $0x158] ss:$12 sps:$4 sm:$0xff]  }
 0xc44   :  { %v4256_v63 = vpop.xlane.xlu0 %4255 }
 0xc45   :  { %v8478_v18 = vpop.eup %7642  ;;  %v4266_v23 = vsub.f32 %v4234_v62, %v4256_v63  ;;  %v4278_v30 = vmul.f32 1.442695, %v4265_v15 }
 0xc46   :  { %v4290_v42 = vsel %vm2401_vm3, %v8478_v18, 0.0  ;;  %v7645_v20 = vpop.eup %7644  ;;  %v4259_v53 = vpop.xlane.xlu1 %4258 }
 0xc47   :  { %v4280_v54 = vmul.f32 1.442695, %v4266_v23  ;;  %4291 = vadd.xlane.f32.xlu0 %v4290_v42  ;;  %v4284_v38 = vsel %vm2401_vm3, %v7645_v20, 0.0  ;;  %v4267_v6 = vsub.f32 %v4235_v55, %v4259_v53  ;;  %v7510_v23 = vld [vmem:[#allocation7 + $0x128] ss:$12 sps:$4 sm:$0xff]  }
 0xc48   :  { %v7513_v53 = vld [vmem:[#allocation7 + $0x170] ss:$12 sps:$4 sm:$0xff]  }
 0xc49   :  { %v7647_v39 = vpop.eup %7646  ;;  %7650 = vpow2.f32 %v4280_v54  ;;  %v4282_v32 = vmul.f32 1.442695, %v4267_v6 }
 0xc4a   :  { %v4293_v14 = vsel %vm2401_vm3, %v7647_v39, 0.0  ;;  %v7649_v0 = vpop.eup %7648  ;;  %7652 = vpow2.f32 %v4276_v56 }
 0xc4b   :  { %4285 = vadd.xlane.f32.xlu0 %v4284_v38  ;;  %4294 = vadd.xlane.f32.xlu1 %v4293_v14  ;;  %v4287_v51 = vsel %vm2401_vm3, %v7649_v0, 0.0  ;;  %7654 = vpow2.f32 %v4282_v32 }
 0xc4c   :  { %7656 = vpow2.f32 %v4278_v30 }
 0xc4f   :  { %4288 = vadd.xlane.f32.xlu1 %v4287_v51 }
 0xc53   :  { %v8485_v44 = vpop.eup %7650 }
 0xc54   :  { %v4302_v52 = vsel %vm2401_vm3, %v8485_v44, 0.0  ;;  %v8489_v48 = vpop.eup %7652 }
 0xc55   :  { %4303 = vadd.xlane.f32.xlu0 %v4302_v52  ;;  %v4296_v61 = vsel %vm2401_vm3, %v8489_v48, 0.0  ;;  %v7655_v62 = vpop.eup %7654 }
 0xc56   :  { %v4305_v5 = vsel %vm2401_vm3, %v7655_v62, 0.0  ;;  %v7657_v9 = vpop.eup %7656 }
 0xc59   :  { %4297 = vadd.xlane.f32.xlu0 %v4296_v61  ;;  %v7511_v61 = vld [vmem:[#allocation7 + $0x140] ss:$12 sps:$4 sm:$0xff]  }
 0xc60   :  { %4332 = vrot.lane.b32.xlu1 %v8078_v13, %s7848_s2  ;;  %v4299_v13 = vsel %vm2401_vm3, %v7657_v9, 0.0 }
 0xc64   :  { %4393 = vrot.lane.b32.xlu1 %v8088_v27, %s7848_s2 }
 0xc6f   :  { %4330 = vrot.lane.b32.xlu0 %v8068_v60, %s7848_s2 }
 0xc88   :  { %4306 = vadd.xlane.f32.xlu1 %v4305_v5  ;;  %v4719_v5 = vsel %vm2270_vm0, %v8064_v43, 0 }
 0xc8c   :  { %4300 = vadd.xlane.f32.xlu1 %v4299_v13  ;;  %v4722_v13 = vsel %vm2270_vm0, %v8074_v10, 0 }
 0xc9d   :  { %4395 = vrot.lane.b32.xlu1 %v8097_v49, %s7848_s2 }
 0xcd4   :  { %v4292_v27 = vpop.xlane.xlu0 %4291 }
 0xcd8   :  { %v4286_v21 = vpop.xlane.xlu0 %4285  ;;  %v4295_v60 = vpop.xlane.xlu1 %4294 }
 0xcd9   :  { %7658 = vrcp.f32 %v4286_v21 }
 0xcdc   :  { %v4289_v24 = vpop.xlane.xlu1 %4288 }
 0xcdd   :  { %7660 = vrcp.f32 %v4289_v24 }
 0xcde   :  { %7662 = vrcp.f32 %v4295_v60 }
 0xcdf   :  { %7664 = vrcp.f32 %v4292_v27 }
 0xce0   :  { %v4333_v22 = vpop.permute.xlu1 %4332 }
 0xce2   :  { %v4304_v55 = vpop.xlane.xlu0 %4303 }
 0xce3   :  { %v7659_v59 = vpop.eup %7658 }
 0xce4   :  { %v4316_v37 = vmul.f32 %v7659_v59, %v7645_v20  ;;  %v4394_v50 = vpop.permute.xlu1 %4393 }
 0xce6   :  { %v4298_v19 = vpop.xlane.xlu0 %4297 }
 0xce7   :  { %v7661_v31 = vpop.eup %7660 }
 0xce8   :  { %v4317_v36 = vmul.f32 %v7661_v31, %v7649_v0  ;;  %v7663_v29 = vpop.eup %7662 }
 0xce9   :  { %v7665_v49 = vpop.eup %7664  ;;  %v4319_v1 = vmul.f32 %v7663_v29, %v7647_v39 }
 0xcea   :  { %v4331_v45 = vpop.permute.xlu0 %4330  ;;  %v4324_v8 = vpack.c.bf16 %v4317_v36, %v4316_v37  ;;  %v4318_v58 = vmul.f32 %v7665_v49, %v8478_v18 }
 0xceb   :  { %6750 = vmatprep.subr.bf16.mxu1 %v4331_v45 }
 0xcec   :  { %6754 = vmatprep.mubr.msk.bf16.mxu1 %vm2401_vm3, %v4324_v8  ;;  %6751 = vmatpush3.bf16.msra.mxu1 %v4331_v45  ;;  %v4325_v12 = vpack.c.bf16 %v4319_v1, %v4318_v58 }
 0xced   :  { %6752 = vmatprep.subr.bf16.mxu1 %v4333_v22 }
 0xcf0   :  { %6753 = vmatpush3.bf16.msra.mxu1 %v4333_v22 }
 0xcf1   :  { %6758 = vmatprep.subr.bf16.mxu1 %v4394_v50 }
 0xcf3   :  { %6755 = vmatmul.mubr.msk.bf16.vlgmr.msra.gmra.mrb[88].mxu1 %vm2401_vm3, %v4325_v12 }
 0xcf4   :  { %6759 = vmatpush3.bf16.msra.mxu1 %v4394_v50 }
 0xd15   :  { %v4307_v3 = vpop.xlane.xlu1 %4306 }
 0xd16   :  { %7666 = vrcp.f32 %v4307_v3 }
 0xd17   :  { %7668 = vrcp.f32 %v4298_v19 }
 0xd18   :  { %7670 = vrcp.f32 %v4304_v55 }
 0xd19   :  { %v4301_v63 = vpop.xlane.xlu1 %4300 }
 0xd1a   :  { %7672 = vrcp.f32 %v4301_v63 }
 0xd1d   :  { %v4396_v42 = vpop.permute.xlu1 %4395 }
 0xd1e   :  { %6760 = vmatprep.subr.bf16.mxu1 %v4396_v42 }
 0xd1f   :  { %6761 = vmatpush3.bf16.msra.mxu1 %v4396_v42 }
 0xd20   :  { %6766 = vmatprep.subr.bf16.mxu1 %v7510_v23  ;;  %v7667_v20 = vpop.eup %7666 }
 0xd21   :  { %v7669_v18 = vpop.eup %7668  ;;  %v4323_v39 = vmul.f32 %v7667_v20, %v7655_v62  ;;  %v4780_v62 = vsel %vm2270_vm0, %v8084_v25, 0 }
 0xd22   :  { %v7671_v56 = vpop.eup %7670  ;;  %v4320_v38 = vmul.f32 %v7669_v18, %v8489_v48 }
 0xd23   :  { %v4322_v0 = vmul.f32 %v7671_v56, %v8485_v44 }
 0xd24   :  { %v7673_v54 = vpop.eup %7672 }
 0xd25   :  { %v4321_v14 = vmul.f32 %v7673_v54, %v7657_v9  ;;  %v4327_v52 = vpack.c.bf16 %v4323_v39, %v4322_v0  ;;  %v4783_v9 = vsel %vm2270_vm0, %v8093_v41, 0 }
 0xd27   :  { %v4326_v51 = vpack.c.bf16 %v4321_v14, %v4320_v38 }
 0xd29   :  { %6762 = vmatprep.mubr.msk.bf16.mxu1 %vm2401_vm3, %v4326_v51 }
 0xd2a   :  { %6763 = vmatmul.mubr.msk.bf16.vlgmr.msra.gmra.mrb[92].mxu1 %vm2401_vm3, %v4327_v52 }
 0xd2b   :  { %6767 = vmatpush3.bf16.msra.mxu1 %v7510_v23 }
 0xd2c   :  { %6768 = vmatprep.subr.bf16.mxu1 %v7511_v61 }
 0xd2f   :  { %6769 = vmatpush3.bf16.msra.mxu1 %v7511_v61 }
 0xd30   :  { %6770 = vmatprep.subr.bf16.mxu1 %v7512_v46 }
 0xd33   :  { %6771 = vmatpush3.bf16.msra.mxu1 %v7512_v46 }
 0xd34   :  { %6772 = vmatprep.subr.bf16.mxu1 %v7513_v53 }
 0xd37   :  { %6773 = vmatpush3.bf16.msra.mxu1 %v7513_v53 }
 0xd38   :  { %7102 = vmatprep.subr.msk.bf16.mxu1 %vm2270_vm0, %v8064_v43 }
 0xdc6   :  { %v6756_v44 = vpop.f32.mrb[88].mxu1 }
 0xdc7   :  { %v4376_v48 = vpop.f32.mrb[89].mxu1 }
 0xdc8   :  { %v6757_v6 = vpop.f32.mrb[90].mxu1 }
 0xdc9   :  { %v4455_v15 = vpack.c.bf16 %v6757_v6, %v6756_v44  ;;  %v4379_v32 = vpop.f32.mrb[91].mxu1 }
 0xdca   :  { %v4454_v30 = vpack.c.bf16 %v4379_v32, %v4376_v48 }
 0xdcc   :  { %6306 = vmatmul.mubr.msk.bf16.vlgmr.msra.gmra.mrb[52].mxu0 %vm2270_vm0, %v4454_v30  ;;  %6774 = vmatprep.mubr.msk.bf16.mxu1 %vm2270_vm0, %v4454_v30 }
 0xdcd   :  { %6791 = vmatpush3.bf16.xpose.msra.mxu0 %v4780_v62  ;;  %6775 = vmatmul.mubr.msk.bf16.vlgmr.msra.gmra.mrb[52].mxu1 %vm2270_vm0, %v4455_v15 }
 0xdce   :  { %6783 = vmatpush3.bf16.xpose.msra.mxu1 %v4719_v5  ;;  %7105 = vmatprep.subr.msk.bf16.mxu0 %vm2270_vm0, %v8093_v41 }
 0xdcf   :  { %7103 = vmatprep.subr.msk.bf16.mxu1 %vm2270_vm0, %v8074_v10  ;;  %4592 = vmatprep.mubr.bf16.mxu0 %v8792_v47 }
 0xdd4   :  { %6307 = vmatmul.mubr.msk.bf16.gmra.mrb[56].mxu0 %vm2270_vm0, %v4455_v15 }
 0xdd5   :  { %6793 = vmatpush3.bf16.xpose.msra.mxu0 %v4783_v9  ;;  %4602 = vmatprep.mubr.bf16.mxu0 %v8792_v47 }
 0xdd6   :  { %6785 = vmatpush3.bf16.xpose.msra.mxu1 %v4722_v13 }
 0xdd7   :  { %6798 = vmatprep.subr.bf16.mxu1 %v8099_v7 }
 0xdfd   :  { %v6764_v27 = vpop.f32.mrb[92].mxu1 }
 0xdfe   :  { %v4439_v21 = vpop.f32.mrb[93].mxu1 }
 0xdff   :  { %v6765_v60 = vpop.f32.mrb[94].mxu1 }
 0xe00   :  { %v4457_v24 = vpack.c.bf16 %v6765_v60, %v6764_v27  ;;  %v4442_v55 = vpop.f32.mrb[95].mxu1 }
 0xe01   :  { %v4456_v59 = vpack.c.bf16 %v4442_v55, %v4439_v21 }
 0xe03   :  { %6308 = vmatmul.mubr.msk.bf16.gmra.mrb[60].mxu0 %vm2270_vm0, %v4456_v59  ;;  %6778 = vmatprep.mubr.msk.bf16.mxu1 %vm2270_vm0, %v4456_v59 }
 0xe04   :  { %6779 = vmatmul.mubr.msk.bf16.gmra.mrb[56].mxu1 %vm2270_vm0, %v4457_v24  ;;  %4612 = vmatprep.mubr.bf16.mxu0 %v8792_v47 }
 0xe05   :  { %6786 = vmatprep.mubr.msk.bf16.mxu1 %vm2270_vm0, %v8007_v2 }
 0xe0b   :  { %6309 = vmatmul.mubr.msk.bf16.gmra.mrb[64].mxu0 %vm2270_vm0, %v4457_v24 }
 0xe0c   :  { %6787 = vmatmul.mubr.msk.bf16.vlgmr.msra.gmra.mrb[96].mxu1 %vm2270_vm0, %v8021_v16  ;;  %6794 = vmatprep.mubr.msk.bf16.mxu0 %vm2270_vm0, %v8033_v28 }
 0xe0d   :  { %6799 = vmatpush3.bf16.msra.mxu1 %v8099_v7 }
 0xe0e   :  { %6800 = vmatprep.subr.bf16.mxu1 %v8101_v34 }
 0xe11   :  { %6801 = vmatpush3.bf16.msra.mxu1 %v8101_v34 }
 0xe12   :  { %6806 = vmatprep.subr.bf16.mxu1 %v8103_v57 }
 0xe13   :  { %6795 = vmatmul.mubr.msk.bf16.vlgmr.msra.gmra.mrb[80].mxu0 %vm2270_vm0, %v8049_v40 }
 0xe14   :  { %5172 = vmatprep.mubr.bf16.mxu0 %v8792_v47 }
 0xedf   :  { %v6788_v19 = vpop.f32.mrb[96].mxu1 }
 0xee0   :  { %v4758_v31 = vpop.f32.mrb[97].mxu1  ;;  %v4836_v45 = vsel %vm8112_vm1, %v6788_v19, -1e+30 }
 0xee1   :  { %v4834_v37 = vsel %vm8117_vm2, %v4758_v31, -1e+30  ;;  %v6789_v36 = vpop.f32.mrb[98].mxu1  ;;  %v4848_v58 = vsel %vm2401_vm3, %v4836_v45, -inf }
 0xee2   :  { %v4761_v29 = vpop.f32.mrb[99].mxu1  ;;  %v4842_v22 = vsel %vm2401_vm3, %v4834_v37, -inf  ;;  %v4837_v50 = vsel %vm8121_vm4, %v6789_v36, -1e+30 }
 0xee3   :  { %v4835_v8 = vsel %vm8127_vm5, %v4761_v29, -1e+30  ;;  %4843 = vmax.xlane.f32.xlu0 %v4842_v22  ;;  %v4851_v42 = vsel %vm2401_vm3, %v4837_v50, -inf }
 0xee4   :  { %v4845_v49 = vsel %vm2401_vm3, %v4835_v8, -inf }
 0xee5   :  { %4846 = vmax.xlane.f32.xlu1 %v4845_v49 }
 0xee6   :  { %v6796_v1 = vpop.f32.mrb[80].mxu0 }
 0xee7   :  { %4849 = vmax.xlane.f32.xlu0 %v4848_v58  ;;  %v4819_v12 = vpop.f32.mrb[81].mxu0  ;;  %v4840_v39 = vsel %vm8112_vm1, %v6796_v1, -1e+30 }
 0xee8   :  { %v6797_v3 = vpop.f32.mrb[82].mxu0  ;;  %v4838_v20 = vsel %vm8117_vm2, %v4819_v12, -1e+30  ;;  %v4860_v14 = vsel %vm2401_vm3, %v4840_v39, -inf }
 0xee9   :  { %v4822_v63 = vpop.f32.mrb[83].mxu0  ;;  %v4841_v56 = vsel %vm8121_vm4, %v6797_v3, -1e+30  ;;  %v4854_v54 = vsel %vm2401_vm3, %v4838_v20, -inf }
 0xeea   :  { %v4839_v23 = vsel %vm8127_vm5, %v4822_v63, -1e+30  ;;  %v4863_v38 = vsel %vm2401_vm3, %v4841_v56, -inf }
 0xeeb   :  { %4852 = vmax.xlane.f32.xlu0 %v4851_v42  ;;  %v4857_v18 = vsel %vm2401_vm3, %v4839_v23, -inf }
 0xeec   :  { %4858 = vmax.xlane.f32.xlu1 %v4857_v18  ;;  %v7516_v18 = vld [vmem:[#allocation7 + $0x184] ss:$12 sps:$4 sm:$0xff]  }
 0xeed   :  { %5140 = vmatprep.subr.bf16.mxu0 %v7516_v18 }
 0xeef   :  { %4855 = vmax.xlane.f32.xlu0 %v4854_v54  ;;  %v7519_v54 = vld [vmem:[#allocation7 + $0x19c] ss:$12 sps:$4 sm:$0xff]  }
 0xef0   :  { %4864 = vmax.xlane.f32.xlu1 %v4863_v38  ;;  %v7522_v38 = vld [vmem:[#allocation7 + $0x1b4] ss:$12 sps:$4 sm:$0xff]  }
 0xef3   :  { %4861 = vmax.xlane.f32.xlu0 %v4860_v14  ;;  %v7520_v14 = vld [vmem:[#allocation7 + $0x1b0] ss:$12 sps:$4 sm:$0xff]  }
 0xf70   :  { %v4844_v0 = vpop.xlane.xlu0 %4843 }
 0xf71   :  { %v4866_v51 = vsub.f32 %v4834_v37, %v4844_v0  ;;  %v7525_v0 = vld [vmem:[#allocation7 + $0x1cc] ss:$12 sps:$4 sm:$0xff]  }
 0xf72   :  { %v4847_v52 = vpop.xlane.xlu1 %4846 }
 0xf73   :  { %v4874_v61 = vmul.f32 1.442695, %v4866_v51  ;;  %v4867_v46 = vsub.f32 %v4835_v8, %v4847_v52  ;;  %v7523_v51 = vld [vmem:[#allocation7 + $0x1c8] ss:$12 sps:$4 sm:$0xff]  }
 0xf74   :  { %v4850_v53 = vpop.xlane.xlu0 %4849 }
 0xf75   :  { %7674 = vpow2.f32 %v4874_v61  ;;  %v4876_v44 = vmul.f32 1.442695, %v4867_v46  ;;  %v4868_v48 = vsub.f32 %v4836_v45, %v4850_v53 }
 0xf77   :  { %7676 = vpow2.f32 %v4876_v44  ;;  %v4878_v6 = vmul.f32 1.442695, %v4868_v48 }
 0xf78   :  { %v4853_v15 = vpop.xlane.xlu0 %4852 }
 0xf79   :  { %7678 = vpow2.f32 %v4878_v6  ;;  %v4869_v32 = vsub.f32 %v4837_v50, %v4853_v15  ;;  %v4859_v30 = vpop.xlane.xlu1 %4858 }
 0xf7a   :  { %v4871_v62 = vsub.f32 %v4839_v23, %v4859_v30 }
 0xf7b   :  { %v4880_v5 = vmul.f32 1.442695, %v4869_v32 }
 0xf7c   :  { %v4884_v9 = vmul.f32 1.442695, %v4871_v62  ;;  %v4856_v13 = vpop.xlane.xlu0 %4855 }
 0xf7d   :  { %7680 = vpow2.f32 %v4880_v5  ;;  %v4870_v27 = vsub.f32 %v4838_v20, %v4856_v13  ;;  %v4865_v21 = vpop.xlane.xlu1 %4864 }
 0xf7e   :  { %v4873_v60 = vsub.f32 %v4841_v56, %v4865_v21  ;;  %7682 = vpow2.f32 %v4884_v9  ;;  %v7514_v56 = vld [vmem:[#allocation7 + $0x180] ss:$12 sps:$4 sm:$0xff]  }
 0xf7f   :  { %v8573_v24 = vpop.eup %7674  ;;  %v4882_v55 = vmul.f32 1.442695, %v4870_v27  ;;  %5141 = vmatpush1.bf16.msra.mxu0 %v7514_v56 }
 0xf80   :  { %v4888_v59 = vmul.f32 1.442695, %v4873_v60  ;;  %v4862_v19 = vpop.xlane.xlu0 %4861  ;;  %v4890_v31 = vsel %vm2401_vm3, %v8573_v24, 0.0  ;;  %5142 = vmatprep.subr.bf16.mxu0 %v7519_v54  ;;  %v7526_v60 = vld [vmem:[#allocation7 + $0x188] ss:$12 sps:$4 sm:$0xff]  }
 0xf81   :  { %v8577_v37 = vpop.eup %7676  ;;  %7684 = vpow2.f32 %v4882_v55  ;;  %v4872_v36 = vsub.f32 %v4840_v39, %v4862_v19  ;;  %4891 = vadd.xlane.f32.xlu0 %v4890_v31  ;;  %v7517_v39 = vld [vmem:[#allocation7 + $0x198] ss:$12 sps:$4 sm:$0xff]  }
 0xf82   :  { %v4893_v29 = vsel %vm2401_vm3, %v8577_v37, 0.0  ;;  %7686 = vpow2.f32 %v4888_v59 }
 0xf83   :  { %v8581_v22 = vpop.eup %7678  ;;  %v4886_v45 = vmul.f32 1.442695, %v4872_v36  ;;  %4894 = vadd.xlane.f32.xlu1 %v4893_v29  ;;  %5143 = vmatpush1.bf16.msra.mxu0 %v7517_v39  ;;  %v7527_v36 = vld [vmem:[#allocation7 + $0x1a0] ss:$12 sps:$4 sm:$0xff]   ;;  %v7528_v29 = vld [vmem:[#allocation7 + $0x1b8] ss:$12 sps:$4 sm:$0xff]  }
 0xf84   :  { %v4896_v8 = vsel %vm2401_vm3, %v8581_v22, 0.0  ;;  %5144 = vmatprep.subr.bf16.mxu0 %v7522_v38 }
 0xf85   :  { %7688 = vpow2.f32 %v4886_v45  ;;  %4897 = vadd.xlane.f32.xlu0 %v4896_v8 }
 0xf87   :  { %v8585_v49 = vpop.eup %7680  ;;  %5145 = vmatpush1.bf16.msra.mxu0 %v7520_v14 }
 0xf88   :  { %v4899_v1 = vsel %vm2401_vm3, %v8585_v49, 0.0  ;;  %v8589_v58 = vpop.eup %7682  ;;  %5146 = vmatprep.subr.bf16.mxu0 %v7525_v0 }
 0xf89   :  { %4900 = vadd.xlane.f32.xlu1 %v4899_v1  ;;  %v4905_v3 = vsel %vm2401_vm3, %v8589_v58, 0.0 }
 0xf8b   :  { %v8591_v50 = vpop.eup %7684  ;;  %5147 = vmatpush1.bf16.msra.mxu0 %v7523_v51 }
 0xf8c   :  { %v4902_v12 = vsel %vm2401_vm3, %v8591_v50, 0.0  ;;  %v8597_v63 = vpop.eup %7686 }
 0xf8d   :  { %4903 = vadd.xlane.f32.xlu0 %v4902_v12  ;;  %4906 = vadd.xlane.f32.xlu1 %v4905_v3  ;;  %v4911_v20 = vsel %vm2401_vm3, %v8597_v63, 0.0 }
 0xf8f   :  { %v8599_v23 = vpop.eup %7688 }
 0xf90   :  { %v4908_v42 = vsel %vm2401_vm3, %v8599_v23, 0.0 }
 0xf91   :  { %4909 = vadd.xlane.f32.xlu0 %v4908_v42  ;;  %4912 = vadd.xlane.f32.xlu1 %v4911_v20 }
 0xfa2   :  { %5312 = vrot.lane.b32.xlu1 %v8074_v10, %s7848_s2 }
 0xfa6   :  { %5304 = vrot.lane.b32.xlu1 %v8007_v2, %s7848_s2 }
 0xfa7   :  { %5310 = vrot.lane.b32.xlu0 %v8064_v43, %s7848_s2 }
 0xfaa   :  { %5306 = vrot.lane.b32.xlu1 %v8021_v16, %s7848_s2 }
 0xfab   :  { %5383 = vrot.lane.b32.xlu0 %v8084_v25, %s7848_s2 }
 0xfae   :  { %5385 = vrot.lane.b32.xlu1 %v8093_v41, %s7848_s2 }
 0xfaf   :  { %5377 = vrot.lane.b32.xlu0 %v8033_v28, %s7848_s2 }
 0xfb2   :  { %5379 = vrot.lane.b32.xlu1 %v8049_v40, %s7848_s2 }
0x100e   :  { %v4892_v2 = vpop.xlane.xlu0 %4891 }
0x100f   :  { %7690 = vrcp.f32 %v4892_v2 }
0x1010   :  { %v4895_v10 = vpop.xlane.xlu1 %4894 }
0x1011   :  { %7692 = vrcp.f32 %v4895_v10 }
0x1012   :  { %v4898_v43 = vpop.xlane.xlu0 %4897 }
0x1013   :  { %7694 = vrcp.f32 %v4898_v43 }
0x1016   :  { %v4901_v52 = vpop.xlane.xlu1 %4900 }
0x1017   :  { %7696 = vrcp.f32 %v4901_v52 }
0x1019   :  { %v7691_v16 = vpop.eup %7690 }
0x101a   :  { %v4904_v61 = vpop.xlane.xlu0 %4903  ;;  %v4907_v25 = vpop.xlane.xlu1 %4906  ;;  %v4922_v41 = vmul.f32 %v7691_v16, %v8573_v24 }
0x101b   :  { %v7693_v46 = vpop.eup %7692  ;;  %7698 = vrcp.f32 %v4904_v61 }
0x101c   :  { %7700 = vrcp.f32 %v4907_v25  ;;  %v4923_v28 = vmul.f32 %v7693_v46, %v8577_v37 }
0x101d   :  { %v7695_v48 = vpop.eup %7694 }
0x101e   :  { %v4910_v53 = vpop.xlane.xlu0 %4909  ;;  %v4913_v40 = vpop.xlane.xlu1 %4912  ;;  %v4930_v44 = vpack.c.bf16 %v4923_v28, %v4922_v41  ;;  %v4924_v15 = vmul.f32 %v7695_v48, %v8581_v22  ;;  %v7529_v22 = vld [vmem:[#allocation7 + $0x1d0] ss:$12 sps:$4 sm:$0xff]  }
0x101f   :  { %7702 = vrcp.f32 %v4910_v53 }
0x1020   :  { %7704 = vrcp.f32 %v4913_v40  ;;  %6802 = vmatprep.mubr.msk.bf16.mxu1 %vm2401_vm3, %v4930_v44 }
0x1021   :  { %v7697_v6 = vpop.eup %7696 }
0x1022   :  { %v4925_v32 = vmul.f32 %v7697_v6, %v8585_v49  ;;  %v5311_v30 = vpop.permute.xlu0 %5310  ;;  %v5313_v45 = vpop.permute.xlu1 %5312 }
0x1023   :  { %v5321_v42 = vsel %vm2270_vm0, %v5311_v30, 0  ;;  %v5324_v51 = vsel %vm2270_vm0, %v5313_v45, 0 }
0x1024   :  { %v4931_v62 = vpack.c.bf16 %v4925_v32, %v4924_v15 }
0x1025   :  { %v7699_v5 = vpop.eup %7698 }
0x1026   :  { %v7701_v9 = vpop.eup %7700  ;;  %v5384_v13 = vpop.permute.xlu0 %5383  ;;  %6803 = vmatmul.mubr.msk.bf16.vlgmr.msra.gmra.mrb[100].mxu1 %vm2401_vm3, %v4931_v62  ;;  %v4926_v27 = vmul.f32 %v7699_v5, %v8591_v50 }
0x1027   :  { %6807 = vmatpush3.bf16.msra.mxu1 %v8103_v57  ;;  %7108 = vmatprep.subr.msk.bf16.mxu0 %vm2270_vm0, %v5384_v13  ;;  %v4927_v21 = vmul.f32 %v7701_v9, %v8589_v58  ;;  %v5305_v8 = vpop.permute.xlu1 %5304 }
0x1028   :  { %6808 = vmatprep.subr.bf16.mxu1 %v8105_v4 }
0x1029   :  { %v7703_v24 = vpop.eup %7702  ;;  %v4932_v55 = vpack.c.bf16 %v4927_v21, %v4926_v27 }
0x102a   :  { %v7705_v59 = vpop.eup %7704  ;;  %v4928_v19 = vmul.f32 %v7703_v24, %v8599_v23  ;;  %v5394_v23 = vsel %vm2270_vm0, %v5384_v13, 0  ;;  %v5378_v2 = vpop.permute.xlu0 %5377 }
0x102b   :  { %v4929_v31 = vmul.f32 %v7705_v59, %v8597_v63  ;;  %6809 = vmatpush3.bf16.msra.mxu1 %v8105_v4  ;;  %6810 = vmatprep.mubr.msk.bf16.mxu1 %vm2401_vm3, %v4932_v55  ;;  %v5307_v1 = vpop.permute.xlu1 %5306 }
0x102c   :  { %6814 = vmatprep.subr.bf16.mxu1 %v7526_v60 }
0x102d   :  { %v4933_v37 = vpack.c.bf16 %v4929_v31, %v4928_v19 }
0x102f   :  { %6811 = vmatmul.mubr.msk.bf16.vlgmr.msra.gmra.mrb[104].mxu1 %vm2401_vm3, %v4933_v37  ;;  %v5386_v20 = vpop.permute.xlu1 %5385 }
0x1030   :  { %6815 = vmatpush3.bf16.msra.mxu1 %v7526_v60  ;;  %v5397_v0 = vsel %vm2270_vm0, %v5386_v20, 0 }
0x1031   :  { %6816 = vmatprep.subr.bf16.mxu1 %v7527_v36 }
0x1033   :  { %v5380_v10 = vpop.permute.xlu1 %5379 }
0x1034   :  { %6817 = vmatpush3.bf16.msra.mxu1 %v7527_v36 }
0x1035   :  { %6818 = vmatprep.subr.bf16.mxu1 %v7528_v29 }
0x1038   :  { %6819 = vmatpush3.bf16.msra.mxu1 %v7528_v29 }
0x1039   :  { %6820 = vmatprep.subr.bf16.mxu1 %v7529_v22 }
0x103c   :  { %6821 = vmatpush3.bf16.msra.mxu1 %v7529_v22 }
0x103d   :  { %7106 = vmatprep.subr.msk.bf16.mxu1 %vm2270_vm0, %v5311_v30 }
0x10f9   :  { %v6804_v49 = vpop.f32.mrb[100].mxu1 }
0x10fa   :  { %v4974_v58 = vpop.f32.mrb[101].mxu1 }
0x10fb   :  { %v6805_v50 = vpop.f32.mrb[102].mxu1 }
0x10fc   :  { %v5045_v12 = vpack.c.bf16 %v6805_v50, %v6804_v49  ;;  %v4977_v3 = vpop.f32.mrb[103].mxu1 }
0x10fd   :  { %v5044_v63 = vpack.c.bf16 %v4977_v3, %v4974_v58 }
0x10ff   :  { %6334 = vmatmul.mubr.msk.bf16.vlgmr.msra.gmra.mrb[52].mxu0 %vm2270_vm0, %v5044_v63  ;;  %6822 = vmatprep.mubr.msk.bf16.mxu1 %vm2270_vm0, %v5044_v63 }
0x1100   :  { %6839 = vmatpush3.bf16.xpose.msra.mxu0 %v5394_v23  ;;  %6823 = vmatmul.mubr.msk.bf16.vlgmr.msra.gmra.mrb[52].mxu1 %vm2270_vm0, %v5045_v12 }
0x1101   :  { %6831 = vmatpush3.bf16.xpose.msra.mxu1 %v5321_v42  ;;  %7109 = vmatprep.subr.msk.bf16.mxu0 %vm2270_vm0, %v5386_v20 }
0x1102   :  { %v6812_v18 = vpop.f32.mrb[104].mxu1  ;;  %7107 = vmatprep.subr.msk.bf16.mxu1 %vm2270_vm0, %v5313_v45  ;;  %5182 = vmatprep.mubr.bf16.mxu0 %v8792_v47 }
0x1103   :  { %v5029_v56 = vpop.f32.mrb[105].mxu1 }
0x1104   :  { %v6813_v54 = vpop.f32.mrb[106].mxu1 }
0x1105   :  { %v5047_v39 = vpack.c.bf16 %v6813_v54, %v6812_v18  ;;  %v5032_v38 = vpop.f32.mrb[107].mxu1 }
0x1106   :  { %v5046_v14 = vpack.c.bf16 %v5032_v38, %v5029_v56 }
0x1107   :  { %6335 = vmatmul.mubr.msk.bf16.gmra.mrb[56].mxu0 %vm2270_vm0, %v5045_v12 }
0x1108   :  { %6826 = vmatprep.mubr.msk.bf16.mxu1 %vm2270_vm0, %v5046_v14  ;;  %6841 = vmatpush3.bf16.xpose.msra.mxu0 %v5397_v0 }
0x1109   :  { %6827 = vmatmul.mubr.msk.bf16.gmra.mrb[56].mxu1 %vm2270_vm0, %v5047_v39  ;;  %5192 = vmatprep.mubr.bf16.mxu0 %v8792_v47 }
0x110a   :  { %6833 = vmatpush3.bf16.xpose.msra.mxu1 %v5324_v51  ;;  %6834 = vmatprep.mubr.msk.bf16.mxu1 %vm2270_vm0, %v5305_v8 }
0x110f   :  { %6336 = vmatmul.mubr.msk.bf16.gmra.mrb[60].mxu0 %vm2270_vm0, %v5046_v14 }
0x1110   :  { %5202 = vmatprep.mubr.bf16.mxu0 %v8792_v47 }
0x1111   :  { %6835 = vmatmul.mubr.msk.bf16.vlgmr.msra.gmra.mrb[108].mxu1 %vm2270_vm0, %v5307_v1 }
0x1117   :  { %6337 = vmatmul.mubr.msk.bf16.gmra.mrb[64].mxu0 %vm2270_vm0, %v5047_v39 }
0x1118   :  { %6842 = vmatprep.mubr.msk.bf16.mxu0 %vm2270_vm0, %v5378_v2 }
0x111f   :  { %6843 = vmatmul.mubr.msk.bf16.vlgmr.msra.gmra.mrb[84].mxu0 %vm2270_vm0, %v5380_v10 }
0x1120   :  { %5802 = vmatprep.mubr.bf16.mxu0 %v8792_v47 }
0x11e4   :  { %v6836_v43 = vpop.f32.mrb[108].mxu1 }
0x11e5   :  { %v5360_v52 = vpop.f32.mrb[109].mxu1  ;;  %v5450_v41 = vsel %vm8112_vm1, %v6836_v43, -1e+30 }
0x11e6   :  { %v5448_v16 = vsel %vm8117_vm2, %v5360_v52, -1e+30  ;;  %v6837_v61 = vpop.f32.mrb[110].mxu1  ;;  %v5462_v40 = vsel %vm2401_vm3, %v5450_v41, -inf }
0x11e7   :  { %v5456_v25 = vsel %vm2401_vm3, %v5448_v16, -inf  ;;  %v5363_v46 = vpop.f32.mrb[111].mxu1  ;;  %v5451_v44 = vsel %vm8121_vm4, %v6837_v61, -1e+30 }
0x11e8   :  { %v5449_v28 = vsel %vm8127_vm5, %v5363_v46, -1e+30  ;;  %5457 = vmax.xlane.f32.xlu0 %v5456_v25  ;;  %v5465_v48 = vsel %vm2401_vm3, %v5451_v44, -inf  ;;  %v7532_v25 = vld [vmem:[#allocation7 + $0x1e4] ss:$12 sps:$4 sm:$0xff]  }
0x11e9   :  { %v5459_v53 = vsel %vm2401_vm3, %v5449_v28, -inf  ;;  %v7536_v46 = vld [vmem:[#allocation7 + $0x1fc] ss:$12 sps:$4 sm:$0xff]   ;;  %5770 = vmatprep.subr.bf16.mxu0 %v7532_v25 }
0x11ea   :  { %5460 = vmax.xlane.f32.xlu1 %v5459_v53  ;;  %v7538_v53 = vld [vmem:[#allocation7 + $0x210] ss:$12 sps:$4 sm:$0xff]  }
0x11ec   :  { %5463 = vmax.xlane.f32.xlu0 %v5462_v40 }
0x11f0   :  { %5466 = vmax.xlane.f32.xlu0 %v5465_v48 }
0x11f2   :  { %v6844_v6 = vpop.f32.mrb[84].mxu0 }
0x11f3   :  { %v5433_v15 = vpop.f32.mrb[85].mxu0  ;;  %v5454_v9 = vsel %vm8112_vm1, %v6844_v6, -1e+30 }
0x11f4   :  { %v5452_v32 = vsel %vm8117_vm2, %v5433_v15, -1e+30  ;;  %v6845_v30 = vpop.f32.mrb[86].mxu0  ;;  %v5474_v11 = vsel %vm2401_vm3, %v5454_v9, -inf }
0x11f5   :  { %v5468_v62 = vsel %vm2401_vm3, %v5452_v32, -inf  ;;  %v5436_v5 = vpop.f32.mrb[87].mxu0  ;;  %v5455_v21 = vsel %vm8121_vm4, %v6845_v30, -1e+30 }
0x11f6   :  { %v5453_v13 = vsel %vm8127_vm5, %v5436_v5, -1e+30  ;;  %5469 = vmax.xlane.f32.xlu0 %v5468_v62  ;;  %v5477_v60 = vsel %vm2401_vm3, %v5455_v21, -inf }
0x11f7   :  { %v5471_v27 = vsel %vm2401_vm3, %v5453_v13, -inf }
0x11f8   :  { %5472 = vmax.xlane.f32.xlu1 %v5471_v27 }
0x11fa   :  { %5475 = vmax.xlane.f32.xlu0 %v5474_v11 }
0x11fc   :  { %5478 = vmax.xlane.f32.xlu1 %v5477_v60 }
0x1275   :  { %v5458_v24 = vpop.xlane.xlu0 %5457 }
0x1276   :  { %v5480_v55 = vsub.f32 %v5448_v16, %v5458_v24 }
0x1277   :  { %v5461_v26 = vpop.xlane.xlu1 %5460 }
0x1278   :  { %v5488_v35 = vmul.f32 1.442695, %v5480_v55  ;;  %v5481_v31 = vsub.f32 %v5449_v28, %v5461_v26  ;;  %v7540_v28 = vld [vmem:[#allocation7 + $0x214] ss:$12 sps:$4 sm:$0xff]  }
0x1279   :  { %v5464_v59 = vpop.xlane.xlu0 %5463 }
0x127a   :  { %v5482_v19 = vsub.f32 %v5450_v41, %v5464_v59  ;;  %v5490_v33 = vmul.f32 1.442695, %v5481_v31  ;;  %v7534_v41 = vld [vmem:[#allocation7 + $0x1f8] ss:$12 sps:$4 sm:$0xff]  }
0x127c   :  { %v5492_v37 = vmul.f32 1.442695, %v5482_v19 }
0x127d   :  { %v5467_v36 = vpop.xlane.xlu0 %5466 }
0x127e   :  { %7706 = vpow2.f32 %v5492_v37  ;;  %v5483_v29 = vsub.f32 %v5451_v44, %v5467_v36 }
0x127f   :  { %7708 = vpow2.f32 %v5488_v35  ;;  %v7533_v35 = vld [vmem:[#allocation7 + $0x1e8] ss:$12 sps:$4 sm:$0xff]  }
0x1280   :  { %v5494_v22 = vmul.f32 1.442695, %v5483_v29 }
0x1282   :  { %7710 = vpow2.f32 %v5494_v22 }
0x1283   :  { %v5470_v45 = vpop.xlane.xlu0 %5469  ;;  %7712 = vpow2.f32 %v5490_v33 }
0x1284   :  { %v5484_v8 = vsub.f32 %v5452_v32, %v5470_v45 }
0x1285   :  { %v5473_v0 = vpop.xlane.xlu1 %5472 }
0x1286   :  { %v5496_v3 = vmul.f32 1.442695, %v5484_v8  ;;  %v5485_v10 = vsub.f32 %v5453_v13, %v5473_v0 }
0x1287   :  { %v5476_v49 = vpop.xlane.xlu0 %5475 }
0x1288   :  { %v8684_v1 = vpop.eup %7706  ;;  %v5486_v58 = vsub.f32 %v5454_v9, %v5476_v49  ;;  %v5498_v52 = vmul.f32 1.442695, %v5485_v10 }
0x1289   :  { %v5510_v50 = vsel %vm2401_vm3, %v8684_v1, 0.0  ;;  %v7709_v12 = vpop.eup %7708  ;;  %v5479_v51 = vpop.xlane.xlu1 %5478 }
0x128a   :  { %v5500_v63 = vmul.f32 1.442695, %v5486_v58  ;;  %5511 = vadd.xlane.f32.xlu0 %v5510_v50  ;;  %v5504_v42 = vsel %vm2401_vm3, %v7709_v12, 0.0  ;;  %v5487_v2 = vsub.f32 %v5455_v21, %v5479_v51  ;;  %v7537_v50 = vld [vmem:[#allocation7 + $0x200] ss:$12 sps:$4 sm:$0xff]  }
0x128c   :  { %v8688_v23 = vpop.eup %7710  ;;  %7714 = vpow2.f32 %v5500_v63  ;;  %v5502_v43 = vmul.f32 1.442695, %v5487_v2  ;;  %v7542_v63 = vld [vmem:[#allocation7 + $0x228] ss:$12 sps:$4 sm:$0xff]  }
0x128d   :  { %v5513_v20 = vsel %vm2401_vm3, %v8688_v23, 0.0  ;;  %v7713_v18 = vpop.eup %7712  ;;  %7716 = vpow2.f32 %v5496_v3  ;;  %v7544_v3 = vld [vmem:[#allocation7 + $0x22c] ss:$12 sps:$4 sm:$0xff]  }
0x128e   :  { %5505 = vadd.xlane.f32.xlu0 %v5504_v42  ;;  %5514 = vadd.xlane.f32.xlu1 %v5513_v20  ;;  %v5507_v56 = vsel %vm2401_vm3, %v7713_v18, 0.0  ;;  %7718 = vpow2.f32 %v5502_v43  ;;  %v2257_v43 = vsub.s32 0, %v8107_v17 }
0x128f   :  { %7720 = vpow2.f32 %v5498_v52  ;;  %v2253_v52 = vld [vmem:[%s8780_s3] sm:$0x7]  ;;  %s7849_s3 = smov [#allocation8]  }
0x1290   :  { %s5961_s29 = sshll.u32 %s7849_s3, 4  ;;  %s5962_s29 = int_to_ptr.vmem [resolvable:$true] %s5961_s29 }
0x1291   :  { %s7812_s30 = scalar_lea.vmem %s5962_s29, 3072  ;;  %p7817_p11 = scmp.lt.s32.totalorder %s5962_s29, %s5962_s29 }
0x1292   :  { %5508 = vadd.xlane.f32.xlu1 %v5507_v56  ;;  %p7813_p10 = scmp.ne.s32.totalorder %s5962_s29, %s7812_s30  ;;  %p7818_p12 = scmp.lt.s32.totalorder %s7812_s30, %s7812_s30 }
0x1294   :  { %p7819_p13 = por %p7818_p12, %p7817_p11 }
0x1296   :  { %v8694_v54 = vpop.eup %7714  ;;  %p7820_p0 = pnand %p7819_p13, %p7813_p10 }
0x1297   :  { %v5522_v39 = vsel %vm2401_vm3, %v8694_v54, 0.0  ;;  %v8698_v38 = vpop.eup %7716 }
0x1298   :  { %5523 = vadd.xlane.f32.xlu0 %v5522_v39  ;;  %v5516_v14 = vsel %vm2401_vm3, %v8698_v38, 0.0  ;;  %v8708_v16 = vpop.eup %7718 }
0x1299   :  { %v5525_v61 = vsel %vm2401_vm3, %v8708_v16, 0.0 }
0x129c   :  { %5517 = vadd.xlane.f32.xlu0 %v5516_v14 }
0x12a3   :  { %5552 = vrot.lane.b32.xlu1 %v8101_v34, %s7848_s2  ;;  %v8712_v34 = vpop.eup %7720 }
0x12a7   :  { %5613 = vrot.lane.b32.xlu1 %v8103_v57, %s7848_s2  ;;  %v5519_v57 = vsel %vm2401_vm3, %v8712_v34, 0.0 }
0x12b2   :  { %5550 = vrot.lane.b32.xlu0 %v8099_v7, %s7848_s2  ;;  %v7530_v7 = vld [vmem:[#allocation7 + $0x1e0] ss:$12 sps:$4 sm:$0xff]  }
0x12b3   :  { %5771 = vmatpush1.bf16.msra.mxu0 %v7530_v7 }
0x12b4   :  { %5772 = vmatprep.subr.bf16.mxu0 %v7536_v46 }
0x12b7   :  { %5773 = vmatpush1.bf16.msra.mxu0 %v7534_v41 }
0x12b8   :  { %5774 = vmatprep.subr.bf16.mxu0 %v7540_v28 }
0x12bb   :  { %5775 = vmatpush1.bf16.msra.mxu0 %v7538_v53 }
0x12bc   :  { %5776 = vmatprep.subr.bf16.mxu0 %v7544_v3 }
0x12bf   :  { %5777 = vmatpush1.bf16.msra.mxu0 %v7542_v63 }
0x12cb   :  { %5526 = vadd.xlane.f32.xlu1 %v5525_v61  ;;  %v2265_v61 = vsub.s32 2, %v8107_v17 }
0x12cd   :  { %v2266_v7 = vrot.slane %v2253_v52, %v2265_v61 }
0x12cf   :  { %5520 = vadd.xlane.f32.xlu1 %v5519_v57 }
0x12e0   :  { %5615 = vrot.lane.b32.xlu1 %v8105_v4, %s7848_s2 }
0x1317   :  { %v5512_v40 = vpop.xlane.xlu0 %5511 }
0x131b   :  { %v5506_v44 = vpop.xlane.xlu0 %5505  ;;  %v5515_v48 = vpop.xlane.xlu1 %5514 }
0x131c   :  { %7722 = vrcp.f32 %v5506_v44 }
0x131f   :  { %v5509_v6 = vpop.xlane.xlu1 %5508 }
0x1320   :  { %7724 = vrcp.f32 %v5509_v6 }
0x1321   :  { %7726 = vrcp.f32 %v5515_v48 }
0x1322   :  { %7728 = vrcp.f32 %v5512_v40 }
0x1323   :  { %v5553_v13 = vpop.permute.xlu1 %5552 }
0x1325   :  { %v5524_v4 = vpop.xlane.xlu0 %5523 }
0x1326   :  { %v7723_v15 = vpop.eup %7722 }
0x1327   :  { %v5536_v62 = vmul.f32 %v7723_v15, %v7709_v12  ;;  %v5614_v55 = vpop.permute.xlu1 %5613  ;;  %v7541_v12 = vld [vmem:[#allocation7 + $0x218] ss:$12 sps:$4 sm:$0xff]  }
0x1329   :  { %v5518_v32 = vpop.xlane.xlu0 %5517 }
0x132a   :  { %v7725_v30 = vpop.eup %7724 }
0x132b   :  { %v5537_v5 = vmul.f32 %v7725_v30, %v7713_v18  ;;  %v7727_v9 = vpop.eup %7726 }
0x132c   :  { %v7729_v11 = vpop.eup %7728  ;;  %v5539_v60 = vmul.f32 %v7727_v9, %v8688_v23  ;;  %v7545_v23 = vld [vmem:[#allocation7 + $0x230] ss:$12 sps:$4 sm:$0xff]  }
0x132d   :  { %v5551_v27 = vpop.permute.xlu0 %5550  ;;  %v5544_v21 = vpack.c.bf16 %v5537_v5, %v5536_v62  ;;  %v5538_v24 = vmul.f32 %v7729_v11, %v8684_v1 }
0x132e   :  { %6846 = vmatprep.subr.bf16.mxu1 %v5551_v27 }
0x132f   :  { %6850 = vmatprep.mubr.msk.bf16.mxu1 %vm2401_vm3, %v5544_v21  ;;  %6847 = vmatpush3.bf16.msra.mxu1 %v5551_v27  ;;  %v5545_v26 = vpack.c.bf16 %v5539_v60, %v5538_v24 }
0x1330   :  { %6848 = vmatprep.subr.bf16.mxu1 %v5553_v13 }
0x1333   :  { %6849 = vmatpush3.bf16.msra.mxu1 %v5553_v13 }
0x1334   :  { %6854 = vmatprep.subr.bf16.mxu1 %v5614_v55 }
0x1336   :  { %6851 = vmatmul.mubr.msk.bf16.vlgmr.msra.gmra.mrb[112].mxu1 %vm2401_vm3, %v5545_v26 }
0x1337   :  { %6855 = vmatpush3.bf16.msra.mxu1 %v5614_v55 }
0x1358   :  { %v5527_v59 = vpop.xlane.xlu1 %5526 }
0x1359   :  { %7730 = vrcp.f32 %v5527_v59 }
0x135a   :  { %7732 = vrcp.f32 %v5518_v32 }
0x135b   :  { %7734 = vrcp.f32 %v5524_v4 }
0x135c   :  { %v5521_v19 = vpop.xlane.xlu1 %5520 }
0x135d   :  { %7736 = vrcp.f32 %v5521_v19 }
0x1360   :  { %v5616_v31 = vpop.permute.xlu1 %5615 }
0x1361   :  { %6856 = vmatprep.subr.bf16.mxu1 %v5616_v31 }
0x1362   :  { %6857 = vmatpush3.bf16.msra.mxu1 %v5616_v31 }
0x1363   :  { %6862 = vmatprep.subr.bf16.mxu1 %v7533_v35  ;;  %v7731_v37 = vpop.eup %7730 }
0x1364   :  { %v7733_v36 = vpop.eup %7732  ;;  %v5543_v22 = vmul.f32 %v7731_v37, %v8708_v16  ;;  %v2261_v16 = vsub.s32 1, %v8107_v17 }
0x1365   :  { %v7735_v29 = vpop.eup %7734  ;;  %v5540_v45 = vmul.f32 %v7733_v36, %v8698_v38 }
0x1366   :  { %v5542_v49 = vmul.f32 %v7735_v29, %v8694_v54  ;;  %v8747_v57 = vrot.slane %v2253_v52, %v2261_v16 }
0x1367   :  { %v7737_v33 = vpop.eup %7736 }
0x1368   :  { %v5541_v8 = vmul.f32 %v7737_v33, %v8712_v34  ;;  %v5547_v58 = vpack.c.bf16 %v5543_v22, %v5542_v49  ;;  %v8745_v34 = vrot.slane %v2253_v52, %v2257_v43 }
0x136a   :  { %v5546_v1 = vpack.c.bf16 %v5541_v8, %v5540_v45 }
0x136c   :  { %6858 = vmatprep.mubr.msk.bf16.mxu1 %vm2401_vm3, %v5546_v1 }
0x136d   :  { %6859 = vmatmul.mubr.msk.bf16.vlgmr.msra.gmra.mrb[116].mxu1 %vm2401_vm3, %v5547_v58 }
0x136e   :  { %6863 = vmatpush3.bf16.msra.mxu1 %v7533_v35 }
0x136f   :  { %6864 = vmatprep.subr.bf16.mxu1 %v7537_v50 }
0x1372   :  { %6865 = vmatpush3.bf16.msra.mxu1 %v7537_v50 }
0x1373   :  { %6866 = vmatprep.subr.bf16.mxu1 %v7541_v12 }
0x1376   :  { %6867 = vmatpush3.bf16.msra.mxu1 %v7541_v12 }
0x1377   :  { %6868 = vmatprep.subr.bf16.mxu1 %v7545_v23 }
0x137a   :  { %6869 = vmatpush3.bf16.msra.mxu1 %v7545_v23 }
0x1409   :  { %v6852_v42 = vpop.f32.mrb[112].mxu1 }
0x140a   :  { %v5596_v20 = vpop.f32.mrb[113].mxu1 }
0x140b   :  { %v6853_v18 = vpop.f32.mrb[114].mxu1 }
0x140c   :  { %v5675_v56 = vpack.c.bf16 %v6853_v18, %v6852_v42  ;;  %v5599_v54 = vpop.f32.mrb[115].mxu1 }
0x140d   :  { %v5674_v39 = vpack.c.bf16 %v5599_v54, %v5596_v20 }
0x140f   :  { %6362 = vmatmul.mubr.msk.bf16.vlgmr.msra.gmra.mrb[52].mxu0 %vm2270_vm0, %v5674_v39  ;;  %6870 = vmatprep.mubr.msk.bf16.mxu1 %vm2270_vm0, %v5674_v39 }
0x1410   :  { %6871 = vmatmul.mubr.msk.bf16.vlgmr.msra.gmra.mrb[52].mxu1 %vm2270_vm0, %v5675_v56  ;;  %5812 = vmatprep.mubr.bf16.mxu0 %v8792_v47 }
0x1417   :  { %6363 = vmatmul.mubr.msk.bf16.gmra.mrb[56].mxu0 %vm2270_vm0, %v5675_v56 }
0x1418   :  { %5822 = vmatprep.mubr.bf16.mxu0 %v8792_v47 }
0x1440   :  { %v6860_v38 = vpop.f32.mrb[116].mxu1 }
0x1441   :  { %v5659_v14 = vpop.f32.mrb[117].mxu1 }
0x1442   :  { %v6861_v0 = vpop.f32.mrb[118].mxu1 }
0x1443   :  { %v5677_v51 = vpack.c.bf16 %v6861_v0, %v6860_v38  ;;  %v5662_v2 = vpop.f32.mrb[119].mxu1 }
0x1444   :  { %v5676_v10 = vpack.c.bf16 %v5662_v2, %v5659_v14 }
0x1446   :  { %6364 = vmatmul.mubr.msk.bf16.gmra.mrb[60].mxu0 %vm2270_vm0, %v5676_v10  ;;  %6874 = vmatprep.mubr.msk.bf16.mxu1 %vm2270_vm0, %v5676_v10 }
0x1447   :  { %6875 = vmatmul.mubr.msk.bf16.gmra.mrb[56].mxu1 %vm2270_vm0, %v5677_v51  ;;  %5832 = vmatprep.mubr.bf16.mxu0 %v8792_v47 }
0x144e   :  { %6365 = vmatmul.mubr.msk.bf16.gmra.mrb[64].mxu0 %vm2270_vm0, %v5677_v51 }
0x14e2   :  { %v5804_v25 = vpop.f32.mrb[52].mxu0 }
0x14e3   :  { %v6878_v47 = vadd.f32 %v5804_v25, %v8745_v34  ;;  %v5806_v46 = vpop.f32.mrb[53].mxu0  ;;  %v6872_v41 = vpop.f32.mrb[52].mxu1 }
0x14e4   :  { %v6879_v28 = vadd.f32 %v5806_v46, %v8747_v57  ;;  %v6894_v53 = vadd.f32 %v6872_v41, %v2266_v7  ;;  %v5808_v40 = vpop.f32.mrb[54].mxu0  ;;  %v5877_v44 = vpop.f32.mrb[53].mxu1 }
0x14e5   :  { %5932 = vst [vmem:[#allocation8] sm:$0xff] %v6878_v47  ;;  %v6880_v48 = vadd.f32 %v5808_v40, %v8745_v34  ;;  %v6895_v6 = vadd.f32 %v5877_v44, %v2266_v7  ;;  %v5810_v17 = vpop.f32.mrb[55].mxu0  ;;  %v6873_v4 = vpop.f32.mrb[54].mxu1 }
0x14e6   :  { %5933 = vst [vmem:[#allocation8 + $0x8] sm:$0xff] %v6879_v28  ;;  %5940 = vst [vmem:[#allocation8 + $0x40] sm:$0xff] %v6894_v53  ;;  %v6881_v15 = vadd.f32 %v5810_v17, %v8747_v57  ;;  %v6896_v32 = vadd.f32 %v6873_v4, %v2266_v7  ;;  %v5880_v30 = vpop.f32.mrb[55].mxu1 }
0x14e7   :  { %5935 = vst [vmem:[#allocation8 + $0x18] sm:$0xff] %v6880_v48  ;;  %5934 = vst [vmem:[#allocation8 + $0x10] sm:$0xff] %v6895_v6  ;;  %v6897_v62 = vadd.f32 %v5880_v30, %v2266_v7 }
0x14e8   :  { %5936 = vst [vmem:[#allocation8 + $0x20] sm:$0xff] %v6881_v15  ;;  %5943 = vst [vmem:[#allocation8 + $0x58] sm:$0xff] %v6896_v32 }
0x14e9   :  { %5937 = vst [vmem:[#allocation8 + $0x28] sm:$0xff] %v6897_v62 }
0x14ea   :  { %v5814_v5 = vpop.f32.mrb[56].mxu0 }
0x14eb   :  { %v6882_v9 = vadd.f32 %v5814_v5, %v8745_v34  ;;  %v5816_v13 = vpop.f32.mrb[57].mxu0 }
0x14ec   :  { %v6883_v27 = vadd.f32 %v5816_v13, %v8747_v57  ;;  %v5818_v21 = vpop.f32.mrb[58].mxu0 }
0x14ed   :  { %5938 = vst [vmem:[#allocation8 + $0x30] sm:$0xff] %v6882_v9  ;;  %v6884_v11 = vadd.f32 %v5818_v21, %v8745_v34  ;;  %v5820_v60 = vpop.f32.mrb[59].mxu0 }
0x14ee   :  { %5939 = vst [vmem:[#allocation8 + $0x38] sm:$0xff] %v6883_v27  ;;  %v6885_v24 = vadd.f32 %v5820_v60, %v8747_v57 }
0x14ef   :  { %5941 = vst [vmem:[#allocation8 + $0x48] sm:$0xff] %v6884_v11 }
0x14f0   :  { %5942 = vst [vmem:[#allocation8 + $0x50] sm:$0xff] %v6885_v24 }
0x1519   :  { %v5824_v55 = vpop.f32.mrb[60].mxu0 }
0x151a   :  { %v6886_v26 = vadd.f32 %v5824_v55, %v8745_v34  ;;  %v5826_v59 = vpop.f32.mrb[61].mxu0  ;;  %v6876_v19 = vpop.f32.mrb[56].mxu1 }
0x151b   :  { %v6887_v35 = vadd.f32 %v5826_v59, %v8747_v57  ;;  %v6898_v31 = vadd.f32 %v6876_v19, %v2266_v7  ;;  %v5828_v37 = vpop.f32.mrb[62].mxu0  ;;  %v5893_v36 = vpop.f32.mrb[57].mxu1 }
0x151c   :  { %5944 = vst [vmem:[#allocation8 + $0x60] sm:$0xff] %v6886_v26  ;;  %v6888_v29 = vadd.f32 %v5828_v37, %v8745_v34  ;;  %v6899_v33 = vadd.f32 %v5893_v36, %v2266_v7  ;;  %v5830_v22 = vpop.f32.mrb[63].mxu0  ;;  %v6877_v45 = vpop.f32.mrb[58].mxu1 }
0x151d   :  { %5945 = vst [vmem:[#allocation8 + $0x68] sm:$0xff] %v6887_v35  ;;  %5952 = vst [vmem:[#allocation8 + $0xa0] sm:$0xff] %v6898_v31  ;;  %v6889_v8 = vadd.f32 %v5830_v22, %v8747_v57  ;;  %v6900_v49 = vadd.f32 %v6877_v45, %v2266_v7  ;;  %v5896_v1 = vpop.f32.mrb[59].mxu1 }
0x151e   :  { %5947 = vst [vmem:[#allocation8 + $0x78] sm:$0xff] %v6888_v29  ;;  %5946 = vst [vmem:[#allocation8 + $0x70] sm:$0xff] %v6899_v33  ;;  %v6901_v58 = vadd.f32 %v5896_v1, %v2266_v7 }
0x151f   :  { %5948 = vst [vmem:[#allocation8 + $0x80] sm:$0xff] %v6889_v8  ;;  %5955 = vst [vmem:[#allocation8 + $0xb8] sm:$0xff] %v6900_v49 }
0x1520   :  { %5949 = vst [vmem:[#allocation8 + $0x88] sm:$0xff] %v6901_v58 }
0x1521   :  { %v5834_v50 = vpop.f32.mrb[64].mxu0 }
0x1522   :  { %v6890_v12 = vadd.f32 %v5834_v50, %v8745_v34  ;;  %v5836_v3 = vpop.f32.mrb[65].mxu0 }
0x1523   :  { %v6891_v63 = vadd.f32 %v5836_v3, %v8747_v57  ;;  %v5838_v23 = vpop.f32.mrb[66].mxu0 }
0x1524   :  { %5950 = vst [vmem:[#allocation8 + $0x90] sm:$0xff] %v6890_v12  ;;  %v6892_v42 = vadd.f32 %v5838_v23, %v8745_v34  ;;  %v5840_v20 = vpop.f32.mrb[67].mxu0 }
0x1525   :  { %5951 = vst [vmem:[#allocation8 + $0x98] sm:$0xff] %v6891_v63  ;;  %v6893_v18 = vadd.f32 %v5840_v20, %v8747_v57 }
0x1526   :  { %5953 = vst [vmem:[#allocation8 + $0xa8] sm:$0xff] %v6892_v42 }
0x1527   :  { %5954 = vst [vmem:[#allocation8 + $0xb0] sm:$0xff] %v6893_v18 }
0x1528   :  { %7823 = shalt.err (!%p7820_p0)
}
0x1529   :  { %s7824_s7 = scalar_lea.hbm %s8781_s4, 3072 }
0x152a   :  { %p7825_p1 = scmp.ne.s32.totalorder %s8781_s4, %s7824_s7  ;;  %p7828_p2 = scmp.lt.u32.totalorder %s7824_s7, %s8781_s4 }
0x152c   :  { %p7830_p3 = pnand %p7828_p2, %p7825_p1 }
0x152e   :  { %7833 = shalt.err (!%p7830_p3)
}
0x152f   :  { %s7850_s12 = smov 384   ;;  %s7851_s1 = smov 24  }
0x1530   :  { %5967 = dma.vmem_to_hbm [thread:$0]  %s5962_s29, 3072, %s8781_s4, [#allocation4], %s7850_s12, %s7850_s12, %s7851_s1  }
0x1531   :  { %7838 = dma.done.wait [#allocation4], 3072  }
0x1532   :  { %7839 = vsyncadd [#allocation4], 4294964224 }
0x1533   :  { %5971 = vsyncpa [#allocation3], 1 }
0x1534   :  { %5972 = vsyncpa [#allocation6], 1 }
0x1535   :  { %5973 = vsyncpa [#allocation4], 1 }

</bundles_post_ra>
